<compile_context>
chip_gen: v7x
topology: tpu7x:2x2x1
jax: 0.10.0
libtpu: 0.0.40
codegen_flags: <defaults>
</compile_context>

<pallas_src>
import functools

import jax
import jax.numpy as jnp
import numpy as np
from jax.experimental import pallas as pl
from jax.experimental.pallas import tpu as pltpu

IMG_C = 3            # img_channel
WIDTH = 16           # width
DW = WIDTH * 2       # DW_Expand * width  (conv1/conv2 channels)
FFN = WIDTH * 2      # FFN_Expand * width (conv4 channels)
EPS = 1e-6           # LayerNorm2d eps
TAP_STRIDE = 128     # lane alignment of every packed-weight slice unit

# ----------------------------------------------------------------------------
# Parameter shapes (channel-major; 3x3 weights are tap-major: col = k*cin+ci)
# ----------------------------------------------------------------------------
PARAM_SHAPES = {
    'intro_w': (WIDTH, 9 * IMG_C), 'intro_b': (WIDTH, 1),
    'ln1_w': (WIDTH, 1), 'ln1_b': (WIDTH, 1),
    'c1_w': (DW, WIDTH), 'c1_b': (DW, 1),
    'c2_w': (DW, 9), 'c2_b': (DW, 1),
    'sca_w': (DW // 2, DW // 2), 'sca_b': (DW // 2, 1),
    'c3_w': (WIDTH, DW // 2), 'c3_b': (WIDTH, 1),
    'beta': (WIDTH, 1),
    'ln2_w': (WIDTH, 1), 'ln2_b': (WIDTH, 1),
    'c4_w': (FFN, WIDTH), 'c4_b': (FFN, 1),
    'c5_w': (WIDTH, FFN // 2), 'c5_b': (WIDTH, 1),
    'gamma': (WIDTH, 1),
    'end_w': (IMG_C, 9 * WIDTH), 'end_b': (IMG_C, 1),
}

# Bias vectors that survive folding (ln*/beta/gamma are folded into weights).
VEC_NAMES = ['intro_b', 'c1_b', 'c2_b', 'sca_b', 'c3_b', 'c4_b', 'c5_b',
             'end_b']
VEC_IDX = {name: i for i, name in enumerate(VEC_NAMES)}
VEC_ROWS = {name: PARAM_SHAPES[name][0] for name in VEC_NAMES}

# Packed matrix layout: (name, rows, n_taps, cols_per_tap).  Every tap block
# starts at a 128-lane-aligned offset so kernel slices are lane-aligned.
MAT_PACK = [
    ('intro_w', WIDTH, 9, IMG_C),
    ('c1_w', DW, 1, WIDTH),
    ('c2_w', DW, 1, 9),
    ('sca_w', DW // 2, 1, DW // 2),
    ('c3_w', WIDTH, 1, DW // 2),
    ('c4_w', FFN, 1, WIDTH),
    ('c5_w', WIDTH, 1, FFN // 2),
    ('end_w', IMG_C, 9, WIDTH),
]
MAT_OFF = {}
MAT_DIMS = {}
_off = 0
for _name, _rows, _taps, _cols in MAT_PACK:
  MAT_OFF[_name] = _off
  MAT_DIMS[_name] = (_rows, _taps, _cols)
  _off += _taps * TAP_STRIDE
WMAT_COLS = _off


# ----------------------------------------------------------------------------
# Pallas kernel: full NAFNet forward for one batch element per grid step.
# Layout: activations are (C, H*W_padded) slabs — channels on sublanes,
# flattened spatial (lane-dense, padded to 128) on lanes.
# ----------------------------------------------------------------------------
def _nafnet_kernel(inp_ref, wvec_ref, wmat_ref, edge_ref, out_ref,
                   pad_ref, *, img_w, img_hw):
  f32 = jnp.float32
  HWP = inp_ref.shape[-1]             # lane-padded spatial size (mult. of 128)
  HW = img_hw                         # true H*W
  W = img_w
  WP = W + 1                          # halo width of the flat padded slab

  def mat(name, tap=0):
    rows, _, cols = MAT_DIMS[name]
    off = MAT_OFF[name] + tap * TAP_STRIDE
    return wmat_ref[:rows, off:off + cols]

  def vec(name):
    rows = VEC_ROWS[name]
    j = VEC_IDX[name]
    return wvec_ref[:rows, j:j + 1]

  # Zero only the halo / lane-pad columns, once per image (interiors are
  # overwritten before every conv that reads them).
  pad_ref[:, :WP] = jnp.zeros((pad_ref.shape[0], WP), f32)
  pad_ref[:, WP + HW:] = jnp.zeros(
      (pad_ref.shape[0], pad_ref.shape[1] - (WP + HW)), f32)

  # Lane-validity masks for horizontally shifted taps (kill row-wrap columns)
  # and for the global pool (kill lane-pad columns).
  mask_l = edge_ref[0:1, :]           # 0.0 where w == 0      (for dx == 0)
  mask_r = edge_ref[1:2, :]           # 0.0 where w == W - 1  (for dx == 2)
  valid = edge_ref[2:3, :]            # 0.0 on lane-pad columns

  def write_interior(x):
    cin = x.shape[0]
    if HWP == HW:
      pad_ref[:cin, WP:WP + HW] = x
    else:
      pad_ref[:cin, WP:WP + HW] = x[:, :HW]   # keep pad columns zero

  def tap_slab(cin, k):
    dy, dx = k // 3, k % 3
    start = WP + (dy - 1) * W + (dx - 1)
    slab = pad_ref[:cin, start:start + HWP]
    if dx == 0:
      slab = slab * mask_l
    elif dx == 2:
      slab = slab * mask_r
    return slab

  def conv3x3(x, name, b):
    # 9 accumulated matmuls straight from the padded slab (no im2col).
    cin = x.shape[0]
    write_interior(x)
    acc = jnp.dot(mat(name, 0), tap_slab(cin, 0), preferred_element_type=f32)
    for k in range(1, 9):
      acc = acc + jnp.dot(mat(name, k), tap_slab(cin, k),
                          preferred_element_type=f32)
    return acc + b

  def dwconv3x3(x, b):
    # depthwise: 9 shifted MACs with per-channel tap weights.
    c = x.shape[0]
    w = mat('c2_w')                   # (c, 9), hoisted out of the loop
    write_interior(x)
    acc = tap_slab(c, 0) * w[:, 0:1]
    for k in range(1, 9):
      acc = acc + tap_slab(c, k) * w[:, k:k + 1]
    return acc + b

  def conv1x1(x, name, b):
    return jnp.dot(mat(name), x, preferred_element_type=f32) + b

  def layernorm2d(x):
    # Affine (weight/bias) is folded host-side into the following 1x1 conv.
    mu = jnp.mean(x, axis=0, keepdims=True)
    xc = x - mu
    var = jnp.mean(xc * xc, axis=0, keepdims=True)
    return xc * jax.lax.rsqrt(var + EPS)

  def simple_gate(x):
    c = x.shape[0] // 2
    return x[:c, :] * x[c:, :]

  inp = inp_ref[0].astype(f32)                               # (3, HWP)

  # ---- intro: 3x3 conv, 3 -> 16 ----
  x0 = conv3x3(inp, 'intro_w', vec('intro_b'))               # (16, HWP)

  # ---- NAFBlock(16) ----
  t = layernorm2d(x0)
  t = conv1x1(t, 'c1_w', vec('c1_b'))                        # (32, HWP) (ln1 folded)
  t = dwconv3x3(t, vec('c2_b'))                              # (32, HWP)
  t = simple_gate(t)                                         # (16, HWP)
  # SCA: global average pool (lane reduction) -> 1x1 on the pooled vector ->
  # per-channel scale.  The tiny (16,16)@(16,1) dot also performs the needed
  # sublane<->lane move, so it stays a matmul.
  if HWP == HW:
    pooled = jnp.mean(t, axis=1, keepdims=True)              # (16, 1)
  else:
    pooled = jnp.sum(t * valid, axis=1, keepdims=True) * (1.0 / HW)
  sca = jnp.dot(mat('sca_w'), pooled,
                preferred_element_type=f32) + vec('sca_b')   # (16, 1)
  t = t * sca
  t = conv1x1(t, 'c3_w', vec('c3_b'))                        # (16, HWP) (beta folded)
  # dropout is Identity (drop_out_rate = 0.0)
  y = x0 + t

  t = layernorm2d(y)
  t = conv1x1(t, 'c4_w', vec('c4_b'))                        # (32, HWP) (ln2 folded)
  t = simple_gate(t)                                         # (16, HWP)
  t = conv1x1(t, 'c5_w', vec('c5_b'))                        # (16, HWP) (gamma folded)
  z = y + t

  # ---- ending: 3x3 conv, 16 -> 3, plus global residual ----
  out = conv3x3(z, 'end_w', vec('end_b'))                    # (3, HWP)
  out_ref[0] = (out + inp).astype(out_ref.dtype)


# ----------------------------------------------------------------------------
# Host wrapper
# ----------------------------------------------------------------------------
def init_params(key):
  # Deterministic synthetic init.  NOTE: PyTorch zero-inits beta/gamma (which
  # would make the NAFBlock an identity map); we use small random values
  # everywhere so the whole compute path is exercised.
  params = {}
  for name, shape in PARAM_SHAPES.items():
    key, sub = jax.random.split(key)
    params[name] = 0.2 * jax.random.normal(sub, shape, jnp.float32)
  return params


def pack_params(p):
  """Fold LN-affine / beta / gamma into the 1x1 convs and pack into 2 arrays."""
  p = {k: np.asarray(v, np.float32) for k, v in p.items()}

  folded = dict(p)
  # LayerNorm affine into the following 1x1 conv:  W' = W * ln_w^T,
  # b' = W @ ln_b + b (LN reduction stays in-kernel, only scale/shift moves).
  folded['c1_w'] = p['c1_w'] * p['ln1_w'][:, 0][None, :]
  folded['c1_b'] = p['c1_b'] + p['c1_w'] @ p['ln1_b']
  folded['c4_w'] = p['c4_w'] * p['ln2_w'][:, 0][None, :]
  folded['c4_b'] = p['c4_b'] + p['c4_w'] @ p['ln2_b']
  # beta into conv3, gamma into conv5 (per-output-channel row scale).
  folded['c3_w'] = p['c3_w'] * p['beta']
  folded['c3_b'] = p['c3_b'] * p['beta']
  folded['c5_w'] = p['c5_w'] * p['gamma']
  folded['c5_b'] = p['c5_b'] * p['gamma']

  wvec = np.zeros((DW, len(VEC_NAMES)), np.float32)
  for j, name in enumerate(VEC_NAMES):
    v = folded[name]
    wvec[:v.shape[0], j] = v[:, 0]

  wmat = np.zeros((DW, WMAT_COLS), np.float32)
  for name, rows, taps, cols in MAT_PACK:
    m = folded[name]                       # (rows, taps*cols), tap-major
    off = MAT_OFF[name]
    for k in range(taps):
      wmat[:rows, off + k * TAP_STRIDE: off + k * TAP_STRIDE + cols] = \
          m[:, k * cols:(k + 1) * cols]
  return jnp.asarray(wvec), jnp.asarray(wmat)


def nafnet_forward(inp_nchw, params):
  N, C, H, W = inp_nchw.shape
  assert C == IMG_C
  HW = H * W
  HWP = -(-HW // 128) * 128                # lane-dense spatial size

  # NCHW -> (N, C, H*W): a pure reshape (no transpose round-trip); channels
  # land on sublanes, flattened spatial on lanes.  Pad lanes to 128.
  inp_flat = inp_nchw.reshape(N, C, HW)
  if HWP != HW:
    inp_flat = jnp.pad(inp_flat, ((0, 0), (0, 0), (0, HWP - HW)))

  wvec, wmat = pack_params(params)

  # Column-validity masks (row-wrap kill for shifted taps, lane-pad kill for
  # the global pool).  Constant block index => DMA'd once, not per image.
  col = np.arange(HWP, dtype=np.int64)
  edge = jnp.asarray(np.stack([
      (col % W != 0),                      # mask_l (dx == 0)
      (col % W != W - 1),                  # mask_r (dx == 2)
      (col < HW),                          # valid lanes
  ]).astype(np.float32))                   # (3, HWP)

  # Explicit scoped-VMEM budget: pad slab + double-buffered I/O + packed
  # weights + a conservative count of live (<=32, HWP) f32 activation temps.
  pad_cols = HWP + 2 * (W + 1)
  need = (DW * pad_cols * 4                      # pad_ref scratch
          + 2 * 2 * 8 * HWP * 4                  # in/out blocks, double-buffered
          + DW * WMAT_COLS * 4 + DW * 128 * 4    # packed weights
          + 8 * HWP * 4                          # edge masks
          + 12 * DW * HWP * 4)                   # live activation temps
  vmem_limit = int(min(128 << 20, max(32 << 20, 2 * need)))

  kernel = functools.partial(_nafnet_kernel, img_w=W, img_hw=HW)

  def full_spec(a):
    nd = a.ndim
    return pl.BlockSpec(a.shape, lambda n, _nd=nd: (0,) * _nd)

  out = pl.pallas_call(
      kernel,
      out_shape=jax.ShapeDtypeStruct((N, IMG_C, HWP), jnp.float32),
      grid_spec=pltpu.PrefetchScalarGridSpec(
          num_scalar_prefetch=0,
          grid=(N,),
          in_specs=[pl.BlockSpec((1, IMG_C, HWP), lambda n: (n, 0, 0)),
                    full_spec(wvec), full_spec(wmat), full_spec(edge)],
          out_specs=pl.BlockSpec((1, IMG_C, HWP), lambda n: (n, 0, 0)),
          scratch_shapes=[
              pltpu.VMEM((DW, pad_cols), jnp.float32),   # halo-padded slab
          ],
      ),
      compiler_params=pltpu.CompilerParams(
          dimension_semantics=("parallel",),
          vmem_limit_bytes=vmem_limit),
  )(inp_flat, wvec, wmat, edge)

  return out[:, :, :HW].reshape(N, IMG_C, H, W)


# ----------------------------------------------------------------------------
# Pure-JAX reference (NCHW), original (unfolded) math, for validation.
# ----------------------------------------------------------------------------
def _ref_conv3x3(x, w, b):
  N, cin, H, W = x.shape
  cout = w.shape[0]
  xp = jnp.pad(x, ((0, 0), (0, 0), (1, 1), (1, 1)))
  out = jnp.zeros((N, cout, H, W), jnp.float32)
  for k in range(9):
    dy, dx = k // 3, k % 3
    wk = w[:, k * cin:(k + 1) * cin]
    out = out + jnp.einsum('oc,nchw->nohw', wk,
                           xp[:, :, dy:dy + H, dx:dx + W],
                           precision=jax.lax.Precision.HIGHEST)
  return out + b[None, :, :, None]


def _ref_dwconv3x3(x, w, b):
  N, c, H, W = x.shape
  xp = jnp.pad(x, ((0, 0), (0, 0), (1, 1), (1, 1)))
  out = jnp.zeros_like(x)
  for k in range(9):
    dy, dx = k // 3, k % 3
    out = out + xp[:, :, dy:dy + H, dx:dx + W] * w[:, k][None, :, None, None]
  return out + b[None, :, :, None]


def nafnet_ref(x_nchw, p):
  HIGH = jax.lax.Precision.HIGHEST

  def bc(v):                       # (C, 1) -> (1, C, 1, 1)
    return v[None, :, :, None]

  def ln(t, w, b):
    mu = jnp.mean(t, axis=1, keepdims=True)
    var = jnp.mean((t - mu) ** 2, axis=1, keepdims=True)
    return (t - mu) / jnp.sqrt(var + EPS) * bc(w) + bc(b)

  def c11(t, w, b):
    return jnp.einsum('oc,nchw->nohw', w, t, precision=HIGH) + bc(b)

  def sg(t):
    c = t.shape[1] // 2
    return t[:, :c] * t[:, c:]

  x0 = _ref_conv3x3(x_nchw, p['intro_w'], p['intro_b'])
  t = ln(x0, p['ln1_w'], p['ln1_b'])
  t = c11(t, p['c1_w'], p['c1_b'])
  t = _ref_dwconv3x3(t, p['c2_w'], p['c2_b'])
  t = sg(t)
  pooled = jnp.mean(t, axis=(2, 3), keepdims=True)
  sca = jnp.einsum('oc,nchw->nohw', p['sca_w'], pooled,
                   precision=HIGH) + bc(p['sca_b'])
  t = t * sca
  t = c11(t, p['c3_w'], p['c3_b'])
  y = x0 + t * bc(p['beta'])
  t = ln(y, p['ln2_w'], p['ln2_b'])
  t = c11(t, p['c4_w'], p['c4_b'])
  t = sg(t)
  t = c11(t, p['c5_w'], p['c5_b'])
  z = y + t * bc(p['gamma'])
  out = _ref_conv3x3(z, p['end_w'], p['end_b'])
  return out + x_nchw


if __name__ == "__main__":
  key = jax.random.PRNGKey(0)
  kx, kp = jax.random.split(key)

  N, H, W = 2, 16, 16
  inp_nchw = jax.random.normal(kx, (N, IMG_C, H, W), jnp.float32)
  params = init_params(kp)

  out = nafnet_forward(inp_nchw, params)
  out = jax.block_until_ready(out)
  assert out.shape == inp_nchw.shape and out.dtype == jnp.float32

  # validate against the pure-JAX reference (same math, no Pallas, no folding)
  ref = nafnet_ref(inp_nchw, params)
  np.testing.assert_allclose(np.asarray(out), np.asarray(ref),
                             rtol=2e-3, atol=2e-3)

  print("KERNEL_OK")
</pallas_src>

<mosaic_0001>
module attributes {stable_mosaic.version = 11 : i64} {
  func.func @_nafnet_kernel(%arg0: i32, %arg1: memref<1x3x256xf32, #tpu.memory_space<vmem>>, %arg2: memref<32x8xf32, #tpu.memory_space<vmem>>, %arg3: memref<32x3072xf32, #tpu.memory_space<vmem>>, %arg4: memref<3x256xf32, #tpu.memory_space<vmem>>, %arg5: memref<1x3x256xf32, #tpu.memory_space<vmem>>, %arg6: memref<32x290xf32, #tpu.memory_space<vmem>>) attributes {dimension_semantics = [#tpu.dimension_semantics<parallel>], iteration_bounds = array<i64: 2>, scalar_prefetch = 0 : i64, scratch_operands = 1 : i64, tpu.core_type = #tpu.core_type<tc>, window_params = [{transform_indices = @transform_0, window_bounds = array<i64: 1, 3, 256>}, {pipeline_mode = #tpu.pipeline_mode<synchronous>, transform_indices = @transform_1, window_bounds = array<i64: 32, 8>}, {pipeline_mode = #tpu.pipeline_mode<synchronous>, transform_indices = @transform_2, window_bounds = array<i64: 32, 3072>}, {pipeline_mode = #tpu.pipeline_mode<synchronous>, transform_indices = @transform_3, window_bounds = array<i64: 3, 256>}, {transform_indices = @transform_4, window_bounds = array<i64: 1, 3, 256>}]} {
    %cst = arith.constant 0.000000e+00 : f32
    %0 = vector.broadcast %cst : f32 to vector<32x17xf32>
    %c0 = arith.constant 0 : index
    %c0_0 = arith.constant 0 : index
    %1 = vector.load %arg6[%c0, %c0_0] : memref<32x290xf32, #tpu.memory_space<vmem>>, vector<32x17xf32>
    tpu.vector_store %arg6[%c0, %c0_0], %0 {strides = array<i32>} : memref<32x290xf32, #tpu.memory_space<vmem>>, vector<32x17xf32>,
    %cst_1 = arith.constant 0.000000e+00 : f32
    %2 = vector.broadcast %cst_1 : f32 to vector<32x17xf32>
    %c0_2 = arith.constant 0 : index
    %c273 = arith.constant 273 : index
    %3 = vector.load %arg6[%c0_2, %c273] : memref<32x290xf32, #tpu.memory_space<vmem>>, vector<32x17xf32>
    tpu.vector_store %arg6[%c0_2, %c273], %2 {strides = array<i32>} : memref<32x290xf32, #tpu.memory_space<vmem>>, vector<32x17xf32>,
    %c0_3 = arith.constant 0 : index
    %c0_4 = arith.constant 0 : index
    %4 = vector.load %arg4[%c0_3, %c0_4] : memref<3x256xf32, #tpu.memory_space<vmem>>, vector<1x256xf32>
    %c1 = arith.constant 1 : index
    %c0_5 = arith.constant 0 : index
    %5 = vector.load %arg4[%c1, %c0_5] : memref<3x256xf32, #tpu.memory_space<vmem>>, vector<1x256xf32>
    %c0_6 = arith.constant 0 : index
    %c0_7 = arith.constant 0 : index
    %c0_8 = arith.constant 0 : index
    %6 = vector.load %arg1[%c0_6, %c0_7, %c0_8] : memref<1x3x256xf32, #tpu.memory_space<vmem>>, vector<1x3x256xf32>
    %7 = vector.shape_cast %6 : vector<1x3x256xf32> to vector<3x256xf32>
    %c0_9 = arith.constant 0 : index
    %c0_10 = arith.constant 0 : index
    %8 = vector.load %arg2[%c0_9, %c0_10] : memref<32x8xf32, #tpu.memory_space<vmem>>, vector<16x1xf32>
    %c0_11 = arith.constant 0 : index
    %c17 = arith.constant 17 : index
    %9 = vector.load %arg6[%c0_11, %c17] : memref<32x290xf32, #tpu.memory_space<vmem>>, vector<3x256xf32>
    tpu.vector_store %arg6[%c0_11, %c17], %7 {strides = array<i32>} : memref<32x290xf32, #tpu.memory_space<vmem>>, vector<3x256xf32>,
    %c0_12 = arith.constant 0 : index
    %c0_13 = arith.constant 0 : index
    %10 = vector.load %arg3[%c0_12, %c0_13] : memref<32x3072xf32, #tpu.memory_space<vmem>>, vector<16x3xf32>
    %c0_14 = arith.constant 0 : index
    %c0_15 = arith.constant 0 : index
    %11 = vector.load %arg6[%c0_14, %c0_15] : memref<32x290xf32, #tpu.memory_space<vmem>>, vector<3x256xf32>
    %12 = vector.broadcast %4 : vector<1x256xf32> to vector<3x256xf32>
    %13 = arith.mulf %11, %12 : vector<3x256xf32>
    %cst_16 = arith.constant dense<0.000000e+00> : vector<16x256xf32>
    %14 = tpu.matmul %10, %13, %cst_16 {dimension_numbers = #tpu.dot_dimension_numbers<[1], [0], [0], [1], [0, 0, 1, 1], [], []>} : vector<16x3xf32>, vector<3x256xf32>, vector<16x256xf32> -> vector<16x256xf32>
    %c0_17 = arith.constant 0 : index
    %c128 = arith.constant 128 : index
    %15 = vector.load %arg3[%c0_17, %c128] : memref<32x3072xf32, #tpu.memory_space<vmem>>, vector<16x3xf32>
    %c0_18 = arith.constant 0 : index
    %c1_19 = arith.constant 1 : index
    %16 = vector.load %arg6[%c0_18, %c1_19] : memref<32x290xf32, #tpu.memory_space<vmem>>, vector<3x256xf32>
    %cst_20 = arith.constant dense<0.000000e+00> : vector<16x256xf32>
    %17 = tpu.matmul %15, %16, %cst_20 {dimension_numbers = #tpu.dot_dimension_numbers<[1], [0], [0], [1], [0, 0, 1, 1], [], []>} : vector<16x3xf32>, vector<3x256xf32>, vector<16x256xf32> -> vector<16x256xf32>
    %18 = arith.addf %14, %17 : vector<16x256xf32>
    %c0_21 = arith.constant 0 : index
    %c256 = arith.constant 256 : index
    %19 = vector.load %arg3[%c0_21, %c256] : memref<32x3072xf32, #tpu.memory_space<vmem>>, vector<16x3xf32>
    %c0_22 = arith.constant 0 : index
    %c2 = arith.constant 2 : index
    %20 = vector.load %arg6[%c0_22, %c2] : memref<32x290xf32, #tpu.memory_space<vmem>>, vector<3x256xf32>
    %21 = vector.broadcast %5 : vector<1x256xf32> to vector<3x256xf32>
    %22 = arith.mulf %20, %21 : vector<3x256xf32>
    %cst_23 = arith.constant dense<0.000000e+00> : vector<16x256xf32>
    %23 = tpu.matmul %19, %22, %cst_23 {dimension_numbers = #tpu.dot_dimension_numbers<[1], [0], [0], [1], [0, 0, 1, 1], [], []>} : vector<16x3xf32>, vector<3x256xf32>, vector<16x256xf32> -> vector<16x256xf32>
    %24 = arith.addf %18, %23 : vector<16x256xf32>
    %c0_24 = arith.constant 0 : index
    %c384 = arith.constant 384 : index
    %25 = vector.load %arg3[%c0_24, %c384] : memref<32x3072xf32, #tpu.memory_space<vmem>>, vector<16x3xf32>
    %c0_25 = arith.constant 0 : index
    %c16 = arith.constant 16 : index
    %26 = vector.load %arg6[%c0_25, %c16] : memref<32x290xf32, #tpu.memory_space<vmem>>, vector<3x256xf32>
    %27 = vector.broadcast %4 : vector<1x256xf32> to vector<3x256xf32>
    %28 = arith.mulf %26, %27 : vector<3x256xf32>
    %cst_26 = arith.constant dense<0.000000e+00> : vector<16x256xf32>
    %29 = tpu.matmul %25, %28, %cst_26 {dimension_numbers = #tpu.dot_dimension_numbers<[1], [0], [0], [1], [0, 0, 1, 1], [], []>} : vector<16x3xf32>, vector<3x256xf32>, vector<16x256xf32> -> vector<16x256xf32>
    %30 = arith.addf %24, %29 : vector<16x256xf32>
    %c0_27 = arith.constant 0 : index
    %c512 = arith.constant 512 : index
    %31 = vector.load %arg3[%c0_27, %c512] : memref<32x3072xf32, #tpu.memory_space<vmem>>, vector<16x3xf32>
    %c0_28 = arith.constant 0 : index
    %c17_29 = arith.constant 17 : index
    %32 = vector.load %arg6[%c0_28, %c17_29] : memref<32x290xf32, #tpu.memory_space<vmem>>, vector<3x256xf32>
    %cst_30 = arith.constant dense<0.000000e+00> : vector<16x256xf32>
    %33 = tpu.matmul %31, %32, %cst_30 {dimension_numbers = #tpu.dot_dimension_numbers<[1], [0], [0], [1], [0, 0, 1, 1], [], []>} : vector<16x3xf32>, vector<3x256xf32>, vector<16x256xf32> -> vector<16x256xf32>
    %34 = arith.addf %30, %33 : vector<16x256xf32>
    %c0_31 = arith.constant 0 : index
    %c640 = arith.constant 640 : index
    %35 = vector.load %arg3[%c0_31, %c640] : memref<32x3072xf32, #tpu.memory_space<vmem>>, vector<16x3xf32>
    %c0_32 = arith.constant 0 : index
    %c18 = arith.constant 18 : index
    %36 = vector.load %arg6[%c0_32, %c18] : memref<32x290xf32, #tpu.memory_space<vmem>>, vector<3x256xf32>
    %37 = vector.broadcast %5 : vector<1x256xf32> to vector<3x256xf32>
    %38 = arith.mulf %36, %37 : vector<3x256xf32>
    %cst_33 = arith.constant dense<0.000000e+00> : vector<16x256xf32>
    %39 = tpu.matmul %35, %38, %cst_33 {dimension_numbers = #tpu.dot_dimension_numbers<[1], [0], [0], [1], [0, 0, 1, 1], [], []>} : vector<16x3xf32>, vector<3x256xf32>, vector<16x256xf32> -> vector<16x256xf32>
    %40 = arith.addf %34, %39 : vector<16x256xf32>
    %c0_34 = arith.constant 0 : index
    %c768 = arith.constant 768 : index
    %41 = vector.load %arg3[%c0_34, %c768] : memref<32x3072xf32, #tpu.memory_space<vmem>>, vector<16x3xf32>
    %c0_35 = arith.constant 0 : index
    %c32 = arith.constant 32 : index
    %42 = vector.load %arg6[%c0_35, %c32] : memref<32x290xf32, #tpu.memory_space<vmem>>, vector<3x256xf32>
    %43 = vector.broadcast %4 : vector<1x256xf32> to vector<3x256xf32>
    %44 = arith.mulf %42, %43 : vector<3x256xf32>
    %cst_36 = arith.constant dense<0.000000e+00> : vector<16x256xf32>
    %45 = tpu.matmul %41, %44, %cst_36 {dimension_numbers = #tpu.dot_dimension_numbers<[1], [0], [0], [1], [0, 0, 1, 1], [], []>} : vector<16x3xf32>, vector<3x256xf32>, vector<16x256xf32> -> vector<16x256xf32>
    %46 = arith.addf %40, %45 : vector<16x256xf32>
    %c0_37 = arith.constant 0 : index
    %c896 = arith.constant 896 : index
    %47 = vector.load %arg3[%c0_37, %c896] : memref<32x3072xf32, #tpu.memory_space<vmem>>, vector<16x3xf32>
    %c0_38 = arith.constant 0 : index
    %c33 = arith.constant 33 : index
    %48 = vector.load %arg6[%c0_38, %c33] : memref<32x290xf32, #tpu.memory_space<vmem>>, vector<3x256xf32>
    %cst_39 = arith.constant dense<0.000000e+00> : vector<16x256xf32>
    %49 = tpu.matmul %47, %48, %cst_39 {dimension_numbers = #tpu.dot_dimension_numbers<[1], [0], [0], [1], [0, 0, 1, 1], [], []>} : vector<16x3xf32>, vector<3x256xf32>, vector<16x256xf32> -> vector<16x256xf32>
    %50 = arith.addf %46, %49 : vector<16x256xf32>
    %c0_40 = arith.constant 0 : index
    %c1024 = arith.constant 1024 : index
    %51 = vector.load %arg3[%c0_40, %c1024] : memref<32x3072xf32, #tpu.memory_space<vmem>>, vector<16x3xf32>
    %c0_41 = arith.constant 0 : index
    %c34 = arith.constant 34 : index
    %52 = vector.load %arg6[%c0_41, %c34] : memref<32x290xf32, #tpu.memory_space<vmem>>, vector<3x256xf32>
    %53 = vector.broadcast %5 : vector<1x256xf32> to vector<3x256xf32>
    %54 = arith.mulf %52, %53 : vector<3x256xf32>
    %cst_42 = arith.constant dense<0.000000e+00> : vector<16x256xf32>
    %55 = tpu.matmul %51, %54, %cst_42 {dimension_numbers = #tpu.dot_dimension_numbers<[1], [0], [0], [1], [0, 0, 1, 1], [], []>} : vector<16x3xf32>, vector<3x256xf32>, vector<16x256xf32> -> vector<16x256xf32>
    %56 = arith.addf %50, %55 : vector<16x256xf32>
    %57 = vector.broadcast %8 : vector<16x1xf32> to vector<16x256xf32>
    %58 = arith.addf %56, %57 : vector<16x256xf32>
    %cst_43 = arith.constant dense<0.000000e+00> : vector<256xf32>
    %59 = vector.multi_reduction <add>, %58, %cst_43 [0] : vector<16x256xf32> to vector<256xf32>
    %60 = vector.shape_cast %59 : vector<256xf32> to vector<1x256xf32>
    %cst_44 = arith.constant 1.600000e+01 : f32
    %61 = vector.broadcast %cst_44 : f32 to vector<1x256xf32>
    %62 = arith.divf %60, %61 : vector<1x256xf32>
    %63 = vector.broadcast %62 : vector<1x256xf32> to vector<16x256xf32>
    %64 = arith.subf %58, %63 : vector<16x256xf32>
    %65 = arith.mulf %64, %64 : vector<16x256xf32>
    %cst_45 = arith.constant dense<0.000000e+00> : vector<256xf32>
    %66 = vector.multi_reduction <add>, %65, %cst_45 [0] : vector<16x256xf32> to vector<256xf32>
    %67 = vector.shape_cast %66 : vector<256xf32> to vector<1x256xf32>
    %cst_46 = arith.constant 1.600000e+01 : f32
    %68 = vector.broadcast %cst_46 : f32 to vector<1x256xf32>
    %69 = arith.divf %67, %68 : vector<1x256xf32>
    %cst_47 = arith.constant 9.99999997E-7 : f32
    %70 = vector.broadcast %cst_47 : f32 to vector<1x256xf32>
    %71 = arith.addf %69, %70 : vector<1x256xf32>
    %72 = math.rsqrt %71 : vector<1x256xf32>
    %73 = vector.broadcast %72 : vector<1x256xf32> to vector<16x256xf32>
    %74 = arith.mulf %64, %73 : vector<16x256xf32>
    %c0_48 = arith.constant 0 : index
    %c1_49 = arith.constant 1 : index
    %75 = vector.load %arg2[%c0_48, %c1_49] : memref<32x8xf32, #tpu.memory_space<vmem>>, vector<32x1xf32>
    %c0_50 = arith.constant 0 : index
    %c1152 = arith.constant 1152 : index
    %76 = vector.load %arg3[%c0_50, %c1152] : memref<32x3072xf32, #tpu.memory_space<vmem>>, vector<32x16xf32>
    %cst_51 = arith.constant dense<0.000000e+00> : vector<32x256xf32>
    %77 = tpu.matmul %76, %74, %cst_51 {dimension_numbers = #tpu.dot_dimension_numbers<[1], [0], [0], [1], [0, 0, 1, 1], [], []>} : vector<32x16xf32>, vector<16x256xf32>, vector<32x256xf32> -> vector<32x256xf32>
    %78 = vector.broadcast %75 : vector<32x1xf32> to vector<32x256xf32>
    %79 = arith.addf %77, %78 : vector<32x256xf32>
    %c0_52 = arith.constant 0 : index
    %c2_53 = arith.constant 2 : index
    %80 = vector.load %arg2[%c0_52, %c2_53] : memref<32x8xf32, #tpu.memory_space<vmem>>, vector<32x1xf32>
    %c0_54 = arith.constant 0 : index
    %c1280 = arith.constant 1280 : index
    %81 = vector.load %arg3[%c0_54, %c1280] : memref<32x3072xf32, #tpu.memory_space<vmem>>, vector<32x9xf32>
    %c0_55 = arith.constant 0 : index
    %c17_56 = arith.constant 17 : index
    %82 = vector.load %arg6[%c0_55, %c17_56] : memref<32x290xf32, #tpu.memory_space<vmem>>, vector<32x256xf32>
    tpu.vector_store %arg6[%c0_55, %c17_56], %79 {strides = array<i32>} : memref<32x290xf32, #tpu.memory_space<vmem>>, vector<32x256xf32>,
    %c0_57 = arith.constant 0 : index
    %c0_58 = arith.constant 0 : index
    %83 = vector.load %arg6[%c0_57, %c0_58] : memref<32x290xf32, #tpu.memory_space<vmem>>, vector<32x256xf32>
    %84 = vector.broadcast %4 : vector<1x256xf32> to vector<32x256xf32>
    %85 = arith.mulf %83, %84 : vector<32x256xf32>
    %86 = vector.extract_strided_slice %81 {offsets = [0, 0], sizes = [32, 1], strides = [1, 1]} : vector<32x9xf32> to vector<32x1xf32>
    %87 = vector.broadcast %86 : vector<32x1xf32> to vector<32x256xf32>
    %88 = arith.mulf %85, %87 : vector<32x256xf32>
    %c0_59 = arith.constant 0 : index
    %c1_60 = arith.constant 1 : index
    %89 = vector.load %arg6[%c0_59, %c1_60] : memref<32x290xf32, #tpu.memory_space<vmem>>, vector<32x256xf32>
    %90 = vector.extract_strided_slice %81 {offsets = [0, 1], sizes = [32, 1], strides = [1, 1]} : vector<32x9xf32> to vector<32x1xf32>
    %91 = vector.broadcast %90 : vector<32x1xf32> to vector<32x256xf32>
    %92 = arith.mulf %89, %91 : vector<32x256xf32>
    %93 = arith.addf %88, %92 : vector<32x256xf32>
    %c0_61 = arith.constant 0 : index
    %c2_62 = arith.constant 2 : index
    %94 = vector.load %arg6[%c0_61, %c2_62] : memref<32x290xf32, #tpu.memory_space<vmem>>, vector<32x256xf32>
    %95 = vector.broadcast %5 : vector<1x256xf32> to vector<32x256xf32>
    %96 = arith.mulf %94, %95 : vector<32x256xf32>
    %97 = vector.extract_strided_slice %81 {offsets = [0, 2], sizes = [32, 1], strides = [1, 1]} : vector<32x9xf32> to vector<32x1xf32>
    %98 = vector.broadcast %97 : vector<32x1xf32> to vector<32x256xf32>
    %99 = arith.mulf %96, %98 : vector<32x256xf32>
    %100 = arith.addf %93, %99 : vector<32x256xf32>
    %c0_63 = arith.constant 0 : index
    %c16_64 = arith.constant 16 : index
    %101 = vector.load %arg6[%c0_63, %c16_64] : memref<32x290xf32, #tpu.memory_space<vmem>>, vector<32x256xf32>
    %102 = vector.broadcast %4 : vector<1x256xf32> to vector<32x256xf32>
    %103 = arith.mulf %101, %102 : vector<32x256xf32>
    %104 = vector.extract_strided_slice %81 {offsets = [0, 3], sizes = [32, 1], strides = [1, 1]} : vector<32x9xf32> to vector<32x1xf32>
    %105 = vector.broadcast %104 : vector<32x1xf32> to vector<32x256xf32>
    %106 = arith.mulf %103, %105 : vector<32x256xf32>
    %107 = arith.addf %100, %106 : vector<32x256xf32>
    %c0_65 = arith.constant 0 : index
    %c17_66 = arith.constant 17 : index
    %108 = vector.load %arg6[%c0_65, %c17_66] : memref<32x290xf32, #tpu.memory_space<vmem>>, vector<32x256xf32>
    %109 = vector.extract_strided_slice %81 {offsets = [0, 4], sizes = [32, 1], strides = [1, 1]} : vector<32x9xf32> to vector<32x1xf32>
    %110 = vector.broadcast %109 : vector<32x1xf32> to vector<32x256xf32>
    %111 = arith.mulf %108, %110 : vector<32x256xf32>
    %112 = arith.addf %107, %111 : vector<32x256xf32>
    %c0_67 = arith.constant 0 : index
    %c18_68 = arith.constant 18 : index
    %113 = vector.load %arg6[%c0_67, %c18_68] : memref<32x290xf32, #tpu.memory_space<vmem>>, vector<32x256xf32>
    %114 = vector.broadcast %5 : vector<1x256xf32> to vector<32x256xf32>
    %115 = arith.mulf %113, %114 : vector<32x256xf32>
    %116 = vector.extract_strided_slice %81 {offsets = [0, 5], sizes = [32, 1], strides = [1, 1]} : vector<32x9xf32> to vector<32x1xf32>
    %117 = vector.broadcast %116 : vector<32x1xf32> to vector<32x256xf32>
    %118 = arith.mulf %115, %117 : vector<32x256xf32>
    %119 = arith.addf %112, %118 : vector<32x256xf32>
    %c0_69 = arith.constant 0 : index
    %c32_70 = arith.constant 32 : index
    %120 = vector.load %arg6[%c0_69, %c32_70] : memref<32x290xf32, #tpu.memory_space<vmem>>, vector<32x256xf32>
    %121 = vector.broadcast %4 : vector<1x256xf32> to vector<32x256xf32>
    %122 = arith.mulf %120, %121 : vector<32x256xf32>
    %123 = vector.extract_strided_slice %81 {offsets = [0, 6], sizes = [32, 1], strides = [1, 1]} : vector<32x9xf32> to vector<32x1xf32>
    %124 = vector.broadcast %123 : vector<32x1xf32> to vector<32x256xf32>
    %125 = arith.mulf %122, %124 : vector<32x256xf32>
    %126 = arith.addf %119, %125 : vector<32x256xf32>
    %c0_71 = arith.constant 0 : index
    %c33_72 = arith.constant 33 : index
    %127 = vector.load %arg6[%c0_71, %c33_72] : memref<32x290xf32, #tpu.memory_space<vmem>>, vector<32x256xf32>
    %128 = vector.extract_strided_slice %81 {offsets = [0, 7], sizes = [32, 1], strides = [1, 1]} : vector<32x9xf32> to vector<32x1xf32>
    %129 = vector.broadcast %128 : vector<32x1xf32> to vector<32x256xf32>
    %130 = arith.mulf %127, %129 : vector<32x256xf32>
    %131 = arith.addf %126, %130 : vector<32x256xf32>
    %c0_73 = arith.constant 0 : index
    %c34_74 = arith.constant 34 : index
    %132 = vector.load %arg6[%c0_73, %c34_74] : memref<32x290xf32, #tpu.memory_space<vmem>>, vector<32x256xf32>
    %133 = vector.broadcast %5 : vector<1x256xf32> to vector<32x256xf32>
    %134 = arith.mulf %132, %133 : vector<32x256xf32>
    %135 = vector.extract_strided_slice %81 {offsets = [0, 8], sizes = [32, 1], strides = [1, 1]} : vector<32x9xf32> to vector<32x1xf32>
    %136 = vector.broadcast %135 : vector<32x1xf32> to vector<32x256xf32>
    %137 = arith.mulf %134, %136 : vector<32x256xf32>
    %138 = arith.addf %131, %137 : vector<32x256xf32>
    %139 = vector.broadcast %80 : vector<32x1xf32> to vector<32x256xf32>
    %140 = arith.addf %138, %139 : vector<32x256xf32>
    %141 = vector.extract_strided_slice %140 {offsets = [0, 0], sizes = [16, 256], strides = [1, 1]} : vector<32x256xf32> to vector<16x256xf32>
    %142 = vector.extract_strided_slice %140 {offsets = [16, 0], sizes = [16, 256], strides = [1, 1]} : vector<32x256xf32> to vector<16x256xf32>
    %143 = arith.mulf %141, %142 : vector<16x256xf32>
    %cst_75 = arith.constant dense<0.000000e+00> : vector<16xf32>
    %144 = vector.multi_reduction <add>, %143, %cst_75 [1] : vector<16x256xf32> to vector<16xf32>
    %145 = vector.shape_cast %144 : vector<16xf32> to vector<16x1xf32>
    %cst_76 = arith.constant 2.560000e+02 : f32
    %146 = vector.broadcast %cst_76 : f32 to vector<16x1xf32>
    %147 = arith.divf %145, %146 : vector<16x1xf32>
    %c0_77 = arith.constant 0 : index
    %c1408 = arith.constant 1408 : index
    %148 = vector.load %arg3[%c0_77, %c1408] : memref<32x3072xf32, #tpu.memory_space<vmem>>, vector<16x16xf32>
    %cst_78 = arith.constant dense<0.000000e+00> : vector<16x1xf32>
    %149 = tpu.matmul %148, %147, %cst_78 {dimension_numbers = #tpu.dot_dimension_numbers<[1], [0], [0], [1], [0, 0, 1, 1], [], []>} : vector<16x16xf32>, vector<16x1xf32>, vector<16x1xf32> -> vector<16x1xf32>
    %c0_79 = arith.constant 0 : index
    %c3 = arith.constant 3 : index
    %150 = vector.load %arg2[%c0_79, %c3] : memref<32x8xf32, #tpu.memory_space<vmem>>, vector<16x1xf32>
    %151 = arith.addf %149, %150 : vector<16x1xf32>
    %152 = vector.broadcast %151 : vector<16x1xf32> to vector<16x256xf32>
    %153 = arith.mulf %143, %152 : vector<16x256xf32>
    %c0_80 = arith.constant 0 : index
    %c4 = arith.constant 4 : index
    %154 = vector.load %arg2[%c0_80, %c4] : memref<32x8xf32, #tpu.memory_space<vmem>>, vector<16x1xf32>
    %c0_81 = arith.constant 0 : index
    %c1536 = arith.constant 1536 : index
    %155 = vector.load %arg3[%c0_81, %c1536] : memref<32x3072xf32, #tpu.memory_space<vmem>>, vector<16x16xf32>
    %cst_82 = arith.constant dense<0.000000e+00> : vector<16x256xf32>
    %156 = tpu.matmul %155, %153, %cst_82 {dimension_numbers = #tpu.dot_dimension_numbers<[1], [0], [0], [1], [0, 0, 1, 1], [], []>} : vector<16x16xf32>, vector<16x256xf32>, vector<16x256xf32> -> vector<16x256xf32>
    %157 = vector.broadcast %154 : vector<16x1xf32> to vector<16x256xf32>
    %158 = arith.addf %156, %157 : vector<16x256xf32>
    %159 = arith.addf %58, %158 : vector<16x256xf32>
    %cst_83 = arith.constant dense<0.000000e+00> : vector<256xf32>
    %160 = vector.multi_reduction <add>, %159, %cst_83 [0] : vector<16x256xf32> to vector<256xf32>
    %161 = vector.shape_cast %160 : vector<256xf32> to vector<1x256xf32>
    %cst_84 = arith.constant 1.600000e+01 : f32
    %162 = vector.broadcast %cst_84 : f32 to vector<1x256xf32>
    %163 = arith.divf %161, %162 : vector<1x256xf32>
    %164 = vector.broadcast %163 : vector<1x256xf32> to vector<16x256xf32>
    %165 = arith.subf %159, %164 : vector<16x256xf32>
    %166 = arith.mulf %165, %165 : vector<16x256xf32>
    %cst_85 = arith.constant dense<0.000000e+00> : vector<256xf32>
    %167 = vector.multi_reduction <add>, %166, %cst_85 [0] : vector<16x256xf32> to vector<256xf32>
    %168 = vector.shape_cast %167 : vector<256xf32> to vector<1x256xf32>
    %cst_86 = arith.constant 1.600000e+01 : f32
    %169 = vector.broadcast %cst_86 : f32 to vector<1x256xf32>
    %170 = arith.divf %168, %169 : vector<1x256xf32>
    %cst_87 = arith.constant 9.99999997E-7 : f32
    %171 = vector.broadcast %cst_87 : f32 to vector<1x256xf32>
    %172 = arith.addf %170, %171 : vector<1x256xf32>
    %173 = math.rsqrt %172 : vector<1x256xf32>
    %174 = vector.broadcast %173 : vector<1x256xf32> to vector<16x256xf32>
    %175 = arith.mulf %165, %174 : vector<16x256xf32>
    %c0_88 = arith.constant 0 : index
    %c5 = arith.constant 5 : index
    %176 = vector.load %arg2[%c0_88, %c5] : memref<32x8xf32, #tpu.memory_space<vmem>>, vector<32x1xf32>
    %c0_89 = arith.constant 0 : index
    %c1664 = arith.constant 1664 : index
    %177 = vector.load %arg3[%c0_89, %c1664] : memref<32x3072xf32, #tpu.memory_space<vmem>>, vector<32x16xf32>
    %cst_90 = arith.constant dense<0.000000e+00> : vector<32x256xf32>
    %178 = tpu.matmul %177, %175, %cst_90 {dimension_numbers = #tpu.dot_dimension_numbers<[1], [0], [0], [1], [0, 0, 1, 1], [], []>} : vector<32x16xf32>, vector<16x256xf32>, vector<32x256xf32> -> vector<32x256xf32>
    %179 = vector.broadcast %176 : vector<32x1xf32> to vector<32x256xf32>
    %180 = arith.addf %178, %179 : vector<32x256xf32>
    %181 = vector.extract_strided_slice %180 {offsets = [0, 0], sizes = [16, 256], strides = [1, 1]} : vector<32x256xf32> to vector<16x256xf32>
    %182 = vector.extract_strided_slice %180 {offsets = [16, 0], sizes = [16, 256], strides = [1, 1]} : vector<32x256xf32> to vector<16x256xf32>
    %183 = arith.mulf %181, %182 : vector<16x256xf32>
    %c0_91 = arith.constant 0 : index
    %c6 = arith.constant 6 : index
    %184 = vector.load %arg2[%c0_91, %c6] : memref<32x8xf32, #tpu.memory_space<vmem>>, vector<16x1xf32>
    %c0_92 = arith.constant 0 : index
    %c1792 = arith.constant 1792 : index
    %185 = vector.load %arg3[%c0_92, %c1792] : memref<32x3072xf32, #tpu.memory_space<vmem>>, vector<16x16xf32>
    %cst_93 = arith.constant dense<0.000000e+00> : vector<16x256xf32>
    %186 = tpu.matmul %185, %183, %cst_93 {dimension_numbers = #tpu.dot_dimension_numbers<[1], [0], [0], [1], [0, 0, 1, 1], [], []>} : vector<16x16xf32>, vector<16x256xf32>, vector<16x256xf32> -> vector<16x256xf32>
    %187 = vector.broadcast %184 : vector<16x1xf32> to vector<16x256xf32>
    %188 = arith.addf %186, %187 : vector<16x256xf32>
    %189 = arith.addf %159, %188 : vector<16x256xf32>
    %c0_94 = arith.constant 0 : index
    %c7 = arith.constant 7 : index
    %190 = vector.load %arg2[%c0_94, %c7] : memref<32x8xf32, #tpu.memory_space<vmem>>, vector<3x1xf32>
    %c0_95 = arith.constant 0 : index
    %c17_96 = arith.constant 17 : index
    %191 = vector.load %arg6[%c0_95, %c17_96] : memref<32x290xf32, #tpu.memory_space<vmem>>, vector<16x256xf32>
    tpu.vector_store %arg6[%c0_95, %c17_96], %189 {strides = array<i32>} : memref<32x290xf32, #tpu.memory_space<vmem>>, vector<16x256xf32>,
    %c0_97 = arith.constant 0 : index
    %c1920 = arith.constant 1920 : index
    %192 = vector.load %arg3[%c0_97, %c1920] : memref<32x3072xf32, #tpu.memory_space<vmem>>, vector<3x16xf32>
    %c0_98 = arith.constant 0 : index
    %c0_99 = arith.constant 0 : index
    %193 = vector.load %arg6[%c0_98, %c0_99] : memref<32x290xf32, #tpu.memory_space<vmem>>, vector<16x256xf32>
    %194 = vector.broadcast %4 : vector<1x256xf32> to vector<16x256xf32>
    %195 = arith.mulf %193, %194 : vector<16x256xf32>
    %cst_100 = arith.constant dense<0.000000e+00> : vector<3x256xf32>
    %196 = tpu.matmul %192, %195, %cst_100 {dimension_numbers = #tpu.dot_dimension_numbers<[1], [0], [0], [1], [0, 0, 1, 1], [], []>} : vector<3x16xf32>, vector<16x256xf32>, vector<3x256xf32> -> vector<3x256xf32>
    %c0_101 = arith.constant 0 : index
    %c2048 = arith.constant 2048 : index
    %197 = vector.load %arg3[%c0_101, %c2048] : memref<32x3072xf32, #tpu.memory_space<vmem>>, vector<3x16xf32>
    %c0_102 = arith.constant 0 : index
    %c1_103 = arith.constant 1 : index
    %198 = vector.load %arg6[%c0_102, %c1_103] : memref<32x290xf32, #tpu.memory_space<vmem>>, vector<16x256xf32>
    %cst_104 = arith.constant dense<0.000000e+00> : vector<3x256xf32>
    %199 = tpu.matmul %197, %198, %cst_104 {dimension_numbers = #tpu.dot_dimension_numbers<[1], [0], [0], [1], [0, 0, 1, 1], [], []>} : vector<3x16xf32>, vector<16x256xf32>, vector<3x256xf32> -> vector<3x256xf32>
    %200 = arith.addf %196, %199 : vector<3x256xf32>
    %c0_105 = arith.constant 0 : index
    %c2176 = arith.constant 2176 : index
    %201 = vector.load %arg3[%c0_105, %c2176] : memref<32x3072xf32, #tpu.memory_space<vmem>>, vector<3x16xf32>
    %c0_106 = arith.constant 0 : index
    %c2_107 = arith.constant 2 : index
    %202 = vector.load %arg6[%c0_106, %c2_107] : memref<32x290xf32, #tpu.memory_space<vmem>>, vector<16x256xf32>
    %203 = vector.broadcast %5 : vector<1x256xf32> to vector<16x256xf32>
    %204 = arith.mulf %202, %203 : vector<16x256xf32>
    %cst_108 = arith.constant dense<0.000000e+00> : vector<3x256xf32>
    %205 = tpu.matmul %201, %204, %cst_108 {dimension_numbers = #tpu.dot_dimension_numbers<[1], [0], [0], [1], [0, 0, 1, 1], [], []>} : vector<3x16xf32>, vector<16x256xf32>, vector<3x256xf32> -> vector<3x256xf32>
    %206 = arith.addf %200, %205 : vector<3x256xf32>
    %c0_109 = arith.constant 0 : index
    %c2304 = arith.constant 2304 : index
    %207 = vector.load %arg3[%c0_109, %c2304] : memref<32x3072xf32, #tpu.memory_space<vmem>>, vector<3x16xf32>
    %c0_110 = arith.constant 0 : index
    %c16_111 = arith.constant 16 : index
    %208 = vector.load %arg6[%c0_110, %c16_111] : memref<32x290xf32, #tpu.memory_space<vmem>>, vector<16x256xf32>
    %209 = vector.broadcast %4 : vector<1x256xf32> to vector<16x256xf32>
    %210 = arith.mulf %208, %209 : vector<16x256xf32>
    %cst_112 = arith.constant dense<0.000000e+00> : vector<3x256xf32>
    %211 = tpu.matmul %207, %210, %cst_112 {dimension_numbers = #tpu.dot_dimension_numbers<[1], [0], [0], [1], [0, 0, 1, 1], [], []>} : vector<3x16xf32>, vector<16x256xf32>, vector<3x256xf32> -> vector<3x256xf32>
    %212 = arith.addf %206, %211 : vector<3x256xf32>
    %c0_113 = arith.constant 0 : index
    %c2432 = arith.constant 2432 : index
    %213 = vector.load %arg3[%c0_113, %c2432] : memref<32x3072xf32, #tpu.memory_space<vmem>>, vector<3x16xf32>
    %c0_114 = arith.constant 0 : index
    %c17_115 = arith.constant 17 : index
    %214 = vector.load %arg6[%c0_114, %c17_115] : memref<32x290xf32, #tpu.memory_space<vmem>>, vector<16x256xf32>
    %cst_116 = arith.constant dense<0.000000e+00> : vector<3x256xf32>
    %215 = tpu.matmul %213, %214, %cst_116 {dimension_numbers = #tpu.dot_dimension_numbers<[1], [0], [0], [1], [0, 0, 1, 1], [], []>} : vector<3x16xf32>, vector<16x256xf32>, vector<3x256xf32> -> vector<3x256xf32>
    %216 = arith.addf %212, %215 : vector<3x256xf32>
    %c0_117 = arith.constant 0 : index
    %c2560 = arith.constant 2560 : index
    %217 = vector.load %arg3[%c0_117, %c2560] : memref<32x3072xf32, #tpu.memory_space<vmem>>, vector<3x16xf32>
    %c0_118 = arith.constant 0 : index
    %c18_119 = arith.constant 18 : index
    %218 = vector.load %arg6[%c0_118, %c18_119] : memref<32x290xf32, #tpu.memory_space<vmem>>, vector<16x256xf32>
    %219 = vector.broadcast %5 : vector<1x256xf32> to vector<16x256xf32>
    %220 = arith.mulf %218, %219 : vector<16x256xf32>
    %cst_120 = arith.constant dense<0.000000e+00> : vector<3x256xf32>
    %221 = tpu.matmul %217, %220, %cst_120 {dimension_numbers = #tpu.dot_dimension_numbers<[1], [0], [0], [1], [0, 0, 1, 1], [], []>} : vector<3x16xf32>, vector<16x256xf32>, vector<3x256xf32> -> vector<3x256xf32>
    %222 = arith.addf %216, %221 : vector<3x256xf32>
    %c0_121 = arith.constant 0 : index
    %c2688 = arith.constant 2688 : index
    %223 = vector.load %arg3[%c0_121, %c2688] : memref<32x3072xf32, #tpu.memory_space<vmem>>, vector<3x16xf32>
    %c0_122 = arith.constant 0 : index
    %c32_123 = arith.constant 32 : index
    %224 = vector.load %arg6[%c0_122, %c32_123] : memref<32x290xf32, #tpu.memory_space<vmem>>, vector<16x256xf32>
    %225 = vector.broadcast %4 : vector<1x256xf32> to vector<16x256xf32>
    %226 = arith.mulf %224, %225 : vector<16x256xf32>
    %cst_124 = arith.constant dense<0.000000e+00> : vector<3x256xf32>
    %227 = tpu.matmul %223, %226, %cst_124 {dimension_numbers = #tpu.dot_dimension_numbers<[1], [0], [0], [1], [0, 0, 1, 1], [], []>} : vector<3x16xf32>, vector<16x256xf32>, vector<3x256xf32> -> vector<3x256xf32>
    %228 = arith.addf %222, %227 : vector<3x256xf32>
    %c0_125 = arith.constant 0 : index
    %c2816 = arith.constant 2816 : index
    %229 = vector.load %arg3[%c0_125, %c2816] : memref<32x3072xf32, #tpu.memory_space<vmem>>, vector<3x16xf32>
    %c0_126 = arith.constant 0 : index
    %c33_127 = arith.constant 33 : index
    %230 = vector.load %arg6[%c0_126, %c33_127] : memref<32x290xf32, #tpu.memory_space<vmem>>, vector<16x256xf32>
    %cst_128 = arith.constant dense<0.000000e+00> : vector<3x256xf32>
    %231 = tpu.matmul %229, %230, %cst_128 {dimension_numbers = #tpu.dot_dimension_numbers<[1], [0], [0], [1], [0, 0, 1, 1], [], []>} : vector<3x16xf32>, vector<16x256xf32>, vector<3x256xf32> -> vector<3x256xf32>
    %232 = arith.addf %228, %231 : vector<3x256xf32>
    %c0_129 = arith.constant 0 : index
    %c2944 = arith.constant 2944 : index
    %233 = vector.load %arg3[%c0_129, %c2944] : memref<32x3072xf32, #tpu.memory_space<vmem>>, vector<3x16xf32>
    %c0_130 = arith.constant 0 : index
    %c34_131 = arith.constant 34 : index
    %234 = vector.load %arg6[%c0_130, %c34_131] : memref<32x290xf32, #tpu.memory_space<vmem>>, vector<16x256xf32>
    %235 = vector.broadcast %5 : vector<1x256xf32> to vector<16x256xf32>
    %236 = arith.mulf %234, %235 : vector<16x256xf32>
    %cst_132 = arith.constant dense<0.000000e+00> : vector<3x256xf32>
    %237 = tpu.matmul %233, %236, %cst_132 {dimension_numbers = #tpu.dot_dimension_numbers<[1], [0], [0], [1], [0, 0, 1, 1], [], []>} : vector<3x16xf32>, vector<16x256xf32>, vector<3x256xf32> -> vector<3x256xf32>
    %238 = arith.addf %232, %237 : vector<3x256xf32>
    %239 = vector.broadcast %190 : vector<3x1xf32> to vector<3x256xf32>
    %240 = arith.addf %238, %239 : vector<3x256xf32>
    %241 = arith.addf %240, %7 : vector<3x256xf32>
    %c0_133 = arith.constant 0 : index
    %c0_134 = arith.constant 0 : index
    %c0_135 = arith.constant 0 : index
    %242 = vector.load %arg5[%c0_133, %c0_134, %c0_135] : memref<1x3x256xf32, #tpu.memory_space<vmem>>, vector<1x3x256xf32>
    %243 = vector.shape_cast %242 : vector<1x3x256xf32> to vector<3x256xf32>
    %244 = vector.shape_cast %241 : vector<3x256xf32> to vector<1x3x256xf32>
    tpu.vector_store %arg5[%c0_133, %c0_134, %c0_135], %244 {strides = array<i32>} : memref<1x3x256xf32, #tpu.memory_space<vmem>>, vector<1x3x256xf32>,
    return
  }
  func.func @transform_0(%arg0: i32) -> (i32, i32, i32) {
    %c0_i32 = arith.constant 0 : i32
    %c0_i32_0 = arith.constant 0 : i32
    %c0_i32_1 = arith.constant 0 : i32
    return %arg0, %c0_i32, %c0_i32_0 : i32, i32, i32
  }
  func.func @transform_1(%arg0: i32) -> (i32, i32) {
    %c0_i32 = arith.constant 0 : i32
    %c0_i32_0 = arith.constant 0 : i32
    %c0_i32_1 = arith.constant 0 : i32
    return %c0_i32, %c0_i32_0 : i32, i32
  }
  func.func @transform_2(%arg0: i32) -> (i32, i32) {
    %c0_i32 = arith.constant 0 : i32
    %c0_i32_0 = arith.constant 0 : i32
    %c0_i32_1 = arith.constant 0 : i32
    return %c0_i32, %c0_i32_0 : i32, i32
  }
  func.func @transform_3(%arg0: i32) -> (i32, i32) {
    %c0_i32 = arith.constant 0 : i32
    %c0_i32_0 = arith.constant 0 : i32
    %c0_i32_1 = arith.constant 0 : i32
    return %c0_i32, %c0_i32_0 : i32, i32
  }
  func.func @transform_4(%arg0: i32) -> (i32, i32, i32) {
    %c0_i32 = arith.constant 0 : i32
    %c0_i32_0 = arith.constant 0 : i32
    %c0_i32_1 = arith.constant 0 : i32
    return %arg0, %c0_i32, %c0_i32_0 : i32, i32, i32
  }
}

</mosaic_0001>

<bundles_post_ra>
// kernel: tpu_custom_call.1
= control target key start
LH: loop header
LB: loop body
LE: loop exit
PB: predicated region body
PF: predicated region fallthrough
CT: control target
= control target key end

     0   :  { %9 = vsyncpa [#allocation4], 0  ;;  %s4363_s15 = smov 0   ;;  %s5768_s0 = inlined_call_operand.vmem [shape: f32[2,3,256], index: 0, kind: input, shape index: {}]   ;;  %s5769_s1 = inlined_call_operand.vmem [shape: f32[32,8], index: 1, kind: input, shape index: {}]   ;;  %s5770_s2 = inlined_call_operand.hbm [shape: f32[32,3072], index: 2, kind: input, shape index: {}]   ;;  %s5771_s3 = inlined_call_operand.vmem [shape: f32[3,256], index: 3, kind: input, shape index: {}]   ;;  %s5772_s4 = inlined_call_operand.vmem [shape: f32[2,3,256], index: 4, kind: output, shape index: {}]  }
   0x1 LB: > { %s4369_s16 = sadd.s32 4294967295, %s4308_s15   ;;  %p3876_p0 = scmp.ge.s32.totalorder %s4308_s15, 1  ;;  %s4308_s15 = sphi %s4363_s15, %s15_s15  }
   0x2   : > { %p135_p1 = scmp.lt.s32.totalorder %s4308_s15, 3  ;;  %s4310_s17 = smov [#allocation3]  }
   0x3   : > { %s150_s18 = sshll.u32 %s4310_s17, 4  ;;  %p5773_p3 = scmp.eq.s32.totalorder %s4369_s16, 0  ;;  %s151_s18 = int_to_ptr.vmem [resolvable:$true] %s150_s18 }
   0x4   : > { %p4373_p2 = pnand %p3876_p0, %p135_p1  ;;  %s4270_s23 = scalar_lea.hbm %s5770_s2, 12288 }
   0x5   : > { %p4271_p6 = scmp.ne.s32.totalorder %s5770_s2, %s4270_s23  ;;  %p4277_p10 = scmp.lt.u32.totalorder %s4270_s23, %s5770_s2 }
   0x6   : > { %s5832_s19 = scalar_select %p4373_p2, 1, 0 }
   0x7   : > { %p4070_p4 = pneg %p4373_p2 }
   0x9   : > { %p4382_p5 = pnand %p5773_p3, %p4070_p4 }
   0xb   : > { %p4272_p7 = pneg %p4382_p5 }
   0xd   : > { %p4273_p8 = pnand %p4272_p7, %p4271_p6 }
   0xf   : > { %p4274_p9 = pneg %p4273_p8 }
  0x11   : > { %p4279_p11 = pnand %p4277_p10, %p4274_p9 }
  0x13   : > { %4282 = shalt.err (!%p4279_p11)
}
  0x14   : > { %s4283_s28 = scalar_lea.vmem %s151_s18, 12288  ;;  %p4291_p1 = scmp.lt.s32.totalorder %s151_s18, %s151_s18 }
  0x15   : > { %p4284_p12 = scmp.ne.s32.totalorder %s151_s18, %s4283_s28  ;;  %p4292_p4 = scmp.lt.s32.totalorder %s4283_s28, %s4283_s28 }
  0x17   : > { %p4286_p13 = pnand %p4284_p12, %p4272_p7  ;;  %p4293_p3 = por %p4292_p4, %p4291_p1 }
  0x19   : > { %p4287_p0 = pneg %p4286_p13 }
  0x1b   : > { %p4294_p2 = pnand %p4293_p3, %p4287_p0 }
  0x1d   : > { %4297 = shalt.err (!%p4294_p2)
}
  0x1e   : > { %s4311_s29 = smov 3072   ;;  %s4312_s30 = smov 192  }
  0x1f   : > { %4073 = dma.hbm_to_vmem [thread:$0]  (!%p4382_p5), %s5770_s2, 12288, %s151_s18, [#allocation4], %s4311_s29, %s4311_s29, %s4312_s30  }
  0x20   : > { %p5834_p6 = scmp.ne.s32.totalorder %s5832_s19, 0 }
  0x22   : > { %177 = sbr.rel (%p5834_p6) target bundleno = 3119 (0xc2f), region = 36 }
  0x29   : > { %p5835_p8 = scmp.eq.s32.totalorder %s4369_s16, 0 }
  0x2b   : > { %4303 = dma.done.wait (%p5835_p8), [#allocation4], 12288   ;;  %p5836_p7 = pmov %p5835_p8 }
  0x2c   : > { %p203_p2 = scmp.lt.s32.totalorder %s4369_s16, 1  ;;  %v249_v0 = vlaneseq  ;;  %vm213_vm0 = vcmask 138240   ;;  %v5781_v1 = vmov 0.0   ;;  %vm218_vm1 = vcmask 277640   ;;  %s4314_s13 = smov 17   ;;  %v261_v48 = vld [vmem:[#allocation3 + $0x8] sm:$0xff] }
  0x2d   : > { %4305 = vsyncadd (%p5836_p7), [#allocation4], 4294955008  ;;  %214 = vst.msk [vmem:[#allocation2] sm:$0xff] %vm213_vm0, %v5781_v1  ;;  %352 = vmatprep.mubr.f32.mxu0 %v5781_v1  ;;  %1431 = vmatprep.mubr.f32.mxu1 %v5781_v1  ;;  %v3885_v6 = vld [vmem:[%s5771_s3 + $0x1] ss:$4 sm:$0x3] }
  0x2e   : > { %215 = vst.msk [vmem:[#allocation2 + $0x18] sm:$0xff] %vm213_vm0, %v5781_v1  ;;  %216 = vst.msk [vmem:[#allocation2 + $0x30] sm:$0xff] %vm213_vm0, %v5781_v1  ;;  %s5915_s16 = smov (!%p203_p2, %s4369_s16), 1  ;;  %v250_v2 = vshrl.u32 %v249_v0, 7  ;;  %s4315_s18 = smov 2   ;;  %vm239_vm2 = vcmask 1042568  }
  0x2f   : > { %217 = vst.msk [vmem:[#allocation2 + $0x48] sm:$0xff] %vm213_vm0, %v5781_v1  ;;  %s3947_s7 = sshll.u32 %s5915_s16, 3  ;;  %v223_v9 = vld [vmem:[%s5771_s3] ss:$4 sm:$0x3]  ;;  %s4316_s19 = smov 16  }
  0x30   : > { %219 = vst.msk [vmem:[#allocation2 + $0x10] sm:$0xff] %vm218_vm1, %v5781_v1  ;;  %220 = vst.msk [vmem:[#allocation2 + $0x28] sm:$0xff] %vm218_vm1, %v5781_v1  ;;  %v251_v3 = vsub.s32 0, %v250_v2  ;;  %s4432_s10 = scalar_lea.vmem %s5768_s0, %s3947_s7  ;;  %v255_v4 = vsub.s32 1, %v250_v2  ;;  %s4317_s20 = smov 18   ;;  %vm242_vm3 = vcmask 133120  }
  0x31   : > { %221 = vst.msk [vmem:[#allocation2 + $0x40] sm:$0xff] %vm218_vm1, %v5781_v1  ;;  %222 = vst.msk [vmem:[#allocation2 + $0x58] sm:$0xff] %vm218_vm1, %v5781_v1  ;;  %v226_v5 = vld [vmem:[%s4432_s10] sm:$0x77]  ;;  %s4318_s21 = smov 32   ;;  %s4319_s22 = smov 127  }
  0x32   : > { %231 = vrot.lane.b32.xlu0 %v226_v5, %s4314_s13  ;;  %v460_v7 = vrot.slane %v3885_v6, %v251_v3  ;;  %v4439_v8 = vcombine.high %v226_v5, %v226_v5  ;;  %v464_v10 = vrot.slane %v3885_v6, %v255_v4  ;;  %v4444_v11 = vrot.slane %v223_v9, %v251_v3  ;;  %s4320_s23 = smov 34   ;;  %s4321_s24 = smov 126   ;;  %v262_v54 = vld [vmem:[#allocation3 + $0xc8] sm:$0xff]  ;;  %v4580_v60 = vld [vmem:[%s5769_s1] sm:$0xff] }
  0x33   : > { %v4448_v12 = vrot.slane %v223_v9, %v255_v4  ;;  %vm469_vm4 = vcmask 15360   ;;  %vm586_vm5 = vcmask 130048   ;;  %s4322_s25 = smov 112   ;;  %vm805_vm6 = vcmask 146432   ;;  %s4323_s26 = smov 111   ;;  %v244_v62 = vld [vmem:[#allocation3] sm:$0xff] }
  0x34   : > { %5837 = vst [vmem:[#allocation6_spill] sm:$0xff] %v4439_v8  ;;  %465 = vrot.lane.b32.xlu1 %v460_v7, %s4315_s18  ;;  %5838 = vst [vmem:[#allocation7_spill] sm:$0xff] %v4444_v11  ;;  %vm922_vm7 = vcmask 261120   ;;  %s4324_s27 = smov 110   ;;  %s4325_s28 = smov 96   ;;  %vm273_vm8 = vcmask 1039360  }
  0x35   : > { %5839 = vst [vmem:[#allocation8_spill] sm:$0xff] %v4448_v12  ;;  %s4326_s29 = smov 95   ;;  %vm283_vm9 = vcmask 1042432   ;;  %vm276_vm10 = vcmask 23552   ;;  %vm1141_vm11 = vcmask 277504   ;;  %vm486_vm12 = vcmask 1031168  }
  0x36   : > { %233 = vrot.lane.b32.xlu0 %v4439_v8, %s4314_s13  ;;  %v4327_v57 = vmov 0   ;;  %s4328_s30 = smov 94   ;;  %vm603_vm13 = vcmask 916480   ;;  %v245_v4 = vld [vmem:[#allocation3 + $0xc0] sm:$0xff]  ;;  %v4596_v5 = vld [vmem:[%s5769_s1 + $0x8] sm:$0xff]  ;;  %vm705_vm14 = vcmask 908288  }
  0x37   : > { %4112 = vset.pattern.permute.xlu0 %v4327_v57  ;;  %4113 = vset.pattern.permute.xlu1 %v4327_v57  ;;  %vm822_vm15 = vcmask 900096   ;;  %vm939_vm1 = vcmask 785408  }
  0x38   : > { %467 = vrot.lane.b32.xlu1 %v464_v10, %s4315_s18 }
  0x3a   : > { %582 = vrot.lane.b32.xlu0 %v4444_v11, %s4316_s19 }
  0x3c   : > { %584 = vrot.lane.b32.xlu1 %v4448_v12, %s4316_s19 }
  0x3e   : > { %801 = vrot.lane.b32.xlu0 %v460_v7, %s4317_s20 }
  0x40   : > { %803 = vrot.lane.b32.xlu1 %v464_v10, %s4317_s20 }
  0x42   : > { %918 = vrot.lane.b32.xlu0 %v4444_v11, %s4318_s21 }
  0x44   : > { %920 = vrot.lane.b32.xlu1 %v4448_v12, %s4318_s21 }
  0xa4   : > { %v232_v13 = vpop.permute.xlu0 %231 }
  0xa5   : > { %240 = vst.msk [vmem:[#allocation2] sm:$0x7] %vm239_vm2, %v232_v13  ;;  %vm1041_vm2 = vcmask 777216  }
  0xa6   : > { %v4455_v16 = vpop.permute.xlu1 %465 }
  0xa7   : > { %5840 = vst [vmem:[#allocation9_spill] sm:$0xff] %v4455_v16 }
  0xa8   : > { %v234_v14 = vpop.permute.xlu0 %233 }
  0xa9   : > { %v235_v15 = vsel %vm213_vm0, %v232_v13, %v234_v14  ;;  %243 = vst.msk [vmem:[#allocation2 + $0x10] sm:$0x7] %vm242_vm3, %v234_v14  ;;  %vm1158_vm3 = vcmask 769024  }
  0xaa   : > { %241 = vst [vmem:[#allocation2 + $0x8] sm:$0x7] %v235_v15  ;;  %v4467_v20 = vpop.permute.xlu1 %467 }
  0xab   : > { %5841 = vst [vmem:[#allocation10_spill] sm:$0xff] %v4467_v20  ;;  %v4473_v21 = vsel %vm469_vm4, %v4455_v16, %v4467_v20  ;;  %vm1488_vm4 = vcmask 1047688  }
  0xac   : > { %v4457_v17 = vld [vmem:[#allocation2] sm:$0x7]  ;;  %5842 = vst [vmem:[#allocation11_spill] sm:$0xff] %v4473_v21  ;;  %v4477_v23 = vpop.permute.xlu0 %582 }
  0xad   : > { %267 = vrot.lane.b32.xlu0 %v4457_v17, %s4319_s22  ;;  %5843 = vst [vmem:[#allocation12_spill] sm:$0xff] %v4477_v23  ;;  %v474_v27 = vmul.f32 %v4455_v16, %v4457_v17  ;;  %v591_v30 = vmul.f32 %v4477_v23, %v4457_v17  ;;  %v259_v51 = vmul.f32 %v4444_v11, %v4457_v17 }
  0xae   : > { %v4479_v24 = vpop.permute.xlu1 %584 }
  0xaf   : > { %5844 = vst [vmem:[#allocation13_spill] sm:$0xff] %v4479_v24  ;;  %v4487_v26 = vsel %vm586_vm5, %v4477_v23, %v4479_v24 }
  0xb0   : > { %v4461_v18 = vld [vmem:[#allocation2 + $0x10] sm:$0x7]  ;;  %5845 = vst [vmem:[#allocation14_spill] sm:$0xff] %v4487_v26  ;;  %v4504_v32 = vpop.permute.xlu0 %801 }
  0xb1   : > { %271 = vrot.lane.b32.xlu1 %v4461_v18, %s4319_s22  ;;  %v4465_v19 = vld [vmem:[#allocation2 + $0x8] sm:$0x7]  ;;  %v476_v25 = vmul.f32 %v4467_v20, %v4461_v18  ;;  %v593_v29 = vmul.f32 %v4479_v24, %v4461_v18  ;;  %5847 = vst [vmem:[#allocation16_spill] sm:$0xff] %v4504_v32  ;;  %v810_v38 = vmul.f32 %v4504_v32, %v4457_v17 }
  0xb2   : > { %269 = vrot.lane.b32.xlu0 %v4465_v19, %s4319_s22  ;;  %v475_v22 = vmul.f32 %v4473_v21, %v4465_v19  ;;  %v592_v28 = vmul.f32 %v4487_v26, %v4465_v19  ;;  %v4501_v31 = vpop.permute.xlu1 %803  ;;  %v260_v49 = vmul.f32 %v4448_v12, %v4465_v19 }
  0xb3   : > { %5846 = vst [vmem:[#allocation15_spill] sm:$0xff] %v4501_v31  ;;  %v4510_v33 = vsel %vm805_vm6, %v4504_v32, %v4501_v31  ;;  %v812_v37 = vmul.f32 %v4501_v31, %v4461_v18 }
  0xb4   : > { %5848 = vst [vmem:[#allocation17_spill] sm:$0xff] %v4510_v33  ;;  %v811_v34 = vmul.f32 %v4510_v33, %v4465_v19  ;;  %v4521_v36 = vpop.permute.xlu0 %918 }
  0xb5   : > { %1137 = vrot.lane.b32.xlu1 %v460_v7, %s4320_s23  ;;  %5850 = vst [vmem:[#allocation19_spill] sm:$0xff] %v4521_v36  ;;  %v927_v42 = vmul.f32 %v4521_v36, %v4457_v17 }
  0xb6   : > { %1139 = vrot.lane.b32.xlu0 %v464_v10, %s4320_s23  ;;  %v4516_v35 = vpop.permute.xlu1 %920  ;;  %v454_v10 = vld [vmem:[#allocation3 + $0x10] sm:$0xff]  ;;  %s4337_s23 = smov 125  }
  0xb7   : > { %5849 = vst [vmem:[#allocation18_spill] sm:$0xff] %v4516_v35  ;;  %v4529_v39 = vsel %vm922_vm7, %v4521_v36, %v4516_v35  ;;  %v929_v41 = vmul.f32 %v4516_v35, %v4461_v18 }
  0xb8   : > { %5851 = vst [vmem:[#allocation20_spill] sm:$0xff] %v4529_v39  ;;  %v928_v40 = vmul.f32 %v4529_v39, %v4465_v19 }
  0xb9   : > { %482 = vrot.lane.b32.xlu1 %v475_v22, %s4321_s24 }
  0xba   : > { %484 = vrot.lane.b32.xlu0 %v476_v25, %s4321_s24  ;;  %v580_v25 = vld [vmem:[#allocation3 + $0x18] sm:$0xff] }
  0xbd   : > { %480 = vrot.lane.b32.xlu1 %v474_v27, %s4321_s24 }
  0xbe   : > { %599 = vrot.lane.b32.xlu0 %v592_v28, %s4322_s25 }
  0xc1   : > { %601 = vrot.lane.b32.xlu1 %v593_v29, %s4322_s25 }
  0xc2   : > { %597 = vrot.lane.b32.xlu0 %v591_v30, %s4322_s25 }
  0xc5   : > { %701 = vrot.lane.b32.xlu1 %v4465_v19, %s4323_s26 }
  0xc6   : > { %703 = vrot.lane.b32.xlu0 %v4461_v18, %s4323_s26 }
  0xc9   : > { %699 = vrot.lane.b32.xlu1 %v4457_v17, %s4323_s26 }
  0xca   : > { %818 = vrot.lane.b32.xlu0 %v811_v34, %s4324_s27  ;;  %v581_v34 = vld [vmem:[#allocation3 + $0xd8] sm:$0xff] }
  0xcd   : > { %820 = vrot.lane.b32.xlu1 %v812_v37, %s4324_s27 }
  0xce   : > { %816 = vrot.lane.b32.xlu0 %v810_v38, %s4324_s27  ;;  %v697_v38 = vld [vmem:[#allocation3 + $0x20] sm:$0xff] }
  0xd1   : > { %935 = vrot.lane.b32.xlu1 %v928_v40, %s4325_s28 }
  0xd2   : > { %937 = vrot.lane.b32.xlu0 %v929_v41, %s4325_s28 }
  0xd5   : > { %933 = vrot.lane.b32.xlu1 %v927_v42, %s4325_s28 }
  0xd6   : > { %1037 = vrot.lane.b32.xlu0 %v4465_v19, %s4326_s29 }
  0xd9   : > { %1039 = vrot.lane.b32.xlu1 %v4461_v18, %s4326_s29 }
  0xda   : > { %1035 = vrot.lane.b32.xlu0 %v4457_v17, %s4326_s29 }
 0x11f   : > { %v268_v43 = vpop.permute.xlu0 %267 }
 0x123   : > { %v272_v44 = vpop.permute.xlu1 %271 }
 0x124   : > { %v270_v45 = vpop.permute.xlu0 %269 }
 0x125   : > { %v275_v46 = vsel %vm273_vm8, %v270_v45, %v272_v44  ;;  %v274_v47 = vsel %vm273_vm8, %v268_v43, %v270_v45  ;;  %v698_v44 = vld [vmem:[#allocation3 + $0xe0] sm:$0xff]  ;;  %v799_v45 = vld [vmem:[#allocation3 + $0x28] sm:$0xff] }
 0x126   : > { %3886 = vmatprep.subr.msk.mxu0 %vm283_vm9, %v275_v46 }
 0x127   : > { %v4553_v50 = vpop.permute.xlu1 %1137  ;;  %3887 = vmatpush1.msk.msra.mxu0 %vm283_vm9, %v274_v47 }
 0x128   : > { %5852 = vst [vmem:[#allocation21_spill] sm:$0xff] %v4553_v50  ;;  %3888 = vmatmul.mubr.msk.f32.vlgmr.msra.gmra.mrb[0].mxu0 %vm276_vm10, %v261_v48  ;;  %3890 = vmatprep.subr.msk.mxu0 %vm283_vm9, %v260_v49  ;;  %v4560_v52 = vpop.permute.xlu0 %1139  ;;  %v1146_v63 = vmul.f32 %v4553_v50, %v4457_v17 }
 0x129   : > { %5853 = vst [vmem:[#allocation22_spill] sm:$0xff] %v4560_v52  ;;  %3891 = vmatpush1.msk.msra.mxu0 %vm283_vm9, %v259_v51  ;;  %358 = vmatprep.mubr.f32.mxu0 %v5781_v1  ;;  %v1148_v53 = vmul.f32 %v4560_v52, %v4461_v18  ;;  %v4568_v55 = vsel %vm1141_vm11, %v4553_v50, %v4560_v52  ;;  %v455_v18 = vld [vmem:[#allocation3 + $0xd0] sm:$0xff]  ;;  %v800_v51 = vld [vmem:[#allocation3 + $0xe8] sm:$0xff] }
 0x12a   : > { %5854 = vst [vmem:[#allocation23_spill] sm:$0xff] %v4568_v55  ;;  %v1147_v56 = vmul.f32 %v4568_v55, %v4465_v19 }
 0x12b   : > { %v483_v58 = vpop.permute.xlu1 %482  ;;  %1156 = vrot.lane.b32.xlu0 %v1148_v53, %s4328_s30 }
 0x12c   : > { %3889 = vmatmul.mubr.msk.f32.gmra.mrb[2].mxu0 %vm276_vm10, %v262_v54  ;;  %v485_v59 = vpop.permute.xlu0 %484  ;;  %1154 = vrot.lane.b32.xlu1 %v1147_v56, %s4328_s30  ;;  %v916_v54 = vld [vmem:[#allocation3 + $0x30] sm:$0xff] }
 0x12d   : > { %v488_v61 = vsel %vm486_vm12, %v483_v58, %v485_v59  ;;  %441 = vmatprep.mubr.f32.mxu0 %v5781_v1  ;;  %v1033_v59 = vld [vmem:[#allocation3 + $0x38] sm:$0xff] }
 0x12e   : > { %3894 = vmatprep.subr.msk.mxu0 %vm283_vm9, %v488_v61  ;;  %v1034_v61 = vld [vmem:[#allocation3 + $0xf8] sm:$0xff] }
 0x12f   : > { %v481_v0 = vpop.permute.xlu1 %480  ;;  %1254 = vperm.xlu0 %4112, %v4580_v60  }
 0x130   : > { %v487_v2 = vsel %vm486_vm12, %v481_v0, %v483_v58  ;;  %v600_v3 = vpop.permute.xlu0 %599  ;;  %1152 = vrot.lane.b32.xlu1 %v1146_v63, %s4328_s30  ;;  %3892 = vmatmul.mubr.msk.f32.vlgmr.msra.gmra.mrb[0].mxu0 %vm276_vm10, %v244_v62  ;;  %v917_v58 = vld [vmem:[#allocation3 + $0xf0] sm:$0xff] }
 0x131   : > { %3895 = vmatpush1.msk.msra.mxu0 %vm283_vm9, %v487_v2  ;;  %447 = vmatprep.mubr.f32.mxu0 %v5781_v1 }
 0x133   : > { %v602_v6 = vpop.permute.xlu1 %601 }
 0x134   : > { %v605_v7 = vsel %vm603_vm13, %v600_v3, %v602_v6  ;;  %v598_v9 = vpop.permute.xlu0 %597  ;;  %3893 = vmatmul.mubr.msk.f32.gmra.mrb[2].mxu0 %vm276_vm10, %v245_v4  ;;  %1259 = vperm.xlu1 %4113, %v4596_v5   ;;  %v1136_v6 = vld [vmem:[#allocation3 + $0x100] sm:$0xff] }
 0x135   : > { %3898 = vmatprep.subr.msk.mxu0 %vm283_vm9, %v605_v7  ;;  %563 = vmatprep.mubr.f32.mxu0 %v5781_v1  ;;  %v604_v14 = vsel %vm603_vm13, %v598_v9, %v600_v3  ;;  %v1135_v3 = vld [vmem:[#allocation3 + $0x40] sm:$0xff]  ;;  %v4329_v7 = vmov 1   ;;  %v4658_v9 = vld [vmem:[%s5769_s1 + $0x10] sm:$0xff] }
 0x136   : > { %4115 = vset.pattern.permute.xlu0 %v4329_v7 }
 0x137   : > { %v702_v13 = vpop.permute.xlu1 %701  ;;  %1330 = vperm.xlu0 %4115, %v4596_v5  }
 0x138   : > { %v704_v15 = vpop.permute.xlu0 %703  ;;  %3896 = vmatmul.mubr.msk.f32.vlgmr.msra.gmra.mrb[0].mxu0 %vm276_vm10, %v454_v10  ;;  %4114 = vset.pattern.permute.xlu1 %v4329_v7  ;;  %v4660_v10 = vld [vmem:[#allocation3 + $0x50] sm:$0xff] }
 0x139   : > { %v707_v17 = vsel %vm705_vm14, %v702_v13, %v704_v15  ;;  %3899 = vmatpush1.msk.msra.mxu0 %vm283_vm9, %v604_v14  ;;  %569 = vmatprep.mubr.f32.mxu0 %v5781_v1  ;;  %v4669_v14 = vld [vmem:[#allocation3 + $0x1d0] sm:$0xff] }
 0x13a   : > { %3902 = vmatprep.subr.msk.mxu0 %vm283_vm9, %v707_v17  ;;  %1325 = vperm.xlu1 %4114, %v4580_v60   ;;  %v4673_v15 = vld [vmem:[#allocation3 + $0x110] sm:$0xff]  ;;  %v4330_v17 = vmov 3  }
 0x13b   : > { %v700_v19 = vpop.permute.xlu1 %699  ;;  %1558 = vperm.xlu0 %4115, %v4660_v10  }
 0x13c   : > { %v819_v22 = vpop.permute.xlu0 %818  ;;  %3897 = vmatmul.mubr.msk.f32.gmra.mrb[2].mxu0 %vm276_vm10, %v455_v18  ;;  %v706_v28 = vsel %vm705_vm14, %v700_v19, %v702_v13  ;;  %v4667_v13 = vld [vmem:[%s5769_s1 + $0x18] sm:$0xff]  ;;  %v4676_v18 = vld [vmem:[#allocation3 + $0x290] sm:$0xff]  ;;  %v5778_v19 = vmov 4  }
 0x13d   : > { %680 = vmatprep.mubr.f32.mxu0 %v5781_v1 }
 0x13e   : > { %1335 = vperm.xlu1 %4114, %v4658_v9  }
 0x13f   : > { %v821_v27 = vpop.permute.xlu1 %820  ;;  %1566 = vperm.xlu0 %4115, %v4669_v14  }
 0x140   : > { %v824_v29 = vsel %vm822_vm15, %v819_v22, %v821_v27  ;;  %v817_v30 = vpop.permute.xlu0 %816  ;;  %3900 = vmatmul.mubr.msk.f32.vlgmr.msra.gmra.mrb[0].mxu0 %vm276_vm10, %v580_v25  ;;  %v5779_v25 = vmov 5   ;;  %v5776_v27 = vmov 6  }
 0x141   : > { %3903 = vmatpush1.msk.msra.mxu0 %vm283_vm9, %v706_v28  ;;  %686 = vmatprep.mubr.f32.mxu0 %v5781_v1  ;;  %v823_v41 = vsel %vm822_vm15, %v817_v30, %v819_v22  ;;  %v4332_v22 = vmov 2   ;;  %v5775_v28 = vmov 7  }
 0x142   : > { %3906 = vmatprep.subr.msk.mxu0 %vm283_vm9, %v824_v29  ;;  %1340 = vperm.xlu1 %4114, %v4667_v13   ;;  %v4336_v29 = vmov 8  }
 0x143   : > { %v936_v37 = vpop.permute.xlu1 %935  ;;  %4118 = vset.pattern.permute.xlu0 %v4330_v17 }
 0x144   : > { %3901 = vmatmul.mubr.msk.f32.gmra.mrb[2].mxu0 %vm276_vm10, %v581_v34  ;;  %v938_v40 = vpop.permute.xlu0 %937  ;;  %1762 = vperm.xlu0 %4118, %v4673_v15  }
 0x145   : > { %782 = vmatprep.mubr.f32.mxu0 %v5781_v1  ;;  %v941_v43 = vsel %vm939_vm1, %v936_v37, %v938_v40 }
 0x146   : > { %1562 = vperm.xlu1 %4114, %v4673_v15  }
 0x147   : > { %v934_v42 = vpop.permute.xlu1 %933 }
 0x148   : > { %3904 = vmatmul.mubr.msk.f32.vlgmr.msra.gmra.mrb[0].mxu0 %vm276_vm10, %v697_v38  ;;  %v1038_v47 = vpop.permute.xlu0 %1037  ;;  %v940_v48 = vsel %vm939_vm1, %v934_v42, %v936_v37  ;;  %4119 = vset.pattern.permute.xlu0 %v5778_v19 }
 0x149   : > { %3907 = vmatpush1.msk.msra.mxu0 %vm283_vm9, %v823_v41  ;;  %788 = vmatprep.mubr.f32.mxu0 %v5781_v1 }
 0x14a   : > { %3910 = vmatprep.subr.msk.mxu0 %vm283_vm9, %v941_v43  ;;  %1570 = vperm.xlu1 %4114, %v4676_v18  }
 0x14b   : > { %v1040_v46 = vpop.permute.xlu1 %1039  ;;  %1846 = vperm.xlu0 %4119, %v4660_v10  }
 0x14c   : > { %3905 = vmatmul.mubr.msk.f32.gmra.mrb[2].mxu0 %vm276_vm10, %v698_v44  ;;  %v1043_v49 = vsel %vm1041_vm2, %v1038_v47, %v1040_v46  ;;  %v1036_v53 = vpop.permute.xlu0 %1035 }
 0x14d   : > { %899 = vmatprep.mubr.f32.mxu0 %v5781_v1  ;;  %v1042_v56 = vsel %vm1041_vm2, %v1036_v53, %v1038_v47 }
 0x14e   : > { %4116 = vset.pattern.permute.xlu1 %v4332_v22 }
 0x14f   : > { %1662 = vperm.xlu1 %4116, %v4673_v15   ;;  %1858 = vperm.xlu0 %4119, %v4676_v18  }
 0x150   : > { %3908 = vmatmul.mubr.msk.f32.vlgmr.msra.gmra.mrb[0].mxu0 %vm276_vm10, %v799_v45 }
 0x151   : > { %3911 = vmatpush1.msk.msra.mxu0 %vm283_vm9, %v940_v48  ;;  %905 = vmatprep.mubr.f32.mxu0 %v5781_v1 }
 0x152   : > { %3914 = vmatprep.subr.msk.mxu0 %vm283_vm9, %v1043_v49 }
 0x153   : > { %1666 = vperm.xlu1 %4116, %v4669_v14   ;;  %4122 = vset.pattern.permute.xlu0 %v5779_v25 }
 0x154   : > { %3909 = vmatmul.mubr.msk.f32.gmra.mrb[2].mxu0 %vm276_vm10, %v800_v51  ;;  %1950 = vperm.xlu0 %4122, %v4673_v15  }
 0x155   : > { %1016 = vmatprep.mubr.f32.mxu0 %v5781_v1 }
 0x157   : > { %4117 = vset.pattern.permute.xlu1 %v4330_v17 }
 0x158   : > { %3912 = vmatmul.mubr.msk.f32.vlgmr.msra.gmra.mrb[0].mxu0 %vm276_vm10, %v916_v54  ;;  %1758 = vperm.xlu1 %4117, %v4660_v10  }
 0x159   : > { %3915 = vmatpush1.msk.msra.mxu0 %vm283_vm9, %v1042_v56  ;;  %1022 = vmatprep.mubr.f32.mxu0 %v5781_v1 }
 0x15a   : > { %4123 = vset.pattern.permute.xlu0 %v5776_v27 }
 0x15b   : > { %2046 = vperm.xlu0 %4123, %v4660_v10  }
 0x15c   : > { %3913 = vmatmul.mubr.msk.f32.gmra.mrb[2].mxu0 %vm276_vm10, %v917_v58  ;;  %1766 = vperm.xlu1 %4117, %v4669_v14  }
 0x15d   : > { %1118 = vmatprep.mubr.f32.mxu0 %v5781_v1 }
 0x15f   : > { %2058 = vperm.xlu0 %4123, %v4676_v18  }
 0x160   : > { %3916 = vmatmul.mubr.msk.f32.vlgmr.msra.gmra.mrb[0].mxu0 %vm276_vm10, %v1033_v59  ;;  %1770 = vperm.xlu1 %4117, %v4676_v18  }
 0x161   : > { %1124 = vmatprep.mubr.f32.mxu0 %v5781_v1 }
 0x163   : > { %4126 = vset.pattern.permute.xlu0 %v5775_v28 }
 0x164   : > { %3917 = vmatmul.mubr.msk.f32.gmra.mrb[2].mxu0 %vm276_vm10, %v1034_v61  ;;  %2138 = vperm.xlu0 %4126, %v4673_v15  }
 0x165   : > { %1235 = vmatprep.mubr.f32.mxu0 %v5781_v1  ;;  %4120 = vset.pattern.permute.xlu1 %v5778_v19 }
 0x166   : > { %1850 = vperm.xlu1 %4120, %v4673_v15  }
 0x168   : > { %4127 = vset.pattern.permute.xlu0 %v4336_v29 }
 0x169   : > { %2234 = vperm.xlu0 %4127, %v4660_v10  }
 0x16a   : > { %1854 = vperm.xlu1 %4120, %v4669_v14  }
 0x16d   : > { %2246 = vperm.xlu0 %4127, %v4676_v18  }
 0x16e   : > { %4121 = vset.pattern.permute.xlu1 %v5779_v25 }
 0x16f   : > { %1946 = vperm.xlu1 %4121, %v4660_v10  }
 0x171   : > { %4129 = vset.pattern.permute.xlu0 %v4332_v22 }
 0x172   : > { %1658 = vperm.xlu0 %4129, %v4660_v10  }
 0x173   : > { %1954 = vperm.xlu1 %4121, %v4669_v14  }
 0x176   : > { %1670 = vperm.xlu0 %4129, %v4676_v18  }
 0x177   : > { %1958 = vperm.xlu1 %4121, %v4676_v18  }
 0x17a   : > { %2322 = vperm.xlu0 %4129, %v4580_v60  }
 0x17b   : > { %4124 = vset.pattern.permute.xlu1 %v5776_v27 }
 0x17c   : > { %2050 = vperm.xlu1 %4124, %v4673_v15  }
 0x17e   : > { %2334 = vperm.xlu0 %4129, %v4667_v13  }
 0x180   : > { %2054 = vperm.xlu1 %4124, %v4669_v14  }
 0x182   : > { %4132 = vset.pattern.permute.xlu0 %v4327_v57 }
 0x183   : > { %1524 = vperm.xlu0 %4132, %v4673_v15  }
 0x184   : > { %4125 = vset.pattern.permute.xlu1 %v5775_v28 }
 0x185   : > { %2134 = vperm.xlu1 %4125, %v4660_v10  }
 0x189   : > { %2142 = vperm.xlu1 %4125, %v4669_v14  }
 0x18d   : > { %2146 = vperm.xlu1 %4125, %v4676_v18  }
 0x191   : > { %4128 = vset.pattern.permute.xlu1 %v4336_v29 }
 0x192   : > { %2238 = vperm.xlu1 %4128, %v4673_v15  }
 0x196   : > { %2242 = vperm.xlu1 %4128, %v4669_v14  }
 0x19a   : > { %4130 = vset.pattern.permute.xlu1 %v4327_v57 }
 0x19b   : > { %1519 = vperm.xlu1 %4130, %v4660_v10  }
 0x19d   : > { %v1157_v62 = vpop.permute.xlu0 %1156 }
 0x19e   : > { %v1155_v63 = vpop.permute.xlu1 %1154 }
 0x19f   : > { %v1160_v0 = vsel %vm1158_vm3, %v1155_v63, %v1157_v62  ;;  %1529 = vperm.xlu1 %4130, %v4669_v14   ;;  %v1319_v14 = vld [vmem:[#allocation3 + $0x48] sm:$0xff] }
 0x1a0   : > { %3918 = vmatprep.subr.msk.mxu0 %vm283_vm9, %v1160_v0 }
 0x1a2   : > { %v1153_v2 = vpop.permute.xlu1 %1152 }
 0x1a3   : > { %v1159_v4 = vsel %vm1158_vm3, %v1153_v2, %v1155_v63  ;;  %1534 = vperm.xlu1 %4130, %v4676_v18   ;;  %v1321_v18 = vld [vmem:[#allocation3 + $0x1c8] sm:$0xff] }
 0x1a4   : > { %3919 = vmatpush1.msk.msra.mxu0 %vm283_vm9, %v1159_v4 }
 0x1a5   : > { %3920 = vmatmul.mubr.msk.f32.vlgmr.msra.gmra.mrb[0].mxu0 %vm276_vm10, %v1135_v3 }
 0x1a6   : > { %1241 = vmatprep.mubr.f32.mxu0 %v5781_v1 }
 0x1a7   : > { %4131 = vset.pattern.permute.xlu1 %v4332_v22 }
 0x1a8   : > { %2326 = vperm.xlu1 %4131, %v4596_v5   ;;  %v1322_v5 = vld [vmem:[#allocation3 + $0x288] sm:$0xff] }
 0x1a9   : > { %3921 = vmatmul.mubr.msk.f32.gmra.mrb[2].mxu0 %vm276_vm10, %v1136_v6 }
 0x1aa   : > { %1419 = vmatprep.mubr.f32.mxu0 %v5781_v1 }
 0x1ac   : > { %2330 = vperm.xlu1 %4131, %v4658_v9   ;;  %v1320_v9 = vld [vmem:[#allocation3 + $0x108] sm:$0xff] }
 0x1ae   : > { %v1255_v37 = vpop.permute.xlu0 %1254 }
 0x1b0   : > { %4133 = vset.pattern.permute.xlu1 %v4327_v57 }
 0x1b3   : > { %v1260_v38 = vpop.permute.xlu1 %1259 }
 0x1b9   : > { %v1326_v57 = vpop.permute.xlu1 %1325 }
 0x1bd   : > { %v1336_v22 = vpop.permute.xlu1 %1335 }
 0x278   : > { %v1237_v30 = vpop.f32.mrb[0].mxu0 }
 0x279   : > { %v1239_v34 = vpop.f32.mrb[1].mxu0  ;;  %v4708_v41 = vadd.f32 %v1255_v37, %v1237_v30 }
 0x27a   : > { %v4712_v44 = vadd.f32 %v1255_v37, %v1239_v34 }
 0x27b   : > { %5855 = vst [vmem:[#allocation24_spill] sm:$0xff] %v4708_v41 }
 0x27c   : > { %v1243_v40 = vpop.f32.mrb[2].mxu0  ;;  %5857 = vst [vmem:[#allocation26_spill] sm:$0xff] %v4712_v44 }
 0x27d   : > { %v4710_v42 = vadd.f32 %v1260_v38, %v1243_v40  ;;  %v1245_v43 = vpop.f32.mrb[3].mxu0 }
 0x27e   : > { %v4714_v45 = vadd.f32 %v1260_v38, %v1245_v43 }
 0x27f   : > { %5856 = vst [vmem:[#allocation25_spill] sm:$0xff] %v4710_v42  ;;  %v1266_v46 = vadd.f32 %v4710_v42, %v4708_v41 }
 0x280   : > { %5858 = vst [vmem:[#allocation27_spill] sm:$0xff] %v4714_v45  ;;  %v1273_v47 = vadd.f32 %v4714_v45, %v4712_v44 }
 0x281   : > { %v1267_v48 = vrot.slane %v1266_v46, 4 }
 0x282   : > { %v1274_v49 = vrot.slane %v1273_v47, 4 }
 0x283   : > { %v1268_v51 = vadd.f32 %v1267_v48, %v1266_v46 }
 0x284   : > { %v1275_v53 = vadd.f32 %v1274_v49, %v1273_v47 }
 0x285   : > { %v1269_v54 = vrot.slane %v1268_v51, 2 }
 0x286   : > { %v1276_v60 = vrot.slane %v1275_v53, 2 }
 0x287   : > { %v1270_v56 = vadd.f32 %v1269_v54, %v1268_v51 }
 0x288   : > { %v1277_v58 = vadd.f32 %v1276_v60, %v1275_v53 }
 0x289   : > { %v1271_v59 = vrot.slane %v1270_v56, 1 }
 0x28a   : > { %v1278_v61 = vrot.slane %v1277_v58, 1 }
 0x28b   : > { %v1272_v62 = vadd.f32 %v1271_v59, %v1270_v56 }
 0x28c   : > { %v1279_v63 = vadd.f32 %v1278_v61, %v1277_v58 }
 0x28d   : > { %v1281_v0 = vmul.f32 0.0625, %v1272_v62 }
 0x28e   : > { %v1282_v2 = vmul.f32 0.0625, %v1279_v63 }
 0x28f   : > { %v1283_v3 = vsub.f32 %v4708_v41, %v1281_v0  ;;  %v1285_v4 = vsub.f32 %v4710_v42, %v1281_v0 }
 0x290   : > { %v1286_v6 = vsub.f32 %v4714_v45, %v1282_v2  ;;  %v1284_v7 = vsub.f32 %v4712_v44, %v1282_v2 }
 0x291   : > { %v1287_v13 = vmul.f32 %v1283_v3, %v1283_v3  ;;  %v1289_v17 = vmul.f32 %v1285_v4, %v1285_v4 }
 0x292   : > { %v1290_v30 = vmul.f32 %v1286_v6, %v1286_v6  ;;  %v1288_v34 = vmul.f32 %v1284_v7, %v1284_v7 }
 0x293   : > { %v1291_v37 = vadd.f32 %v1289_v17, %v1287_v13 }
 0x294   : > { %v1298_v38 = vadd.f32 %v1290_v30, %v1288_v34 }
 0x295   : > { %v1292_v40 = vrot.slane %v1291_v37, 4 }
 0x296   : > { %v1299_v43 = vrot.slane %v1298_v38, 4 }
 0x297   : > { %v1293_v46 = vadd.f32 %v1292_v40, %v1291_v37 }
 0x298   : > { %v1300_v47 = vadd.f32 %v1299_v43, %v1298_v38 }
 0x299   : > { %v1294_v48 = vrot.slane %v1293_v46, 2 }
 0x29a   : > { %v1301_v49 = vrot.slane %v1300_v47, 2 }
 0x29b   : > { %v1295_v51 = vadd.f32 %v1294_v48, %v1293_v46  ;;  %v1331_v48 = vpop.permute.xlu0 %1330 }
 0x29c   : > { %v1302_v53 = vadd.f32 %v1301_v49, %v1300_v47 }
 0x29d   : > { %v1296_v54 = vrot.slane %v1295_v51, 1 }
 0x29e   : > { %v1303_v60 = vrot.slane %v1302_v53, 1 }
 0x29f   : > { %v1297_v56 = vadd.f32 %v1296_v54, %v1295_v51 }
 0x2a0   : > { %v1304_v58 = vadd.f32 %v1303_v60, %v1302_v53 }
 0x2a1   : > { %v1305_v29 = vmul.f32 0.0625, %v1297_v56 }
 0x2a2   : > { %v1306_v59 = vmul.f32 0.0625, %v1304_v58 }
 0x2a3   : > { %v1307_v61 = vadd.f32 1e-06, %v1305_v29 }
 0x2a4   : > { %v1308_v15 = vadd.f32 1e-06, %v1306_v59 }
 0x2a5   : > { %4261 = vrsqrt.f32 %v1307_v61 }
 0x2a6   : > { %4263 = vrsqrt.f32 %v1308_v15 }
 0x2af   : > { %v4262_v62 = vpop.eup %4261 }
 0x2b0   : > { %v4264_v63 = vpop.eup %4263  ;;  %v1313_v0 = vmul.f32 %v4262_v62, %v1285_v4  ;;  %v1311_v2 = vmul.f32 %v4262_v62, %v1283_v3  ;;  %v1341_v3 = vpop.permute.xlu1 %1340 }
 0x2b1   : > { %v1312_v10 = vmul.f32 %v4264_v63, %v1284_v7  ;;  %v1314_v13 = vmul.f32 %v4264_v63, %v1286_v6 }
 0x2b2   : > { %v3962_v30 = vpack.c.bf16 %v1313_v0, %v1311_v2  ;;  %v4775_v2 = vpop.permute.xlu0 %1558 }
 0x2b3   : > { %v3960_v17 = vpack.c.bf16 %v1314_v13, %v1312_v10 }
 0x2b4   : > { %v4751_v4 = vpop.permute.xlu1 %1562 }
 0x2b5   : > { %3961 = vmatprep.subr.bf16.mxu0 %v3960_v17  ;;  %4016 = vmatprep.subr.bf16.mxu1 %v3960_v17 }
 0x2b6   : > { %3963 = vmatpush1.bf16.msra.mxu0 %v3962_v30  ;;  %4017 = vmatpush1.bf16.msra.mxu1 %v3962_v30  ;;  %v4779_v13 = vpop.permute.xlu0 %1566 }
 0x2b8   : > { %v4753_v6 = vpop.permute.xlu1 %1570 }
 0x2b9   : > { %3922 = vmatmul.mubr.msk.f32.vlgmr.msra.gmra.mrb[4].mxu0 %vm586_vm5, %v1319_v14  ;;  %3924 = vmatmul.mubr.msk.f32.vlgmr.msra.gmra.mrb[0].mxu1 %vm586_vm5, %v1321_v18 }
 0x2ba   : > { %1437 = vmatprep.mubr.f32.mxu1 %v5781_v1  ;;  %1425 = vmatprep.mubr.f32.mxu0 %v5781_v1  ;;  %v4783_v30 = vpop.permute.xlu0 %1762 }
 0x2bc   : > { %v4755_v7 = vpop.permute.xlu1 %1662 }
 0x2bd   : > { %3925 = vmatmul.mubr.msk.f32.gmra.mrb[2].mxu1 %vm586_vm5, %v1322_v5  ;;  %3923 = vmatmul.mubr.msk.f32.gmra.mrb[6].mxu0 %vm586_vm5, %v1320_v9 }
 0x2be   : > { %v4787_v18 = vpop.permute.xlu0 %1846 }
 0x2c0   : > { %v4757_v34 = vpop.permute.xlu1 %1666 }
 0x2c2   : > { %v4791_v9 = vpop.permute.xlu0 %1858 }
 0x2c4   : > { %v4761_v58 = vpop.permute.xlu1 %1758 }
 0x2c8   : > { %v4767_v61 = vpop.permute.xlu1 %1766 }
 0x2cc   : > { %v4771_v63 = vpop.permute.xlu1 %1770 }
 0x2d0   : > { %v4773_v0 = vpop.permute.xlu1 %1850 }
 0x2d4   : > { %v4777_v10 = vpop.permute.xlu1 %1854 }
 0x2d8   : > { %v4781_v17 = vpop.permute.xlu1 %1946 }
 0x2dc   : > { %v4785_v14 = vpop.permute.xlu1 %1954 }
 0x2e0   : > { %v4789_v5 = vpop.permute.xlu1 %1958 }
 0x38c   : > { %v1421_v37 = vpop.f32.mrb[4].mxu0  ;;  %v1433_v38 = vpop.f32.mrb[0].mxu1 }
 0x38d   : > { %v1422_v40 = vadd.f32 %v1421_v37, %v1326_v57  ;;  %v1423_v43 = vpop.f32.mrb[5].mxu0  ;;  %v1435_v46 = vpop.f32.mrb[1].mxu1  ;;  %v1434_v53 = vadd.f32 %v1433_v38, %v1336_v22 }
 0x38e   : > { %v1424_v47 = vadd.f32 %v1423_v43, %v1326_v57  ;;  %v1436_v56 = vadd.f32 %v1435_v46, %v1336_v22  ;;  %v4793_v57 = vpop.permute.xlu1 %2050  ;;  %v4795_v22 = vpop.permute.xlu0 %1950 }
 0x38f   : > { %1456 = vrot.lane.b32.xlu0 %v1422_v40, %s4314_s13 }
 0x390   : > { %v1439_v49 = vpop.f32.mrb[2].mxu1  ;;  %1458 = vrot.lane.b32.xlu1 %v1424_v47, %s4314_s13  ;;  %v1427_v51 = vpop.f32.mrb[6].mxu0 }
 0x391   : > { %v1441_v54 = vpop.f32.mrb[3].mxu1  ;;  %v1429_v60 = vpop.f32.mrb[7].mxu0  ;;  %v1428_v29 = vadd.f32 %v1427_v51, %v1331_v48  ;;  %v1440_v15 = vadd.f32 %v1439_v49, %v1341_v3 }
 0x392   : > { %v1430_v59 = vadd.f32 %v1429_v60, %v1331_v48  ;;  %v1442_v62 = vadd.f32 %v1441_v54, %v1341_v3  ;;  %v4797_v3 = vpop.permute.xlu1 %2054  ;;  %v4799_v37 = vpop.permute.xlu0 %2046 }
 0x393   : > { %1464 = vrot.lane.b32.xlu0 %v1434_v53, %s4314_s13 }
 0x394   : > { %1466 = vrot.lane.b32.xlu1 %v1436_v56, %s4314_s13 }
 0x396   : > { %v4801_v38 = vpop.permute.xlu1 %2134  ;;  %v4803_v40 = vpop.permute.xlu0 %2058 }
 0x397   : > { %1460 = vrot.lane.b32.xlu0 %v1428_v29, %s4314_s13 }
 0x398   : > { %1462 = vrot.lane.b32.xlu1 %v1430_v59, %s4314_s13 }
 0x39a   : > { %v4805_v43 = vpop.permute.xlu1 %2142  ;;  %v4807_v46 = vpop.permute.xlu0 %2138 }
 0x39b   : > { %1468 = vrot.lane.b32.xlu0 %v1440_v15, %s4314_s13 }
 0x39c   : > { %1470 = vrot.lane.b32.xlu1 %v1442_v62, %s4314_s13 }
 0x39e   : > { %v4809_v47 = vpop.permute.xlu1 %2146  ;;  %v4811_v48 = vpop.permute.xlu0 %2234 }
 0x3a2   : > { %v4813_v49 = vpop.permute.xlu1 %2238  ;;  %v4815_v51 = vpop.permute.xlu0 %2246 }
 0x3a6   : > { %v4817_v53 = vpop.permute.xlu1 %2242  ;;  %v4819_v54 = vpop.permute.xlu0 %1658 }
 0x3aa   : > { %v4821_v60 = vpop.permute.xlu1 %1519  ;;  %v4823_v56 = vpop.permute.xlu0 %1670 }
 0x3ab   : > { %5859 = vst [vmem:[#allocation28_spill] sm:$0xff] %v4821_v60 }
 0x3ae   : > { %v4825_v29 = vpop.permute.xlu1 %1529  ;;  %v4827_v59 = vpop.permute.xlu0 %2322 }
 0x3af   : > { %5860 = vst [vmem:[#allocation29_spill] sm:$0xff] %v4825_v29  ;;  %5861 = vst [vmem:[#allocation30_spill] sm:$0xff] %v4827_v59 }
 0x3b2   : > { %v4829_v15 = vpop.permute.xlu1 %1534  ;;  %v4833_v28 = vpop.permute.xlu0 %2334 }
 0x3b3   : > { %5862 = vst [vmem:[#allocation31_spill] sm:$0xff] %v4829_v15  ;;  %5864 = vst [vmem:[#allocation33_spill] sm:$0xff] %v4833_v28 }
 0x3b6   : > { %v4831_v62 = vpop.permute.xlu1 %2326  ;;  %v4835_v27 = vpop.permute.xlu0 %1524 }
 0x3b7   : > { %5863 = vst [vmem:[#allocation32_spill] sm:$0xff] %v4831_v62  ;;  %5865 = vst [vmem:[#allocation34_spill] sm:$0xff] %v4835_v27 }
 0x3ba   : > { %v4837_v19 = vpop.permute.xlu1 %2330 }
 0x3bb   : > { %5866 = vst [vmem:[#allocation35_spill] sm:$0xff] %v4837_v19 }
 0x401   : > { %v1457_v25 = vpop.permute.xlu0 %1456 }
 0x402   : > { %1489 = vst.msk [vmem:[#allocation2] sm:$0xff] %vm1488_vm4, %v1457_v25  ;;  %v1459_v1 = vpop.permute.xlu1 %1458 }
 0x403   : > { %1491 = vst.msk [vmem:[#allocation2 + $0x10] sm:$0xff] %vm213_vm0, %v1459_v1 }
 0x405   : > { %v1465_v8 = vpop.permute.xlu0 %1464 }
 0x406   : > { %1495 = vst.msk [vmem:[#allocation2 + $0x30] sm:$0xff] %vm1488_vm4, %v1465_v8  ;;  %v1467_v45 = vpop.permute.xlu1 %1466 }
 0x407   : > { %v4843_v44 = vsel %vm213_vm0, %v1465_v8, %v1467_v45  ;;  %1497 = vst.msk [vmem:[#allocation2 + $0x40] sm:$0xff] %vm213_vm0, %v1467_v45 }
 0x409   : > { %v4846_v42 = vpop.permute.xlu0 %1460  ;;  %v4848_v41 = vld [vmem:[#allocation2] sm:$0xff] }
 0x40a   : > { %1492 = vst.msk [vmem:[#allocation2 + $0x18] sm:$0xff] %vm1488_vm4, %v4846_v42  ;;  %v4852_v28 = vpop.permute.xlu1 %1462  ;;  %v2149_v62 = vmul.f32 %v4801_v38, %v4848_v41  ;;  %v1573_v15 = vmul.f32 %v4775_v2, %v4848_v41  ;;  %v1861_v60 = vmul.f32 %v4787_v18, %v4848_v41 }
 0x40b   : > { %1494 = vst.msk [vmem:[#allocation2 + $0x28] sm:$0xff] %vm213_vm0, %v4852_v28 }
 0x40c   : > { %2173 = vrot.lane.b32.xlu1 %v2149_v62, %s4326_s29  ;;  %1597 = vrot.lane.b32.xlu0 %v1573_v15, %s4319_s22  ;;  %v4873_v62 = vld [vmem:[#allocation2 + $0x10] sm:$0xff] }
 0x40d   : > { %v1469_v8 = vpop.permute.xlu0 %1468  ;;  %v4862_v45 = vld [vmem:[#allocation2 + $0x30] sm:$0xff]  ;;  %v2151_v15 = vmul.f32 %v4801_v38, %v4873_v62 }
 0x40e   : > { %1498 = vst.msk [vmem:[#allocation2 + $0x48] sm:$0xff] %vm1488_vm4, %v1469_v8  ;;  %v1471_v27 = vpop.permute.xlu1 %1470  ;;  %v2155_v19 = vmul.f32 %v4805_v43, %v4862_v45  ;;  %v1579_v59 = vmul.f32 %v4779_v13, %v4862_v45  ;;  %v4881_v12 = vld [vmem:[#allocation2 + $0x40] sm:$0xff] }
 0x40f   : > { %v4870_v29 = vsel %vm213_vm0, %v1469_v8, %v1471_v27  ;;  %1500 = vst.msk [vmem:[#allocation2 + $0x58] sm:$0xff] %vm213_vm0, %v1471_v27  ;;  %v2157_v27 = vmul.f32 %v4805_v43, %v4881_v12 }
 0x410   : > { %2185 = vrot.lane.b32.xlu1 %v2155_v19, %s4326_s29  ;;  %1609 = vrot.lane.b32.xlu0 %v1579_v59, %s4319_s22  ;;  %v1867_v19 = vmul.f32 %v4777_v10, %v4862_v45  ;;  %v4890_v59 = vsel %vm213_vm0, %v1457_v25, %v1459_v1  ;;  %v1580_v1 = vmul.f32 %v4779_v13, %v4843_v44 }
 0x411   : > { %v1574_v8 = vmul.f32 %v4775_v2, %v4890_v59  ;;  %v1863_v25 = vmul.f32 %v4787_v18, %v4873_v62 }
 0x414   : > { %2177 = vrot.lane.b32.xlu1 %v2151_v15, %s4326_s29  ;;  %1885 = vrot.lane.b32.xlu0 %v1861_v60, %s4323_s26  ;;  %v1575_v15 = vmul.f32 %v4775_v2, %v4873_v62  ;;  %v1581_v60 = vmul.f32 %v4779_v13, %v4881_v12  ;;  %v1862_v2 = vmul.f32 %v4787_v18, %v4890_v59 }
 0x415   : > { %v1868_v13 = vmul.f32 %v4777_v10, %v4843_v44 }
 0x418   : > { %2189 = vrot.lane.b32.xlu1 %v2157_v27, %s4326_s29  ;;  %1897 = vrot.lane.b32.xlu0 %v1867_v19, %s4323_s26  ;;  %v1869_v27 = vmul.f32 %v4777_v10, %v4881_v12  ;;  %v1645_v19 = vmul.f32 %v4848_v41, %v4455_v16  ;;  %v2227_v10 = vmul.f32 %v4862_v45, %v4553_v50 }
 0x41a   : > { %v1673_v18 = vmul.f32 %v4819_v54, %v1645_v19 }
 0x41c   : > { %1599 = vrot.lane.b32.xlu1 %v1574_v8, %s4319_s22  ;;  %1601 = vrot.lane.b32.xlu0 %v1575_v15, %s4319_s22  ;;  %v2221_v8 = vmul.f32 %v4848_v41, %v4553_v50 }
 0x41e   : > { %v2249_v15 = vmul.f32 %v4811_v48, %v2221_v8  ;;  %v1751_v8 = vmul.f32 %v4862_v45, %v4477_v23 }
 0x420   : > { %1613 = vrot.lane.b32.xlu0 %v1581_v60, %s4319_s22  ;;  %1611 = vrot.lane.b32.xlu1 %v1580_v1, %s4319_s22  ;;  %v1651_v60 = vmul.f32 %v4862_v45, %v4455_v16 }
 0x422   : > { %v1679_v1 = vmul.f32 %v4757_v34, %v1651_v60 }
 0x424   : > { %1889 = vrot.lane.b32.xlu0 %v1863_v25, %s4323_s26  ;;  %1887 = vrot.lane.b32.xlu1 %v1862_v2, %s4323_s26  ;;  %v2255_v25 = vmul.f32 %v4817_v53, %v2227_v10  ;;  %v1745_v2 = vmul.f32 %v4848_v41, %v4477_v23  ;;  %v1933_v10 = vmul.f32 %v4848_v41, %v4504_v32 }
 0x428   : > { %1901 = vrot.lane.b32.xlu0 %v1869_v27, %s4323_s26  ;;  %1899 = vrot.lane.b32.xlu1 %v1868_v13, %s4323_s26  ;;  %v2223_v27 = vmul.f32 %v4873_v62, %v4560_v52  ;;  %v1773_v13 = vmul.f32 %v4761_v58, %v1745_v2 }
 0x42a   : > { %v2251_v19 = vmul.f32 %v4811_v48, %v2223_v27  ;;  %v1939_v27 = vmul.f32 %v4862_v45, %v4504_v32 }
 0x42c   : > { %1697 = vrot.lane.b32.xlu0 %v1673_v18, %s4321_s24  ;;  %2273 = vrot.lane.b32.xlu1 %v2249_v15, %s4328_s30  ;;  %v2229_v18 = vmul.f32 %v4881_v12, %v4560_v52  ;;  %v1779_v15 = vmul.f32 %v4767_v61, %v1751_v8 }
 0x42e   : > { %v2257_v60 = vmul.f32 %v4817_v53, %v2229_v18  ;;  %v2033_v18 = vmul.f32 %v4848_v41, %v4521_v36 }
 0x430   : > { %1709 = vrot.lane.b32.xlu0 %v1679_v1, %s4321_s24  ;;  %2285 = vrot.lane.b32.xlu1 %v2255_v25, %s4328_s30  ;;  %v4950_v1 = vld [vmem:[#allocation2 + $0x18] sm:$0xff]  ;;  %v1961_v25 = vmul.f32 %v4781_v17, %v1933_v10 }
 0x431   : > { %5867 = vst [vmem:[#allocation36_spill] sm:$0xff] %v4950_v1  ;;  %v1576_v2 = vmul.f32 %v4751_v4, %v4950_v1 }
 0x434   : > { %1797 = vrot.lane.b32.xlu0 %v1773_v13, %s4322_s25  ;;  %2277 = vrot.lane.b32.xlu1 %v2251_v19, %s4328_s30  ;;  %v4959_v13 = vld [vmem:[#allocation2 + $0x48] sm:$0xff]  ;;  %v1967_v19 = vmul.f32 %v4785_v14, %v1939_v27 }
 0x435   : > { %5868 = vst [vmem:[#allocation37_spill] sm:$0xff] %v4959_v13  ;;  %v1582_v8 = vmul.f32 %v4753_v6, %v4959_v13 }
 0x438   : > { %1809 = vrot.lane.b32.xlu0 %v1779_v15, %s4322_s25  ;;  %2289 = vrot.lane.b32.xlu1 %v2257_v60, %s4328_s30  ;;  %v1646_v15 = vmul.f32 %v4890_v59, %v4473_v21  ;;  %v2061_v60 = vmul.f32 %v4799_v37, %v2033_v18  ;;  %v2150_v18 = vmul.f32 %v4801_v38, %v4890_v59 }
 0x43a   : > { %v1674_v10 = vmul.f32 %v4819_v54, %v1646_v15 }
 0x43c   : > { %1985 = vrot.lane.b32.xlu0 %v1961_v25, %s4324_s27  ;;  %1603 = vrot.lane.b32.xlu1 %v1576_v2, %s4319_s22  ;;  %v2039_v25 = vmul.f32 %v4862_v45, %v4521_v36  ;;  %v1652_v2 = vmul.f32 %v4843_v44, %v4473_v21 }
 0x43e   : > { %v2067_v27 = vmul.f32 %v4797_v3, %v2039_v25 }
 0x440   : > { %1997 = vrot.lane.b32.xlu0 %v1967_v19, %s4324_s27  ;;  %1615 = vrot.lane.b32.xlu1 %v1582_v8, %s4319_s22  ;;  %v1680_v19 = vmul.f32 %v4757_v34, %v1652_v2  ;;  %v1746_v8 = vmul.f32 %v4890_v59, %v4487_v26  ;;  %v1647_v2 = vmul.f32 %v4873_v62, %v4467_v20 }
 0x442   : > { %v1774_v15 = vmul.f32 %v4761_v58, %v1746_v8  ;;  %v1675_v38 = vmul.f32 %v4819_v54, %v1647_v2  ;;  %v1870_v8 = vmul.f32 %v4791_v9, %v4959_v13  ;;  %v1934_v54 = vmul.f32 %v4890_v59, %v4510_v33 }
 0x444   : > { %2085 = vrot.lane.b32.xlu0 %v2061_v60, %s4325_s28  ;;  %1699 = vrot.lane.b32.xlu1 %v1674_v10, %s4321_s24  ;;  %v1752_v60 = vmul.f32 %v4843_v44, %v4487_v26  ;;  %v2156_v10 = vmul.f32 %v4805_v43, %v4843_v44 }
 0x446   : > { %v1780_v25 = vmul.f32 %v4767_v61, %v1752_v60  ;;  %v1962_v60 = vmul.f32 %v4781_v17, %v1934_v54  ;;  %v2035_v54 = vmul.f32 %v4873_v62, %v4516_v35 }
 0x448   : > { %2097 = vrot.lane.b32.xlu0 %v2067_v27, %s4325_s28  ;;  %1711 = vrot.lane.b32.xlu1 %v1680_v19, %s4321_s24  ;;  %v1864_v27 = vmul.f32 %v4773_v0, %v4950_v1  ;;  %v1653_v19 = vmul.f32 %v4881_v12, %v4467_v20 }
 0x44a   : > { %v1681_v43 = vmul.f32 %v4757_v34, %v1653_v19  ;;  %v1753_v34 = vmul.f32 %v4881_v12, %v4479_v24 }
 0x44c   : > { %2175 = vrot.lane.b32.xlu0 %v2150_v18, %s4326_s29  ;;  %1799 = vrot.lane.b32.xlu1 %v1774_v15, %s4322_s25  ;;  %v1747_v18 = vmul.f32 %v4873_v62, %v4479_v24 }
 0x44e   : > { %v1775_v15 = vmul.f32 %v4761_v58, %v1747_v18  ;;  %v2034_v58 = vmul.f32 %v4890_v59, %v4529_v39 }
 0x450   : > { %2187 = vrot.lane.b32.xlu0 %v2156_v10, %s4326_s29  ;;  %1811 = vrot.lane.b32.xlu1 %v1780_v25, %s4322_s25  ;;  %v1940_v10 = vmul.f32 %v4843_v44, %v4510_v33  ;;  %v1781_v25 = vmul.f32 %v4767_v61, %v1753_v34  ;;  %v2062_v19 = vmul.f32 %v4799_v37, %v2034_v58 }
 0x451   : > { %v2040_v61 = vmul.f32 %v4843_v44, %v4529_v39  ;;  %v2041_v34 = vmul.f32 %v4881_v12, %v4516_v35 }
 0x452   : > { %v1968_v2 = vmul.f32 %v4785_v14, %v1940_v10 }
 0x453   : > { %v2068_v18 = vmul.f32 %v4797_v3, %v2040_v61 }
 0x454   : > { %1701 = vrot.lane.b32.xlu0 %v1675_v38, %s4321_s24  ;;  %1891 = vrot.lane.b32.xlu1 %v1864_v27, %s4323_s26  ;;  %v1935_v38 = vmul.f32 %v4873_v62, %v4501_v31  ;;  %v2069_v62 = vmul.f32 %v4797_v3, %v2041_v34  ;;  %v2158_v3 = vmul.f32 %v4809_v47, %v4959_v13 }
 0x456   : > { %v1963_v27 = vmul.f32 %v4781_v17, %v1935_v38  ;;  %v5044_v17 = vld [vmem:[#allocation2 + $0x28] sm:$0xff]  ;;  %v1648_v38 = vmul.f32 %v4950_v1, %v4455_v16 }
 0x457   : > { %v2154_v34 = vmul.f32 %v4807_v46, %v5044_v17 }
 0x458   : > { %1713 = vrot.lane.b32.xlu0 %v1681_v43, %s4321_s24  ;;  %1903 = vrot.lane.b32.xlu1 %v1870_v8, %s4323_s26  ;;  %v1941_v43 = vmul.f32 %v4881_v12, %v4501_v31  ;;  %v1866_v12 = vmul.f32 %v4773_v0, %v5044_v17 }
 0x45a   : > { %v1969_v8 = vmul.f32 %v4785_v14, %v1941_v43  ;;  %v5053_v14 = vld [vmem:[#allocation2 + $0x58] sm:$0xff]  ;;  %v1654_v43 = vmul.f32 %v4959_v13, %v4455_v16 }
 0x45b   : > { %v1584_v10 = vmul.f32 %v4753_v6, %v5053_v14 }
 0x45c   : > { %1801 = vrot.lane.b32.xlu0 %v1775_v15, %s4322_s25  ;;  %1987 = vrot.lane.b32.xlu1 %v1962_v60, %s4324_s27  ;;  %v2063_v15 = vmul.f32 %v4799_v37, %v2035_v54  ;;  %v1578_v60 = vmul.f32 %v4751_v4, %v5044_v17  ;;  %v2152_v37 = vmul.f32 %v4807_v46, %v4950_v1 }
 0x45d   : > { %v1748_v54 = vmul.f32 %v4950_v1, %v4477_v23 }
 0x460   : > { %1813 = vrot.lane.b32.xlu0 %v1781_v25, %s4322_s25  ;;  %1999 = vrot.lane.b32.xlu1 %v1968_v2, %s4324_s27  ;;  %v1872_v25 = vmul.f32 %v4791_v9, %v5053_v14  ;;  %v2222_v2 = vmul.f32 %v4890_v59, %v4568_v55 }
 0x462   : > { %v2250_v58 = vmul.f32 %v4811_v48, %v2222_v2  ;;  %v1682_v48 = vmul.f32 %v4823_v56, %v1654_v43  ;;  %v5119_v2 = vsel %vm213_vm0, %v4846_v42, %v4852_v28  ;;  %v1942_v43 = vmul.f32 %v4959_v13, %v4504_v32 }
 0x464   : > { %1989 = vrot.lane.b32.xlu0 %v1963_v27, %s4324_s27  ;;  %2087 = vrot.lane.b32.xlu1 %v2062_v19, %s4325_s28  ;;  %v1676_v27 = vmul.f32 %v4755_v7, %v1648_v38  ;;  %v2228_v19 = vmul.f32 %v4843_v44, %v4568_v55 }
 0x468   : > { %2001 = vrot.lane.b32.xlu0 %v1969_v8, %s4324_s27  ;;  %2099 = vrot.lane.b32.xlu1 %v2068_v18, %s4325_s28  ;;  %v2256_v18 = vmul.f32 %v4817_v53, %v2228_v19  ;;  %v1754_v53 = vmul.f32 %v4959_v13, %v4477_v23 }
 0x46c   : > { %2089 = vrot.lane.b32.xlu0 %v2063_v15, %s4325_s28  ;;  %1607 = vrot.lane.b32.xlu1 %v1578_v60, %s4319_s22 }
 0x470   : > { %2101 = vrot.lane.b32.xlu0 %v2069_v62, %s4325_s28  ;;  %1619 = vrot.lane.b32.xlu1 %v1584_v10, %s4319_s22  ;;  %v1776_v62 = vmul.f32 %v4783_v30, %v1748_v54 }
 0x474   : > { %2179 = vrot.lane.b32.xlu0 %v2152_v37, %s4326_s29  ;;  %1895 = vrot.lane.b32.xlu1 %v1866_v12, %s4323_s26  ;;  %v2160_v12 = vmul.f32 %v4809_v47, %v5053_v14 }
 0x478   : > { %2191 = vrot.lane.b32.xlu0 %v2158_v3, %s4326_s29  ;;  %1907 = vrot.lane.b32.xlu1 %v1872_v25, %s4323_s26  ;;  %v1782_v3 = vmul.f32 %v4771_v63, %v1754_v53  ;;  %v1936_v25 = vmul.f32 %v4950_v1, %v4504_v32  ;;  %v1865_v53 = vmul.f32 %v4773_v0, %v5119_v2 }
 0x47a   : > { %v1964_v19 = vmul.f32 %v4795_v22, %v1936_v25 }
 0x47c   : > { %2275 = vrot.lane.b32.xlu0 %v2250_v58, %s4328_s30  ;;  %1703 = vrot.lane.b32.xlu1 %v1676_v27, %s4321_s24  ;;  %v1577_v27 = vmul.f32 %v4751_v4, %v5119_v2  ;;  %v2036_v4 = vmul.f32 %v4950_v1, %v4521_v36 }
 0x47e   : > { %v5086_v61 = vpop.permute.xlu1 %2173  ;;  %v5088_v8 = vpop.permute.xlu0 %1597 }
 0x480   : > { %2287 = vrot.lane.b32.xlu0 %v2256_v18, %s4328_s30  ;;  %1715 = vrot.lane.b32.xlu1 %v1682_v48, %s4321_s24  ;;  %v1970_v18 = vmul.f32 %v4789_v5, %v1942_v43  ;;  %v1583_v48 = vmul.f32 %v4753_v6, %v4870_v29 }
 0x482   : > { %v5096_v15 = vpop.permute.xlu1 %2185  ;;  %v5098_v60 = vpop.permute.xlu0 %1609 }
 0x484   : > { %2183 = vrot.lane.b32.xlu0 %v2154_v34, %s4326_s29  ;;  %1803 = vrot.lane.b32.xlu1 %v1776_v62, %s4322_s25  ;;  %v2064_v62 = vmul.f32 %v4793_v57, %v2036_v4  ;;  %v2230_v4 = vmul.f32 %v4959_v13, %v4553_v50 }
 0x486   : > { %v5107_v10 = vpop.permute.xlu1 %2177  ;;  %v5109_v37 = vpop.permute.xlu0 %1885 }
 0x488   : > { %2195 = vrot.lane.b32.xlu0 %v2160_v12, %s4326_s29  ;;  %1815 = vrot.lane.b32.xlu1 %v1782_v3, %s4322_s25  ;;  %v2042_v12 = vmul.f32 %v4959_v13, %v4521_v36  ;;  %v1655_v36 = vmul.f32 %v4870_v29, %v4473_v21  ;;  %v5875_v13 = vld [vmem:[#allocation29_spill] sm:$0xff] }
 0x48a   : > { %v5123_v38 = vpop.permute.xlu1 %2189  ;;  %v5125_v58 = vpop.permute.xlu0 %1897  ;;  %v2070_v25 = vmul.f32 %v4803_v40, %v2042_v12  ;;  %v2258_v12 = vmul.f32 %v4815_v51, %v2230_v4  ;;  %v1649_v4 = vmul.f32 %v5119_v2, %v4473_v21 }
 0x48c   : > { %1605 = vrot.lane.b32.xlu0 %v1577_v27, %s4319_s22  ;;  %1991 = vrot.lane.b32.xlu1 %v1964_v19, %s4324_s27  ;;  %v1871_v27 = vmul.f32 %v4791_v9, %v4870_v29  ;;  %v2224_v19 = vmul.f32 %v4950_v1, %v4553_v50 }
 0x48e   : > { %v5134_v28 = vpop.permute.xlu1 %1599  ;;  %v5136_v42 = vpop.permute.xlu0 %1601 }
 0x48f   : > { %v1621_v21 = vsel %vm273_vm8, %v5088_v8, %v5134_v28 }
 0x490   : > { %2003 = vrot.lane.b32.xlu1 %v1970_v18, %s4324_s27  ;;  %1617 = vrot.lane.b32.xlu0 %v1583_v48, %s4319_s22  ;;  %v2153_v18 = vmul.f32 %v4807_v46, %v5119_v2  ;;  %v2252_v48 = vmul.f32 %v4813_v49, %v2224_v19  ;;  %v1650_v46 = vmul.f32 %v5044_v17, %v4467_v20 }
 0x492   : > { %v5145_v54 = vpop.permute.xlu1 %1611  ;;  %v5147_v34 = vpop.permute.xlu0 %1613 }
 0x494   : > { %2091 = vrot.lane.b32.xlu1 %v2064_v62, %s4325_s28  ;;  %1893 = vrot.lane.b32.xlu0 %v1865_v53, %s4323_s26  ;;  %v2159_v53 = vmul.f32 %v4809_v47, %v4870_v29 }
 0x496   : > { %v5156_v6 = vpop.permute.xlu1 %1887  ;;  %v5158_v3 = vpop.permute.xlu0 %1889 }
 0x498   : > { %2103 = vrot.lane.b32.xlu1 %v2070_v25, %s4325_s28  ;;  %1905 = vrot.lane.b32.xlu0 %v1871_v27, %s4323_s26  ;;  %v2226_v25 = vmul.f32 %v5044_v17, %v4560_v52 }
 0x49a   : > { %v5167_v0 = vpop.permute.xlu1 %1899  ;;  %v5169_v43 = vpop.permute.xlu0 %1901  ;;  %v2254_v47 = vmul.f32 %v4813_v49, %v2226_v25  ;;  %v1750_v25 = vmul.f32 %v5044_v17, %v4479_v24 }
 0x49c   : > { %2181 = vrot.lane.b32.xlu1 %v2153_v18, %s4326_s29  ;;  %2279 = vrot.lane.b32.xlu0 %v2252_v48, %s4328_s30  ;;  %v1678_v18 = vmul.f32 %v4755_v7, %v1650_v46  ;;  %v1656_v48 = vmul.f32 %v5053_v14, %v4467_v20  ;;  %v1677_v46 = vmul.f32 %v4755_v7, %v1649_v4 }
 0x49d   : > { %v1778_v32 = vmul.f32 %v4783_v30, %v1750_v25  ;;  %v1756_v7 = vmul.f32 %v5053_v14, %v4479_v24  ;;  %v1749_v4 = vmul.f32 %v5119_v2, %v4487_v26  ;;  %v1622_v20 = vsel %vm273_vm8, %v5134_v28, %v5136_v42 }
 0x49e   : > { %v5178_v9 = vpop.permute.xlu1 %2273  ;;  %v5180_v62 = vpop.permute.xlu0 %1697  ;;  %v1684_v50 = vmul.f32 %v4823_v56, %v1656_v48  ;;  %v1683_v48 = vmul.f32 %v4823_v56, %v1655_v36  ;;  %v1938_v36 = vmul.f32 %v5044_v17, %v4501_v31  ;;  %v1755_v56 = vmul.f32 %v4870_v29, %v4487_v26 }
 0x49f   : > { %v1784_v23 = vmul.f32 %v4771_v63, %v1756_v7  ;;  %v1777_v25 = vmul.f32 %v4783_v30, %v1749_v4  ;;  %v1944_v30 = vmul.f32 %v5053_v14, %v4501_v31  ;;  %v1937_v4 = vmul.f32 %v5119_v2, %v4510_v33 }
 0x4a0   : > { %2193 = vrot.lane.b32.xlu1 %v2159_v53, %s4326_s29  ;;  %2291 = vrot.lane.b32.xlu0 %v2258_v12, %s4328_s30  ;;  %v1966_v24 = vmul.f32 %v4795_v22, %v1938_v36  ;;  %v1783_v7 = vmul.f32 %v4771_v63, %v1755_v56  ;;  %v2038_v63 = vmul.f32 %v5044_v17, %v4516_v35 }
 0x4a1   : > { %v1972_v26 = vmul.f32 %v4789_v5, %v1944_v30  ;;  %v1965_v16 = vmul.f32 %v4795_v22, %v1937_v4  ;;  %v1943_v36 = vmul.f32 %v4870_v29, %v4510_v33  ;;  %v2044_v22 = vmul.f32 %v5053_v14, %v4516_v35  ;;  %v5873_v33 = vld [vmem:[#allocation8_spill] sm:$0xff] }
 0x4a2   : > { %v5191_v27 = vpop.permute.xlu1 %2285  ;;  %v5193_v19 = vpop.permute.xlu0 %1709  ;;  %v2037_v17 = vmul.f32 %v5119_v2, %v4529_v39 }
 0x4a3   : > { %v1971_v31 = vmul.f32 %v4789_v5, %v1943_v36  ;;  %v2225_v5 = vmul.f32 %v5119_v2, %v4568_v55 }
 0x4a4   : > { %1707 = vrot.lane.b32.xlu1 %v1678_v18, %s4321_s24  ;;  %2283 = vrot.lane.b32.xlu0 %v2254_v47, %s4328_s30  ;;  %v2065_v4 = vmul.f32 %v4793_v57, %v2037_v17 }
 0x4a6   : > { %v5203_v53 = vpop.permute.xlu1 %2277  ;;  %v5205_v12 = vpop.permute.xlu0 %1797 }
 0x4a8   : > { %1719 = vrot.lane.b32.xlu1 %v1684_v50, %s4321_s24  ;;  %1705 = vrot.lane.b32.xlu0 %v1677_v46, %s4321_s24 }
 0x4aa   : > { %v5215_v18 = vpop.permute.xlu1 %2289  ;;  %v5217_v47 = vpop.permute.xlu0 %1809 }
 0x4ac   : > { %1807 = vrot.lane.b32.xlu1 %v1778_v32, %s4322_s25  ;;  %1717 = vrot.lane.b32.xlu0 %v1683_v48, %s4321_s24 }
 0x4ae   : > { %v5227_v50 = vpop.permute.xlu1 %1603  ;;  %v5229_v46 = vpop.permute.xlu0 %1985 }
 0x4af   : > { %5869 = vst [vmem:[#allocation38_spill] sm:$0xff] %v5227_v50 }
 0x4b0   : > { %1819 = vrot.lane.b32.xlu1 %v1784_v23, %s4322_s25  ;;  %1805 = vrot.lane.b32.xlu0 %v1777_v25, %s4322_s25 }
 0x4b2   : > { %v5239_v32 = vpop.permute.xlu1 %1615  ;;  %v5241_v48 = vpop.permute.xlu0 %1997 }
 0x4b3   : > { %5870 = vst [vmem:[#allocation39_spill] sm:$0xff] %v5239_v32 }
 0x4b4   : > { %1995 = vrot.lane.b32.xlu1 %v1966_v24, %s4324_s27  ;;  %1817 = vrot.lane.b32.xlu0 %v1783_v7, %s4322_s25  ;;  %v2066_v7 = vmul.f32 %v4793_v57, %v2038_v63  ;;  %v2043_v63 = vmul.f32 %v4870_v29, %v4529_v39  ;;  %v2231_v57 = vmul.f32 %v4870_v29, %v4568_v55 }
 0x4b6   : > { %v1700_v23 = vpop.permute.xlu1 %1699  ;;  %v5251_v25 = vpop.permute.xlu0 %2085  ;;  %v2071_v35 = vmul.f32 %v4803_v40, %v2043_v63 }
 0x4b7   : > { %v1721_v8 = vsel %vm486_vm12, %v5180_v62, %v1700_v23 }
 0x4b8   : > { %2007 = vrot.lane.b32.xlu1 %v1972_v26, %s4324_s27  ;;  %1993 = vrot.lane.b32.xlu0 %v1965_v16, %s4324_s27  ;;  %v2072_v16 = vmul.f32 %v4803_v40, %v2044_v22  ;;  %v2232_v22 = vmul.f32 %v5053_v14, %v4560_v52  ;;  %v1509_v52 = vmul.f32 %v4848_v41, %v4444_v11  ;;  %v5874_v41 = vld [vmem:[#allocation28_spill] sm:$0xff] }
 0x4ba   : > { %v1712_v24 = vpop.permute.xlu1 %1711  ;;  %v5261_v56 = vpop.permute.xlu0 %2097  ;;  %v2260_v39 = vmul.f32 %v4815_v51, %v2232_v22 }
 0x4bb   : > { %v1725_v50 = vsel %vm486_vm12, %v5193_v19, %v1712_v24 }
 0x4bc   : > { %2095 = vrot.lane.b32.xlu1 %v2066_v7, %s4325_s28  ;;  %2005 = vrot.lane.b32.xlu0 %v1971_v31, %s4324_s27  ;;  %v2253_v31 = vmul.f32 %v4813_v49, %v2225_v5 }
 0x4be   : > { %v1800_v26 = vpop.permute.xlu1 %1799  ;;  %v5271_v30 = vpop.permute.xlu0 %2175 }
 0x4c0   : > { %2107 = vrot.lane.b32.xlu1 %v2072_v16, %s4325_s28  ;;  %2093 = vrot.lane.b32.xlu0 %v2065_v4, %s4325_s28  ;;  %v2259_v4 = vmul.f32 %v4815_v51, %v2231_v57  ;;  %v1510_v57 = vmul.f32 %v4890_v59, %v5873_v33 }
 0x4c2   : > { %v1812_v36 = vpop.permute.xlu1 %1811  ;;  %v5281_v7 = vpop.permute.xlu0 %2187  ;;  %v1538_v59 = vmul.f32 %v5874_v41, %v1510_v57 }
 0x4c4   : > { %2281 = vrot.lane.b32.xlu1 %v2253_v31, %s4328_s30  ;;  %2105 = vrot.lane.b32.xlu0 %v2071_v35, %s4325_s28 }
 0x4c6   : > { %v5291_v17 = vpop.permute.xlu1 %1891  ;;  %v1702_v16 = vpop.permute.xlu0 %1701 }
 0x4c7   : > { %5871 = vst [vmem:[#allocation40_spill] sm:$0xff] %v5291_v17  ;;  %v1722_v28 = vsel %vm486_vm12, %v1700_v23, %v1702_v16 }
 0x4c8   : > { %2293 = vrot.lane.b32.xlu1 %v2259_v4, %s4328_s30  ;;  %2295 = vrot.lane.b32.xlu0 %v2260_v39, %s4328_s30  ;;  %v1513_v39 = vmul.f32 %v4862_v45, %v4444_v11  ;;  %v1514_v4 = vmul.f32 %v4843_v44, %v5873_v33  ;;  %v1625_v45 = vsel %vm273_vm8, %v5098_v60, %v5145_v54 }
 0x4c9   : > { %v1626_v44 = vsel %vm273_vm8, %v5145_v54, %v5147_v34  ;;  %v1821_v60 = vsel %vm603_vm13, %v5205_v12, %v1800_v26 }
 0x4ca   : > { %v5297_v40 = vpop.permute.xlu1 %1903  ;;  %v1714_v49 = vpop.permute.xlu0 %1713  ;;  %v1541_v57 = vmul.f32 %v5875_v13, %v1513_v39 }
 0x4cb   : > { %5872 = vst [vmem:[#allocation41_spill] sm:$0xff] %v5297_v40  ;;  %v1537_v40 = vmul.f32 %v5874_v41, %v1509_v52  ;;  %v1638_v52 = vadd.f32 %v1622_v20, %v1538_v59  ;;  %v1542_v41 = vmul.f32 %v5875_v13, %v1514_v4  ;;  %v1726_v1 = vsel %vm486_vm12, %v1712_v24, %v1714_v49 }
 0x4cc   : > { %v1641_v34 = vadd.f32 %v1625_v45, %v1541_v57  ;;  %v1825_v13 = vsel %vm603_vm13, %v5217_v47, %v1812_v36  ;;  %v1910_v47 = vsel %vm705_vm14, %v5156_v6, %v5158_v3  ;;  %v2198_v57 = vsel %vm1041_vm2, %v5271_v30, %v5107_v10 }
 0x4cd   : > { %v1637_v42 = vadd.f32 %v1621_v21, %v1537_v40  ;;  %v1642_v62 = vadd.f32 %v1626_v44, %v1542_v41  ;;  %v1738_v23 = vadd.f32 %v1722_v28, %v1638_v52  ;;  %v2197_v52 = vsel %vm1041_vm2, %v5086_v61, %v5271_v30 }
 0x4ce   : > { %v1988_v5 = vpop.permute.xlu1 %1987  ;;  %v1802_v14 = vpop.permute.xlu0 %1801  ;;  %v1741_v19 = vadd.f32 %v1725_v50, %v1641_v34  ;;  %v2202_v61 = vsel %vm1041_vm2, %v5281_v7, %v5123_v38  ;;  %v5877_v38 = vld [vmem:[#allocation35_spill] sm:$0xff] }
 0x4cf   : > { %v1822_v54 = vsel %vm603_vm13, %v1800_v26, %v1802_v14  ;;  %v1737_v11 = vadd.f32 %v1721_v8, %v1637_v42  ;;  %v1742_v39 = vadd.f32 %v1726_v1, %v1642_v62  ;;  %v1909_v14 = vsel %vm705_vm14, %v5109_v37, %v5156_v6 }
 0x4d0   : > { %v1838_v12 = vadd.f32 %v1822_v54, %v1738_v23  ;;  %v1841_v4 = vadd.f32 %v1825_v13, %v1741_v19  ;;  %v2009_v50 = vsel %vm822_vm15, %v5229_v46, %v1988_v5  ;;  %v1913_v1 = vsel %vm705_vm14, %v5125_v58, %v5167_v0 }
 0x4d1   : > { %v1837_v40 = vadd.f32 %v1821_v60, %v1737_v11  ;;  %v2201_v54 = vsel %vm1041_vm2, %v5096_v15, %v5281_v7  ;;  %v5876_v15 = vld [vmem:[#allocation30_spill] sm:$0xff] }
 0x4d2   : > { %v2000_v63 = vpop.permute.xlu1 %1999  ;;  %v1814_v31 = vpop.permute.xlu0 %1813  ;;  %v1926_v59 = vadd.f32 %v1910_v47, %v1838_v12 }
 0x4d3   : > { %v1826_v16 = vsel %vm603_vm13, %v1812_v36, %v1814_v31  ;;  %v1914_v36 = vsel %vm705_vm14, %v5167_v0, %v5169_v43  ;;  %v1925_v31 = vadd.f32 %v1909_v14, %v1837_v40  ;;  %v2013_v37 = vsel %vm822_vm15, %v5241_v48, %v2000_v63 }
 0x4d4   : > { %v1842_v24 = vadd.f32 %v1826_v16, %v1742_v39 }
 0x4d6   : > { %v2088_v55 = vpop.permute.xlu1 %2087  ;;  %v1990_v35 = vpop.permute.xlu0 %1989  ;;  %v1930_v58 = vadd.f32 %v1914_v36, %v1842_v24 }
 0x4d7   : > { %v2010_v11 = vsel %vm822_vm15, %v1988_v5, %v1990_v35  ;;  %v2109_v6 = vsel %vm939_vm1, %v5251_v25, %v2088_v55  ;;  %v2025_v5 = vadd.f32 %v2009_v50, %v1925_v31  ;;  %v1929_v35 = vadd.f32 %v1913_v1, %v1841_v4  ;;  %v5878_v1 = vld [vmem:[#allocation34_spill] sm:$0xff] }
 0x4d8   : > { %v2026_v45 = vadd.f32 %v2010_v11, %v1926_v59  ;;  %v1512_v50 = vmul.f32 %v5119_v2, %v5873_v33  ;;  %v1516_v59 = vmul.f32 %v4870_v29, %v5873_v33 }
 0x4d9   : > { %v2029_v48 = vadd.f32 %v2013_v37, %v1929_v35  ;;  %v2125_v28 = vadd.f32 %v2109_v6, %v2025_v5 }
 0x4da   : > { %v2100_v51 = vpop.permute.xlu1 %2099  ;;  %v2002_v22 = vpop.permute.xlu0 %2001  ;;  %v1540_v36 = vmul.f32 %v5878_v1, %v1512_v50 }
 0x4db   : > { %v2014_v3 = vsel %vm822_vm15, %v2000_v63, %v2002_v22  ;;  %v2113_v0 = vsel %vm939_vm1, %v5261_v56, %v2100_v51  ;;  %v2213_v41 = vadd.f32 %v2197_v52, %v2125_v28 }
 0x4dc   : > { %v2030_v25 = vadd.f32 %v2014_v3, %v1930_v58  ;;  %v2129_v63 = vadd.f32 %v2113_v0, %v2029_v48 }
 0x4de   : > { %v5315_v17 = vpop.permute.xlu1 %1607  ;;  %v2090_v32 = vpop.permute.xlu0 %2089  ;;  %v2217_v10 = vadd.f32 %v2201_v54, %v2129_v63 }
 0x4df   : > { %v2110_v46 = vsel %vm939_vm1, %v2088_v55, %v2090_v32 }
 0x4e0   : > { %v2126_v42 = vadd.f32 %v2110_v46, %v2026_v45  ;;  %v5879_v46 = vld [vmem:[#allocation31_spill] sm:$0xff] }
 0x4e1   : > { %v1544_v5 = vmul.f32 %v5879_v46, %v1516_v59 }
 0x4e2   : > { %v5334_v21 = vpop.permute.xlu1 %1619  ;;  %v2102_v20 = vpop.permute.xlu0 %2101  ;;  %v2214_v60 = vadd.f32 %v2198_v57, %v2126_v42 }
 0x4e3   : > { %v2114_v43 = vsel %vm939_vm1, %v2100_v51, %v2102_v20 }
 0x4e4   : > { %v2130_v22 = vadd.f32 %v2114_v43, %v2030_v25 }
 0x4e6   : > { %v5339_v49 = vpop.permute.xlu1 %1895  ;;  %v5341_v26 = vpop.permute.xlu0 %2179  ;;  %v2218_v30 = vadd.f32 %v2202_v61, %v2130_v22 }
 0x4ea   : > { %v5364_v44 = vpop.permute.xlu1 %1907  ;;  %v5366_v8 = vpop.permute.xlu0 %2191 }
 0x4ee   : > { %v5371_v55 = vpop.permute.xlu1 %1703  ;;  %v2276_v32 = vpop.permute.xlu0 %2275 }
 0x4ef   : > { %v2297_v56 = vsel %vm1158_vm3, %v5178_v9, %v2276_v32  ;;  %v2298_v51 = vsel %vm1158_vm3, %v2276_v32, %v5203_v53 }
 0x4f0   : > { %v2313_v34 = vadd.f32 %v2297_v56, %v2213_v41  ;;  %v2314_v62 = vadd.f32 %v2298_v51, %v2214_v60  ;;  %v5880_v56 = vld [vmem:[#allocation7_spill] sm:$0xff]  ;;  %v5881_v51 = vld [vmem:[#allocation36_spill] sm:$0xff] }
 0x4f1   : > { %v1511_v41 = vmul.f32 %v5881_v51, %v5880_v56 }
 0x4f2   : > { %v5389_v23 = vpop.permute.xlu1 %1715  ;;  %v2288_v9 = vpop.permute.xlu0 %2287  ;;  %v2337_v19 = vadd.f32 %v5876_v15, %v2313_v34  ;;  %v2338_v40 = vadd.f32 %v5876_v15, %v2314_v62 }
 0x4f3   : > { %v2301_v53 = vsel %vm1158_vm3, %v5191_v27, %v2288_v9  ;;  %v2302_v20 = vsel %vm1158_vm3, %v2288_v9, %v5215_v18 }
 0x4f4   : > { %v2317_v13 = vadd.f32 %v2301_v53, %v2217_v10  ;;  %v2318_v16 = vadd.f32 %v2302_v20, %v2218_v30  ;;  %v5882_v30 = vld [vmem:[#allocation38_spill] sm:$0xff]  ;;  %v1539_v20 = vmul.f32 %v5878_v1, %v1511_v41 }
 0x4f6   : > { %v2341_v7 = vadd.f32 %v5877_v38, %v2317_v13  ;;  %v2342_v39 = vadd.f32 %v5877_v38, %v2318_v16  ;;  %v1804_v12 = vpop.permute.xlu1 %1803  ;;  %v5399_v4 = vpop.permute.xlu0 %2183  ;;  %v5883_v13 = vld [vmem:[#allocation37_spill] sm:$0xff] }
 0x4f7   : > { %v1515_v16 = vmul.f32 %v5883_v13, %v5880_v56 }
 0x4f8   : > { %v5401_v24 = vmul.f32 %v2341_v7, %v2337_v19  ;;  %v5403_v14 = vmul.f32 %v2342_v39, %v2338_v40 }
 0x4f9   : > { %v1543_v59 = vmul.f32 %v5879_v46, %v1515_v16 }
 0x4fa   : > { %v1816_v27 = vpop.permute.xlu1 %1815  ;;  %v5405_v47 = vpop.permute.xlu0 %2195  ;;  %v2349_v18 = vadd.f32 %v5403_v14, %v5401_v24 }
 0x4fc   : > { %2350 = vadd.xlane.f32.xlu1 %v2349_v18 }
 0x4fe   : > { %v1992_v11 = vpop.permute.xlu1 %1991  ;;  %v1606_v31 = vpop.permute.xlu0 %1605 }
 0x4ff   : > { %v1624_v37 = vsel %vm273_vm8, %v1606_v31, %v5315_v17  ;;  %v1623_v9 = vsel %vm273_vm8, %v5882_v30, %v1606_v31 }
 0x500   : > { %v1640_v6 = vadd.f32 %v1624_v37, %v1540_v36  ;;  %v1639_v18 = vadd.f32 %v1623_v9, %v1539_v20  ;;  %v5884_v36 = vld [vmem:[#allocation39_spill] sm:$0xff] }
 0x502   : > { %v5416_v3 = vpop.permute.xlu1 %2003  ;;  %v1618_v35 = vpop.permute.xlu0 %1617 }
 0x503   : > { %v1628_v2 = vsel %vm273_vm8, %v1618_v35, %v5334_v21  ;;  %v1627_v31 = vsel %vm273_vm8, %v5884_v36, %v1618_v35 }
 0x504   : > { %v1644_v45 = vadd.f32 %v1628_v2, %v1544_v5 }
 0x506   : > { %v2092_v58 = vpop.permute.xlu1 %2091  ;;  %v1894_v0 = vpop.permute.xlu0 %1893 }
 0x507   : > { %v1912_v53 = vsel %vm705_vm14, %v1894_v0, %v5339_v49 }
 0x50a   : > { %v5421_v43 = vpop.permute.xlu1 %2103  ;;  %v1906_v48 = vpop.permute.xlu0 %1905 }
 0x50b   : > { %v1916_v49 = vsel %vm705_vm14, %v1906_v48, %v5364_v44 }
 0x50e   : > { %v5423_v28 = vpop.permute.xlu1 %2181  ;;  %v5425_v29 = vpop.permute.xlu0 %2279 }
 0x512   : > { %v5427_v17 = vpop.permute.xlu1 %2193  ;;  %v5429_v25 = vpop.permute.xlu0 %2291 }
 0x516   : > { %v1708_v42 = vpop.permute.xlu1 %1707  ;;  %v5431_v63 = vpop.permute.xlu0 %2283 }
 0x51a   : > { %v1720_v22 = vpop.permute.xlu1 %1719  ;;  %v1706_v32 = vpop.permute.xlu0 %1705 }
 0x51b   : > { %v1724_v57 = vsel %vm486_vm12, %v1706_v32, %v1708_v42  ;;  %v1723_v7 = vsel %vm486_vm12, %v5371_v55, %v1706_v32 }
 0x51c   : > { %v1740_v60 = vadd.f32 %v1724_v57, %v1640_v6  ;;  %v1739_v37 = vadd.f32 %v1723_v7, %v1639_v18  ;;  %v5885_v57 = vld [vmem:[#allocation40_spill] sm:$0xff] }
 0x51d   : > { %v1911_v44 = vsel %vm705_vm14, %v5885_v57, %v1894_v0 }
 0x51e   : > { %v1808_v21 = vpop.permute.xlu1 %1807  ;;  %v1718_v52 = vpop.permute.xlu0 %1717 }
 0x51f   : > { %v1728_v34 = vsel %vm486_vm12, %v1718_v52, %v1720_v22  ;;  %v1727_v55 = vsel %vm486_vm12, %v5389_v23, %v1718_v52 }
 0x520   : > { %v1744_v15 = vadd.f32 %v1728_v34, %v1644_v45  ;;  %v1643_v45 = vadd.f32 %v1627_v31, %v1543_v59 }
 0x522   : > { %v1820_v54 = vpop.permute.xlu1 %1819  ;;  %v1806_v61 = vpop.permute.xlu0 %1805  ;;  %v1743_v32 = vadd.f32 %v1727_v55, %v1643_v45 }
 0x523   : > { %v1824_v62 = vsel %vm603_vm13, %v1806_v61, %v1808_v21  ;;  %v1823_v1 = vsel %vm603_vm13, %v1804_v12, %v1806_v61 }
 0x524   : > { %v1840_v10 = vadd.f32 %v1824_v62, %v1740_v60  ;;  %v1839_v42 = vadd.f32 %v1823_v1, %v1739_v37  ;;  %v5886_v60 = vld [vmem:[#allocation41_spill] sm:$0xff]  ;;  %v5887_v37 = vld [vmem:[#allocation32_spill] sm:$0xff] }
 0x526   : > { %v1996_v19 = vpop.permute.xlu1 %1995  ;;  %v1818_v40 = vpop.permute.xlu0 %1817  ;;  %v1928_v38 = vadd.f32 %v1912_v53, %v1840_v10  ;;  %v1927_v41 = vadd.f32 %v1911_v44, %v1839_v42  ;;  %v2200_v53 = vsel %vm1041_vm2, %v5423_v28, %v5399_v4  ;;  %v2203_v4 = vsel %vm1041_vm2, %v5366_v8, %v5427_v17  ;;  %v2358_v42 = vld [vmem:[#allocation3 + $0x58] sm:$0xff] }
 0x527   : > { %v1828_v39 = vsel %vm603_vm13, %v1818_v40, %v1820_v54  ;;  %v1827_v22 = vsel %vm603_vm13, %v1816_v27, %v1818_v40  ;;  %v1915_v54 = vsel %vm705_vm14, %v5886_v60, %v1906_v48  ;;  %v2199_v48 = vsel %vm1041_vm2, %v5341_v26, %v5423_v28  ;;  %3957 = vmatprep.mubr.msk.f32.mxu1 %vm586_vm5, %v2358_v42 }
 0x528   : > { %v1844_v50 = vadd.f32 %v1828_v39, %v1744_v15  ;;  %v1843_v51 = vadd.f32 %v1827_v22, %v1743_v32  ;;  %v2204_v28 = vsel %vm1041_vm2, %v5427_v17, %v5405_v47  ;;  %v2360_v22 = vld [vmem:[%s5769_s1] sm:$0xff] }
 0x52a   : > { %v2008_v6 = vpop.permute.xlu1 %2007  ;;  %v1994_v5 = vpop.permute.xlu0 %1993  ;;  %v1932_v2 = vadd.f32 %v1916_v49, %v1844_v50  ;;  %v1931_v10 = vadd.f32 %v1915_v54, %v1843_v51 }
 0x52b   : > { %v2011_v12 = vsel %vm822_vm15, %v1992_v11, %v1994_v5  ;;  %v2012_v46 = vsel %vm822_vm15, %v1994_v5, %v1996_v19  ;;  %v5888_v5 = vld [vmem:[#allocation33_spill] sm:$0xff] }
 0x52c   : > { %v2027_v23 = vadd.f32 %v2011_v12, %v1927_v41  ;;  %v2028_v52 = vadd.f32 %v2012_v46, %v1928_v38  ;;  %v2359_v12 = vld [vmem:[#allocation3 + $0x118] sm:$0xff]  ;;  %v5889_v46 = vmov 0.0  }
 0x52e   : > { %v2096_v35 = vpop.permute.xlu1 %2095  ;;  %v2006_v21 = vpop.permute.xlu0 %2005 }
 0x52f   : > { %v2015_v27 = vsel %vm822_vm15, %v5416_v3, %v2006_v21  ;;  %v2016_v62 = vsel %vm822_vm15, %v2006_v21, %v2008_v6 }
 0x530   : > { %v2031_v20 = vadd.f32 %v2015_v27, %v1931_v10  ;;  %v2032_v13 = vadd.f32 %v2016_v62, %v1932_v2 }
 0x532   : > { %v2108_v61 = vpop.permute.xlu1 %2107  ;;  %v2094_v34 = vpop.permute.xlu0 %2093 }
 0x533   : > { %v2111_v0 = vsel %vm939_vm1, %v2092_v58, %v2094_v34  ;;  %v2112_v11 = vsel %vm939_vm1, %v2094_v34, %v2096_v35  ;;  %v5891_v34 = vmov 4  }
 0x534   : > { %v2127_v30 = vadd.f32 %v2111_v0, %v2027_v23  ;;  %v2128_v9 = vadd.f32 %v2112_v11, %v2028_v52 }
 0x536   : > { %v2282_v3 = vpop.permute.xlu1 %2281  ;;  %v2215_v16 = vadd.f32 %v2199_v48, %v2127_v30  ;;  %v2216_v15 = vadd.f32 %v2200_v53, %v2128_v9  ;;  %v2106_v19 = vpop.permute.xlu0 %2105  ;;  %v2465_v53 = vld [vmem:[#allocation3 + $0x60] sm:$0xff] }
 0x537   : > { %v2299_v58 = vsel %vm1158_vm3, %v5425_v29, %v2282_v3  ;;  %v2300_v40 = vsel %vm1158_vm3, %v2282_v3, %v5431_v63  ;;  %v2115_v38 = vsel %vm939_vm1, %v5421_v43, %v2106_v19  ;;  %v2116_v26 = vsel %vm939_vm1, %v2106_v19, %v2108_v61 }
 0x538   : > { %v2131_v7 = vadd.f32 %v2115_v38, %v2031_v20  ;;  %v2132_v39 = vadd.f32 %v2116_v26, %v2032_v13  ;;  %v2315_v18 = vadd.f32 %v2299_v58, %v2215_v16  ;;  %v2316_v29 = vadd.f32 %v2300_v40, %v2216_v15  ;;  %v2466_v20 = vld [vmem:[#allocation3 + $0x120] sm:$0xff] }
 0x539   : > { %v5890_v61 = vmov 5   ;;  %v5892_v13 = vmov 6   ;;  %v5893_v3 = vmov 7  }
 0x53a   : > { %v2294_v50 = vpop.permute.xlu1 %2293  ;;  %v2219_v36 = vadd.f32 %v2203_v4, %v2131_v7  ;;  %v2220_v63 = vadd.f32 %v2204_v28, %v2132_v39  ;;  %v2296_v31 = vpop.permute.xlu0 %2295  ;;  %v2339_v6 = vadd.f32 %v5887_v37, %v2315_v18  ;;  %v2340_v8 = vadd.f32 %v5887_v37, %v2316_v29  ;;  %v5894_v28 = vld [vmem:[#allocation24_spill] sm:$0xff]  ;;  %v5895_v29 = vld [vmem:[#allocation25_spill] sm:$0xff] }
 0x53b   : > { %v2303_v43 = vsel %vm1158_vm3, %v5429_v25, %v2294_v50  ;;  %v2304_v49 = vsel %vm1158_vm3, %v2294_v50, %v2296_v31  ;;  %v2361_v25 = vld [vmem:[%s5769_s1 + $0x8] sm:$0xff] }
 0x53c   : > { %v2319_v1 = vadd.f32 %v2303_v43, %v2219_v36  ;;  %v2320_v59 = vadd.f32 %v2304_v49, %v2220_v63  ;;  %2366 = vrot.lane.b32.xlu1 %v2361_v25, %s4337_s23  ;;  %v5896_v36 = vld [vmem:[#allocation26_spill] sm:$0xff]  ;;  %v5897_v31 = vld [vmem:[#allocation27_spill] sm:$0xff] }
 0x53e   : > { %v2343_v2 = vadd.f32 %v5888_v5, %v2319_v1  ;;  %v2344_v47 = vadd.f32 %v5888_v5, %v2320_v59 }
 0x540   : > { %v2347_v17 = vmul.f32 %v2343_v2, %v2339_v6  ;;  %v2348_v55 = vmul.f32 %v2344_v47, %v2340_v8 }
 0x542   : > { %v2352_v45 = vadd.f32 %v2348_v55, %v2347_v17 }
 0x544   : > { %2353 = vadd.xlane.f32.xlu0 %v2352_v45 }
 0x55a   : > { %2364 = vrot.lane.b32.xlu0 %v2360_v22, %s4337_s23 }
 0x589   : > { %v2351_v32 = vpop.xlane.xlu1 %2350 }
 0x58a   : > { %v2356_v21 = vmul.f32 0.00390625, %v2351_v32 }
 0x5ae   : > { %v2367_v51 = vpop.permute.xlu1 %2366 }
 0x5d1   : > { %v2354_v35 = vpop.xlane.xlu0 %2353 }
 0x5d2   : > { %v2357_v57 = vmul.f32 0.00390625, %v2354_v35 }
 0x5d4   : > { %v3964_v44 = vpack.c.bf16 %v2357_v57, %v2356_v21 }
 0x5d5   : > { %v2365_v41 = vpop.permute.xlu0 %2364 }
 0x5d6   : > { %3965 = vmatprep.subr.bf16.mxu1 %v3964_v44 }
 0x5d7   : > { %3967 = vmatpush3.bf16.msra.mxu1 %v3964_v44 }
 0x5da   : > { %3958 = vmatmul.mubr.msk.f32.vlgmr.msra.gmra.mrb[4].mxu1 %vm586_vm5, %v2359_v12 }
 0x5db   : > { %2545 = vmatprep.mubr.f32.mxu1 %v5889_v46 }
 0x6ad   : > { %v3959_v60 = vpop.f32.mrb[4].mxu1 }
 0x6ae   : > { %v2448_v54 = vadd.f32 %v3959_v60, %v2367_v51  ;;  %v2442_v23 = vpop.f32.mrb[5].mxu1 }
 0x6af   : > { %v2443_v52 = vadd.f32 %v2442_v23, %v2365_v41 }
 0x6b0   : > { %2458 = vperm.xlu0 %4132, %v2448_v54  }
 0x6b1   : > { %2453 = vperm.xlu1 %4133, %v2443_v52  }
 0x6b4   : > { %4135 = vset.pattern.permute.xlu0 %v5890_v61 }
 0x6b5   : > { %4134 = vset.pattern.permute.xlu1 %v5891_v34  ;;  %2620 = vperm.xlu0 %4135, %v2360_v22  }
 0x6b6   : > { %2468 = vperm.xlu1 %4134, %v2360_v22  }
 0x6ba   : > { %2472 = vperm.xlu1 %4134, %v2361_v25  }
 0x6be   : > { %4136 = vset.pattern.permute.xlu1 %v5890_v61 }
 0x6bf   : > { %2625 = vperm.xlu1 %4136, %v2361_v25  }
 0x72f   : > { %v2459_v27 = vpop.permute.xlu0 %2458 }
 0x730   : > { %v2463_v62 = vmul.f32 %v2459_v27, %v2347_v17  ;;  %v2464_v0 = vmul.f32 %v2459_v27, %v2348_v55  ;;  %v2454_v11 = vpop.permute.xlu1 %2453 }
 0x731   : > { %v2461_v10 = vmul.f32 %v2454_v11, %v5401_v24  ;;  %v2462_v30 = vmul.f32 %v2454_v11, %v5403_v14  ;;  %v2612_v24 = vld [vmem:[%s5769_s1 + $0x10] sm:$0xff]  ;;  %v2613_v14 = vld [vmem:[%s5769_s1 + $0x18] sm:$0xff] }
 0x732   : > { %2630 = vperm.xlu1 %4136, %v2612_v24   ;;  %2635 = vperm.xlu0 %4135, %v2613_v14  }
 0x733   : > { %v3968_v9 = vpack.c.bf16 %v2464_v0, %v2462_v30  ;;  %v3970_v48 = vpack.c.bf16 %v2463_v62, %v2461_v10 }
 0x735   : > { %3969 = vmatprep.subr.bf16.mxu1 %v3968_v9  ;;  %v2469_v16 = vpop.permute.xlu1 %2468 }
 0x736   : > { %3971 = vmatpush1.bf16.msra.mxu1 %v3970_v48  ;;  %4137 = vset.pattern.permute.xlu1 %v5892_v13 }
 0x737   : > { %4138 = vset.pattern.permute.xlu0 %v5892_v13  ;;  %2746 = vperm.xlu1 %4137, %v2360_v22  }
 0x738   : > { %2750 = vperm.xlu0 %4138, %v2361_v25  }
 0x739   : > { %3928 = vmatmul.mubr.msk.f32.vlgmr.msra.gmra.mrb[6].mxu1 %vm586_vm5, %v2465_v53  ;;  %v2473_v40 = vpop.permute.xlu1 %2472 }
 0x73a   : > { %2551 = vmatprep.mubr.f32.mxu1 %v5889_v46 }
 0x73c   : > { %4259 = vset.pattern.permute.xlu0 %v5893_v3 }
 0x73d   : > { %3929 = vmatmul.mubr.msk.f32.gmra.mrb[8].mxu1 %vm586_vm5, %v2466_v20 }
 0x73e   : > { %2714 = vmatprep.mubr.f32.mxu1 %v5889_v46 }
 0x80c   : > { %v2547_v15 = vpop.f32.mrb[6].mxu1 }
 0x80d   : > { %v2549_v19 = vpop.f32.mrb[7].mxu1  ;;  %v2548_v58 = vadd.f32 %v2547_v15, %v2469_v16 }
 0x80e   : > { %v2550_v38 = vadd.f32 %v2549_v19, %v2469_v16 }
 0x80f   : > { %v5522_v18 = vadd.f32 %v2548_v58, %v5894_v28  ;;  %v2617_v28 = vld [vmem:[#allocation3 + $0x2a8] sm:$0xff] }
 0x810   : > { %v2553_v26 = vpop.f32.mrb[8].mxu1  ;;  %v5528_v63 = vadd.f32 %v2550_v38, %v5896_v36  ;;  %v2626_v36 = vpop.permute.xlu1 %2625 }
 0x811   : > { %v2554_v7 = vadd.f32 %v2553_v26, %v2473_v40  ;;  %v2555_v39 = vpop.f32.mrb[9].mxu1 }
 0x812   : > { %v2556_v4 = vadd.f32 %v2555_v39, %v2473_v40  ;;  %v2615_v39 = vld [vmem:[#allocation3 + $0x128] sm:$0xff] }
 0x813   : > { %v5525_v50 = vadd.f32 %v2554_v7, %v5895_v29  ;;  %v2614_v7 = vld [vmem:[#allocation3 + $0x68] sm:$0xff] }
 0x814   : > { %v5531_v43 = vadd.f32 %v2556_v4, %v5897_v31  ;;  %v2616_v4 = vld [vmem:[#allocation3 + $0x1e8] sm:$0xff] }
 0x815   : > { %v2562_v49 = vadd.f32 %v5525_v50, %v5522_v18 }
 0x816   : > { %v2569_v1 = vadd.f32 %v5531_v43, %v5528_v63 }
 0x817   : > { %v2563_v59 = vrot.slane %v2562_v49, 4 }
 0x818   : > { %v2570_v37 = vrot.slane %v2569_v1, 4 }
 0x819   : > { %v2564_v6 = vadd.f32 %v2563_v59, %v2562_v49  ;;  %v2621_v59 = vpop.permute.xlu0 %2620 }
 0x81a   : > { %v2571_v8 = vadd.f32 %v2570_v37, %v2569_v1  ;;  %v2631_v37 = vpop.permute.xlu1 %2630 }
 0x81b   : > { %v2565_v5 = vrot.slane %v2564_v6, 2 }
 0x81c   : > { %v2572_v2 = vrot.slane %v2571_v8, 2 }
 0x81d   : > { %v2566_v47 = vadd.f32 %v2565_v5, %v2564_v6 }
 0x81e   : > { %v2573_v17 = vadd.f32 %v2572_v2, %v2571_v8 }
 0x81f   : > { %v2567_v55 = vrot.slane %v2566_v47, 1 }
 0x820   : > { %v2574_v45 = vrot.slane %v2573_v17, 1 }
 0x821   : > { %v2568_v42 = vadd.f32 %v2567_v55, %v2566_v47 }
 0x822   : > { %v2575_v25 = vadd.f32 %v2574_v45, %v2573_v17 }
 0x823   : > { %v2576_v22 = vmul.f32 0.0625, %v2568_v42  ;;  %v2636_v42 = vpop.permute.xlu0 %2635 }
 0x824   : > { %v2577_v32 = vmul.f32 0.0625, %v2575_v25 }
 0x825   : > { %v2578_v35 = vsub.f32 %v5522_v18, %v2576_v22  ;;  %v2580_v21 = vsub.f32 %v5525_v50, %v2576_v22 }
 0x826   : > { %v2581_v57 = vsub.f32 %v5531_v43, %v2577_v32  ;;  %v2579_v44 = vsub.f32 %v5528_v63, %v2577_v32 }
 0x827   : > { %v2582_v12 = vmul.f32 %v2578_v35, %v2578_v35  ;;  %v2584_v51 = vmul.f32 %v2580_v21, %v2580_v21 }
 0x828   : > { %v2585_v41 = vmul.f32 %v2581_v57, %v2581_v57  ;;  %v2583_v60 = vmul.f32 %v2579_v44, %v2579_v44 }
 0x829   : > { %v2586_v54 = vadd.f32 %v2584_v51, %v2582_v12 }
 0x82a   : > { %v2593_v23 = vadd.f32 %v2585_v41, %v2583_v60  ;;  %v2743_v60 = vld [vmem:[#allocation3 + $0x70] sm:$0xff] }
 0x82b   : > { %v2587_v52 = vrot.slane %v2586_v54, 4 }
 0x82c   : > { %v2594_v61 = vrot.slane %v2593_v23, 4 }
 0x82d   : > { %v2588_v34 = vadd.f32 %v2587_v52, %v2586_v54  ;;  %v2744_v54 = vld [vmem:[#allocation3 + $0x130] sm:$0xff] }
 0x82e   : > { %v2595_v27 = vadd.f32 %v2594_v61, %v2593_v23  ;;  %v2747_v23 = vpop.permute.xlu1 %2746 }
 0x82f   : > { %v2589_v62 = vrot.slane %v2588_v34, 2 }
 0x830   : > { %v2596_v0 = vrot.slane %v2595_v27, 2 }
 0x831   : > { %v2590_v11 = vadd.f32 %v2589_v62, %v2588_v34 }
 0x832   : > { %v2597_v10 = vadd.f32 %v2596_v0, %v2595_v27  ;;  %v2751_v27 = vpop.permute.xlu0 %2750 }
 0x833   : > { %v2591_v30 = vrot.slane %v2590_v11, 1 }
 0x834   : > { %v2598_v9 = vrot.slane %v2597_v10, 1 }
 0x835   : > { %v2592_v48 = vadd.f32 %v2591_v30, %v2590_v11 }
 0x836   : > { %v2599_v53 = vadd.f32 %v2598_v9, %v2597_v10 }
 0x837   : > { %v2600_v20 = vmul.f32 0.0625, %v2592_v48 }
 0x838   : > { %v2601_v24 = vmul.f32 0.0625, %v2599_v53 }
 0x839   : > { %v2602_v14 = vadd.f32 1e-06, %v2600_v20 }
 0x83a   : > { %v2603_v13 = vadd.f32 1e-06, %v2601_v24 }
 0x83b   : > { %4265 = vrsqrt.f32 %v2602_v14 }
 0x83c   : > { %4267 = vrsqrt.f32 %v2603_v13 }
 0x845   : > { %v4266_v3 = vpop.eup %4265 }
 0x846   : > { %v4268_v16 = vpop.eup %4267  ;;  %v2608_v15 = vmul.f32 %v4266_v3, %v2580_v21  ;;  %v2606_v19 = vmul.f32 %v4266_v3, %v2578_v35 }
 0x847   : > { %v2607_v58 = vmul.f32 %v4268_v16, %v2579_v44  ;;  %v2609_v40 = vmul.f32 %v4268_v16, %v2581_v57 }
 0x848   : > { %v3974_v26 = vpack.c.bf16 %v2608_v15, %v2606_v19 }
 0x849   : > { %v3972_v38 = vpack.c.bf16 %v2609_v40, %v2607_v58 }
 0x84b   : > { %3973 = vmatprep.subr.bf16.mxu1 %v3972_v38 }
 0x84c   : > { %3975 = vmatpush1.bf16.msra.mxu1 %v3974_v26  ;;  %v5898_v26 = vld [vmem:[#allocation10_spill] sm:$0xff] }
 0x84f   : > { %3930 = vmatmul.mubr.msk.f32.vlgmr.msra.gmra.mrb[10].mxu1 %vm586_vm5, %v2614_v7 }
 0x850   : > { %2720 = vmatprep.mubr.f32.mxu1 %v5889_v46 }
 0x853   : > { %3931 = vmatmul.mubr.msk.f32.gmra.mrb[12].mxu1 %vm586_vm5, %v2615_v39 }
 0x854   : > { %2726 = vmatprep.mubr.f32.mxu1 %v5889_v46 }
 0x857   : > { %3932 = vmatmul.mubr.msk.f32.gmra.mrb[14].mxu1 %vm586_vm5, %v2616_v4  ;;  %v5899_v4 = vld [vmem:[#allocation11_spill] sm:$0xff] }
 0x858   : > { %2732 = vmatprep.mubr.f32.mxu1 %v5889_v46 }
 0x85b   : > { %3933 = vmatmul.mubr.msk.f32.gmra.mrb[16].mxu1 %vm586_vm5, %v2617_v28 }
 0x85c   : > { %2823 = vmatprep.mubr.f32.mxu1 %v5889_v46 }
 0x922   : > { %v2716_v29 = vpop.f32.mrb[10].mxu1 }
 0x923   : > { %v2718_v31 = vpop.f32.mrb[11].mxu1  ;;  %v2717_v8 = vadd.f32 %v2716_v29, %v2621_v59 }
 0x924   : > { %v2719_v47 = vadd.f32 %v2718_v31, %v2621_v59  ;;  %v5900_v31 = vld [vmem:[#allocation9_spill] sm:$0xff] }
 0x926   : > { %v2722_v49 = vpop.f32.mrb[12].mxu1 }
 0x927   : > { %v2724_v1 = vpop.f32.mrb[13].mxu1  ;;  %v2723_v22 = vadd.f32 %v2722_v49, %v2626_v36 }
 0x928   : > { %v2725_v21 = vadd.f32 %v2724_v1, %v2626_v36  ;;  %v5901_v1 = vld [vmem:[#allocation13_spill] sm:$0xff] }
 0x92a   : > { %v2728_v6 = vpop.f32.mrb[14].mxu1 }
 0x92b   : > { %v2729_v5 = vadd.f32 %v2728_v6, %v2631_v37  ;;  %v2730_v2 = vpop.f32.mrb[15].mxu1 }
 0x92c   : > { %v2731_v17 = vadd.f32 %v2730_v2, %v2631_v37 }
 0x92d   : > { %v2739_v55 = vmul.f32 %v2729_v5, %v2717_v8 }
 0x92e   : > { %v2740_v45 = vmul.f32 %v2731_v17, %v2719_v47  ;;  %v2734_v25 = vpop.f32.mrb[16].mxu1  ;;  %v5902_v47 = vld [vmem:[#allocation14_spill] sm:$0xff] }
 0x92f   : > { %v2735_v32 = vadd.f32 %v2734_v25, %v2636_v42  ;;  %v2736_v35 = vpop.f32.mrb[17].mxu1 }
 0x930   : > { %v2737_v57 = vadd.f32 %v2736_v35, %v2636_v42 }
 0x931   : > { %v2741_v44 = vmul.f32 %v2735_v32, %v2723_v22 }
 0x932   : > { %v2742_v12 = vmul.f32 %v2737_v57, %v2725_v21 }
 0x933   : > { %v3978_v51 = vpack.c.bf16 %v2741_v44, %v2739_v55  ;;  %v5904_v44 = vld [vmem:[#allocation15_spill] sm:$0xff] }
 0x934   : > { %v3976_v41 = vpack.c.bf16 %v2742_v12, %v2740_v45 }
 0x936   : > { %3977 = vmatprep.subr.bf16.mxu1 %v3976_v41 }
 0x937   : > { %3979 = vmatpush1.bf16.msra.mxu1 %v3978_v51  ;;  %v5905_v51 = vld [vmem:[#allocation17_spill] sm:$0xff] }
 0x93a   : > { %3934 = vmatmul.mubr.msk.f32.vlgmr.msra.gmra.mrb[18].mxu1 %vm586_vm5, %v2743_v60 }
 0x93b   : > { %2829 = vmatprep.mubr.f32.mxu1 %v5889_v46 }
 0x93e   : > { %3935 = vmatmul.mubr.msk.f32.gmra.mrb[20].mxu1 %vm586_vm5, %v2744_v54 }
 0x93f   : > { %2972 = vmatprep.mubr.f32.mxu1 %v5889_v46 }
 0xa0d   : > { %v2825_v52 = vpop.f32.mrb[18].mxu1 }
 0xa0e   : > { %v2826_v61 = vadd.f32 %v2825_v52, %v2747_v23  ;;  %v2827_v34 = vpop.f32.mrb[19].mxu1 }
 0xa0f   : > { %v2828_v0 = vadd.f32 %v2827_v34, %v2747_v23  ;;  %v5906_v23 = vld [vmem:[#allocation16_spill] sm:$0xff] }
 0xa10   : > { %v2836_v62 = vadd.f32 %v2826_v61, %v5522_v18 }
 0xa11   : > { %v2831_v11 = vpop.f32.mrb[20].mxu1  ;;  %v2837_v9 = vadd.f32 %v2828_v0, %v5528_v63  ;;  %v5907_v0 = vld [vmem:[#allocation18_spill] sm:$0xff] }
 0xa12   : > { %v2832_v10 = vadd.f32 %v2831_v11, %v2751_v27  ;;  %v2833_v30 = vpop.f32.mrb[21].mxu1  ;;  %2845 = vrot.lane.b32.xlu1 %v2836_v62, %s4314_s13 }
 0xa13   : > { %v2834_v53 = vadd.f32 %v2833_v30, %v2751_v27  ;;  %v5908_v30 = vld [vmem:[#allocation20_spill] sm:$0xff] }
 0xa14   : > { %v2838_v48 = vadd.f32 %v2832_v10, %v5525_v50 }
 0xa15   : > { %v2839_v20 = vadd.f32 %v2834_v53, %v5531_v43 }
 0xa16   : > { %2847 = vrot.lane.b32.xlu1 %v2837_v9, %s4314_s13  ;;  %2849 = vrot.lane.b32.xlu0 %v2838_v48, %s4314_s13 }
 0xa1a   : > { %2851 = vrot.lane.b32.xlu1 %v2839_v20, %s4314_s13 }
 0xa84   : > { %v2846_v18 = vpop.permute.xlu1 %2845 }
 0xa85   : > { %2861 = vst.msk [vmem:[#allocation2] sm:$0xff] %vm1488_vm4, %v2846_v18 }
 0xa88   : > { %v2848_v24 = vpop.permute.xlu1 %2847  ;;  %v2850_v14 = vpop.permute.xlu0 %2849 }
 0xa89   : > { %v5563_v13 = vsel %vm213_vm0, %v2846_v18, %v2848_v24  ;;  %2863 = vst.msk [vmem:[#allocation2 + $0x10] sm:$0xff] %vm213_vm0, %v2848_v24  ;;  %v5909_v18 = vld [vmem:[#allocation19_spill] sm:$0xff] }
 0xa8a   : > { %2864 = vst.msk [vmem:[#allocation2 + $0x18] sm:$0xff] %vm1488_vm4, %v2850_v14  ;;  %2862 = vst [vmem:[#allocation2 + $0x8] sm:$0xff] %v5563_v13  ;;  %v3055_v28 = vmul.f32 %v5563_v13, %v5899_v4  ;;  %v5609_v36 = vmul.f32 %v5563_v13, %v5873_v33  ;;  %v3164_v17 = vmul.f32 %v5563_v13, %v5902_v47 }
 0xa8b   : > { %v3370_v41 = vmul.f32 %v5563_v13, %v5905_v51  ;;  %v3479_v9 = vmul.f32 %v5563_v13, %v5908_v30 }
 0xa8c   : > { %v2852_v50 = vpop.permute.xlu1 %2851  ;;  %v5582_v15 = vld [vmem:[#allocation2] sm:$0xff] }
 0xa8d   : > { %v5569_v63 = vsel %vm213_vm0, %v2850_v14, %v2852_v50  ;;  %2866 = vst.msk [vmem:[#allocation2 + $0x28] sm:$0xff] %vm213_vm0, %v2852_v50  ;;  %v5617_v37 = vmul.f32 %v5582_v15, %v5880_v56  ;;  %v3369_v34 = vmul.f32 %v5582_v15, %v5906_v23  ;;  %v3478_v14 = vmul.f32 %v5582_v15, %v5909_v18 }
 0xa8e   : > { %v5588_v58 = vmul.f32 %v5569_v63, %v5873_v33  ;;  %v3058_v29 = vmul.f32 %v5569_v63, %v5899_v4  ;;  %v3054_v33 = vmul.f32 %v5582_v15, %v5900_v31  ;;  %v3167_v32 = vmul.f32 %v5569_v63, %v5902_v47  ;;  %v5911_v4 = vld [vmem:[#allocation23_spill] sm:$0xff] }
 0xa8f   : > { %v3373_v61 = vmul.f32 %v5569_v63, %v5905_v51  ;;  %v3482_v48 = vmul.f32 %v5569_v63, %v5908_v30 }
 0xa90   : > { %v5572_v43 = vld [vmem:[#allocation2 + $0x10] sm:$0xff]  ;;  %v3984_v5 = vpack.c.bf16 %v5588_v58, %v5609_v36 }
 0xa91   : > { %v5576_v3 = vpack.i.bf16 %v5572_v43, %v5563_v13  ;;  %v5578_v16 = vld [vmem:[#allocation2 + $0x18] sm:$0xff]  ;;  %v3056_v7 = vmul.f32 %v5572_v43, %v5898_v26  ;;  %v3165_v59 = vmul.f32 %v5572_v43, %v5901_v1  ;;  %v3371_v12 = vmul.f32 %v5572_v43, %v5904_v44 }
 0xa92   : > { %v5592_v40 = vpack.i.bf16 %v5578_v16, %v5582_v15  ;;  %v3057_v49 = vmul.f32 %v5578_v16, %v5900_v31  ;;  %v5623_v2 = vmul.f32 %v5578_v16, %v5880_v56  ;;  %v5903_v56 = vld [vmem:[#allocation12_spill] sm:$0xff]  ;;  %v3372_v52 = vmul.f32 %v5578_v16, %v5906_v23 }
 0xa93   : > { %4140 = vrot.lane.b32.xlu0 %v5576_v3, %s4319_s22  ;;  %v4154_v6 = vpack.i.bf16 %v3056_v7, %v3055_v28  ;;  %v4169_v42 = vpack.i.bf16 %v3165_v59, %v3164_v17  ;;  %v3166_v22 = vmul.f32 %v5578_v16, %v5903_v56  ;;  %v3163_v35 = vmul.f32 %v5582_v15, %v5903_v56 }
 0xa94   : > { %v5584_v19 = vld [vmem:[#allocation2 + $0x28] sm:$0xff]  ;;  %v3986_v55 = vpack.c.bf16 %v5623_v2, %v5617_v37  ;;  %v4164_v45 = vpack.i.bf16 %v3057_v49, %v3054_v33  ;;  %v4199_v60 = vpack.i.bf16 %v3371_v12, %v3370_v41  ;;  %v4209_v62 = vpack.i.bf16 %v3372_v52, %v3369_v34  ;;  %v2876_v12 = vld [vmem:[#allocation3 + $0x80] sm:$0x7] }
 0xa95   : > { %v4144_v38 = vpack.i.bf16 %v5584_v19, %v5569_v63  ;;  %v3059_v39 = vmul.f32 %v5584_v19, %v5898_v26  ;;  %v3168_v25 = vmul.f32 %v5584_v19, %v5901_v1  ;;  %v4179_v57 = vpack.i.bf16 %v3166_v22, %v3163_v35  ;;  %v5910_v26 = vld [vmem:[#allocation22_spill] sm:$0xff] }
 0xa96   : > { %v3374_v54 = vmul.f32 %v5584_v19, %v5904_v44  ;;  %v3480_v11 = vmul.f32 %v5572_v43, %v5907_v0  ;;  %v3483_v10 = vmul.f32 %v5584_v19, %v5907_v0  ;;  %v3481_v24 = vmul.f32 %v5578_v16, %v5909_v18 }
 0xa97   : > { %4150 = vrot.lane.b32.xlu0 %v5592_v40, %s4319_s22  ;;  %4145 = vrot.lane.b32.xlu1 %v4144_v38, %s4319_s22  ;;  %v4159_v8 = vpack.i.bf16 %v3059_v39, %v3058_v29  ;;  %v4174_v21 = vpack.i.bf16 %v3168_v25, %v3167_v32  ;;  %v3686_v7 = vmul.f32 %v5572_v43, %v5910_v26 }
 0xa98   : > { %v4204_v27 = vpack.i.bf16 %v3374_v54, %v3373_v61  ;;  %v4214_v53 = vpack.i.bf16 %v3480_v11, %v3479_v9  ;;  %v4219_v20 = vpack.i.bf16 %v3483_v10, %v3482_v48  ;;  %v4224_v50 = vpack.i.bf16 %v3481_v24, %v3478_v14 }
 0xa99   : > { %v3689_v39 = vmul.f32 %v5584_v19, %v5910_v26  ;;  %v3685_v28 = vmul.f32 %v5563_v13, %v5911_v4  ;;  %v3688_v29 = vmul.f32 %v5569_v63, %v5911_v4  ;;  %v2840_v13 = vld [vmem:[%s5769_s1] sm:$0x7] }
 0xa9b   : > { %4155 = vrot.lane.b32.xlu1 %v4154_v6, %s4321_s24  ;;  %4160 = vrot.lane.b32.xlu0 %v4159_v8, %s4321_s24  ;;  %v4244_v31 = vpack.i.bf16 %v3686_v7, %v3685_v28  ;;  %v4249_v49 = vpack.i.bf16 %v3689_v39, %v3688_v29  ;;  %v3053_v28 = vld [vmem:[#allocation3 + $0x88] sm:$0x7] }
 0xa9f   : > { %4165 = vrot.lane.b32.xlu1 %v4164_v45, %s4321_s24  ;;  %4170 = vrot.lane.b32.xlu0 %v4169_v42, %s4322_s25 }
 0xaa3   : > { %4175 = vrot.lane.b32.xlu1 %v4174_v21, %s4322_s25  ;;  %4180 = vrot.lane.b32.xlu0 %v4179_v57, %s4322_s25 }
 0xaa7   : > { %4185 = vrot.lane.b32.xlu1 %v5576_v3, %s4323_s26  ;;  %4190 = vrot.lane.b32.xlu0 %v4144_v38, %s4323_s26 }
 0xaab   : > { %4195 = vrot.lane.b32.xlu1 %v5592_v40, %s4323_s26  ;;  %4200 = vrot.lane.b32.xlu0 %v4199_v60, %s4324_s27  ;;  %s212_s26 = scalar_lea.vmem %s5772_s4, %s3947_s7 }
 0xaaf   : > { %4205 = vrot.lane.b32.xlu1 %v4204_v27, %s4324_s27  ;;  %4210 = vrot.lane.b32.xlu0 %v4209_v62, %s4324_s27 }
 0xab3   : > { %4215 = vrot.lane.b32.xlu1 %v4214_v53, %s4325_s28  ;;  %4220 = vrot.lane.b32.xlu0 %v4219_v20, %s4325_s28 }
 0xab7   : > { %4225 = vrot.lane.b32.xlu1 %v4224_v50, %s4325_s28  ;;  %4230 = vrot.lane.b32.xlu0 %v5576_v3, %s4326_s29  ;;  %v5912_v3 = vld [vmem:[#allocation21_spill] sm:$0xff] }
 0xab8   : > { %v3687_v1 = vmul.f32 %v5578_v16, %v5912_v3  ;;  %v3684_v43 = vmul.f32 %v5582_v15, %v5912_v3 }
 0xaba   : > { %v4254_v19 = vpack.i.bf16 %v3687_v1, %v3684_v43 }
 0xabb   : > { %4235 = vrot.lane.b32.xlu1 %v4144_v38, %s4326_s29  ;;  %4240 = vrot.lane.b32.xlu0 %v5592_v40, %s4326_s29 }
 0xabf   : > { %4245 = vrot.lane.b32.xlu1 %v4244_v31, %s4328_s30  ;;  %4250 = vrot.lane.b32.xlu0 %v4249_v49, %s4328_s30 }
 0xac3   : > { %4255 = vrot.lane.b32.xlu1 %v4254_v19, %s4328_s30  ;;  %3794 = vperm.xlu0 %4259, %v2840_v13  }
 0xb05   : > { %v4141_v63 = vpop.permute.xlu0 %4140 }
 0xb06   : > { %v4143_v40 = vunpack.i.h.bf16 %v4141_v63  ;;  %v4142_v38 = vunpack.i.l.bf16 %v4141_v63 }
 0xb08   : > { %v2898_v45 = vsel %vm273_vm8, %v4142_v38, %v4143_v40 }
 0xb09   : > { %v4146_v59 = vpop.permute.xlu1 %4145  ;;  %v4151_v16 = vpop.permute.xlu0 %4150 }
 0xb0a   : > { %v4148_v6 = vunpack.i.h.bf16 %v4146_v59  ;;  %v4147_v8 = vunpack.i.l.bf16 %v4146_v59  ;;  %v4153_v33 = vunpack.i.h.bf16 %v4151_v16  ;;  %v4152_v47 = vunpack.i.l.bf16 %v4151_v16 }
 0xb0c   : > { %v2899_v17 = vsel %vm273_vm8, %v4153_v33, %v4147_v8  ;;  %v2897_v15 = vsel %vm273_vm8, %v4152_v47, %v4142_v38  ;;  %v2900_v42 = vsel %vm273_vm8, %v4147_v8, %v4148_v6  ;;  %v3162_v47 = vld [vmem:[#allocation3 + $0x90] sm:$0x7] }
 0xb0d   : > { %v3982_v25 = vpack.c.bf16 %v2899_v17, %v2897_v15  ;;  %v4156_v56 = vpop.permute.xlu1 %4155  ;;  %v4161_v22 = vpop.permute.xlu0 %4160  ;;  %v3980_v32 = vpack.c.bf16 %v2900_v42, %v2898_v45 }
 0xb0e   : > { %v4158_v35 = vunpack.i.h.bf16 %v4156_v56  ;;  %v4157_v21 = vunpack.i.l.bf16 %v4156_v56  ;;  %v4163_v57 = vunpack.i.h.bf16 %v4161_v22  ;;  %v4162_v44 = vunpack.i.l.bf16 %v4161_v22 }
 0xb0f   : > { %3981 = vmatprep.subr.bf16.mxu1 %v3980_v32 }
 0xb10   : > { %3983 = vmatpush1.bf16.msra.mxu1 %v3982_v25  ;;  %v3079_v51 = vsel %vm486_vm12, %v4157_v21, %v4158_v35  ;;  %v3081_v41 = vsel %vm486_vm12, %v4162_v44, %v4163_v57 }
 0xb11   : > { %v4166_v60 = vpop.permute.xlu1 %4165  ;;  %v4171_v54 = vpop.permute.xlu0 %4170  ;;  %3985 = vmatprep.subr.bf16.mxu1 %v3984_v5  ;;  %v3988_v61 = vpack.c.bf16 %v3081_v41, %v3079_v51  ;;  %v2867_v5 = vld [vmem:[#allocation3 + $0x78] sm:$0x7] }
 0xb12   : > { %v4168_v23 = vunpack.i.h.bf16 %v4166_v60  ;;  %v4167_v52 = vunpack.i.l.bf16 %v4166_v60  ;;  %v4173_v34 = vunpack.i.h.bf16 %v4171_v54  ;;  %v4172_v27 = vunpack.i.l.bf16 %v4171_v54  ;;  %v3271_v41 = vld [vmem:[#allocation3 + $0x98] sm:$0x7] }
 0xb13   : > { %3936 = vmatmul.mubr.msk.f32.vlgmr.msra.gmra.mrb[22].mxu1 %vm586_vm5, %v2876_v12 }
 0xb14   : > { %3987 = vmatpush1.bf16.msra.mxu1 %v3986_v55  ;;  %3046 = vmatprep.mubr.f32.mxu1 %v5889_v46  ;;  %v3078_v58 = vsel %vm486_vm12, %v4167_v52, %v4157_v21  ;;  %v3080_v36 = vsel %vm486_vm12, %v4168_v23, %v4162_v44  ;;  %v3188_v30 = vsel %vm603_vm13, %v4172_v27, %v4173_v34 }
 0xb15   : > { %v4176_v62 = vpop.permute.xlu1 %4175  ;;  %v4181_v0 = vpop.permute.xlu0 %4180  ;;  %3989 = vmatprep.subr.bf16.mxu1 %v3988_v61  ;;  %v3990_v2 = vpack.c.bf16 %v3080_v36, %v3078_v58 }
 0xb16   : > { %v4178_v11 = vunpack.i.h.bf16 %v4176_v62  ;;  %v4177_v10 = vunpack.i.l.bf16 %v4176_v62  ;;  %v4183_v55 = vunpack.i.h.bf16 %v4181_v0  ;;  %v4182_v20 = vunpack.i.l.bf16 %v4181_v0 }
 0xb18   : > { %v3190_v9 = vsel %vm603_vm13, %v4177_v10, %v4178_v11  ;;  %v3189_v39 = vsel %vm603_vm13, %v4183_v55, %v4177_v10  ;;  %v3187_v4 = vsel %vm603_vm13, %v4182_v20, %v4172_v27 }
 0xb19   : > { %v4186_v48 = vpop.permute.xlu1 %4185  ;;  %v4191_v53 = vpop.permute.xlu0 %4190  ;;  %v3992_v37 = vpack.c.bf16 %v3190_v9, %v3188_v30  ;;  %v3994_v1 = vpack.c.bf16 %v3189_v39, %v3187_v4  ;;  %v3368_v30 = vld [vmem:[#allocation3 + $0xa0] sm:$0x7] }
 0xb1a   : > { %v4188_v18 = vunpack.i.h.bf16 %v4186_v48  ;;  %v4187_v24 = vunpack.i.l.bf16 %v4186_v48  ;;  %v4193_v14 = vunpack.i.h.bf16 %v4191_v53  ;;  %v4192_v50 = vunpack.i.l.bf16 %v4191_v53 }
 0xb1b   : > { %3937 = vmatmul.mubr.msk.f32.vlgmr.msra.gmra.mrb[22].mxu1 %vm586_vm5, %v2867_v5 }
 0xb1c   : > { %3991 = vmatpush1.bf16.msra.mxu1 %v3990_v2  ;;  %3153 = vmatprep.mubr.f32.mxu1 %v5889_v46  ;;  %v3285_v29 = vsel %vm705_vm14, %v4187_v24, %v4188_v18  ;;  %v3287_v31 = vsel %vm705_vm14, %v4192_v50, %v4193_v14 }
 0xb1d   : > { %3993 = vmatprep.subr.bf16.mxu1 %v3992_v37  ;;  %v4196_v26 = vpop.permute.xlu1 %4195  ;;  %v4201_v7 = vpop.permute.xlu0 %4200  ;;  %v3996_v13 = vpack.c.bf16 %v3287_v31, %v3285_v29 }
 0xb1e   : > { %v4198_v43 = vunpack.i.h.bf16 %v4196_v26  ;;  %v4197_v19 = vunpack.i.l.bf16 %v4196_v26  ;;  %v4203_v59 = vunpack.i.h.bf16 %v4201_v7  ;;  %v4202_v16 = vunpack.i.l.bf16 %v4201_v7 }
 0xb20   : > { %v3284_v6 = vsel %vm705_vm14, %v4197_v19, %v4187_v24  ;;  %v3286_v8 = vsel %vm705_vm14, %v4198_v43, %v4192_v50  ;;  %v3394_v45 = vsel %vm822_vm15, %v4202_v16, %v4203_v59 }
 0xb21   : > { %v4206_v49 = vpop.permute.xlu1 %4205  ;;  %v4211_v3 = vpop.permute.xlu0 %4210  ;;  %v3998_v15 = vpack.c.bf16 %v3286_v8, %v3284_v6 }
 0xb22   : > { %v4208_v63 = vunpack.i.h.bf16 %v4206_v49  ;;  %v4207_v40 = vunpack.i.l.bf16 %v4206_v49  ;;  %v4213_v42 = vunpack.i.h.bf16 %v4211_v3  ;;  %v4212_v25 = vunpack.i.l.bf16 %v4211_v3 }
 0xb23   : > { %3938 = vmatmul.mubr.msk.f32.vlgmr.msra.gmra.mrb[22].mxu1 %vm586_vm5, %v3053_v28  ;;  %v3477_v28 = vld [vmem:[#allocation3 + $0xa8] sm:$0x7] }
 0xb24   : > { %3995 = vmatpush1.bf16.msra.mxu1 %v3994_v1  ;;  %3262 = vmatprep.mubr.f32.mxu1 %v5889_v46  ;;  %v3396_v17 = vsel %vm822_vm15, %v4207_v40, %v4208_v63  ;;  %v3395_v12 = vsel %vm822_vm15, %v4213_v42, %v4207_v40  ;;  %v3393_v51 = vsel %vm822_vm15, %v4212_v25, %v4202_v16  ;;  %v3586_v63 = vld [vmem:[#allocation3 + $0xb0] sm:$0x7] }
 0xb25   : > { %3997 = vmatprep.subr.bf16.mxu1 %v3996_v13  ;;  %v4216_v38 = vpop.permute.xlu1 %4215  ;;  %v4221_v33 = vpop.permute.xlu0 %4220  ;;  %v4000_v22 = vpack.c.bf16 %v3396_v17, %v3394_v45  ;;  %v4002_v52 = vpack.c.bf16 %v3395_v12, %v3393_v51 }
 0xb26   : > { %v4218_v32 = vunpack.i.h.bf16 %v4216_v38  ;;  %v4217_v35 = vunpack.i.l.bf16 %v4216_v38  ;;  %v4223_v21 = vunpack.i.h.bf16 %v4221_v33  ;;  %v4222_v57 = vunpack.i.l.bf16 %v4221_v33  ;;  %v3683_v38 = vld [vmem:[#allocation3 + $0xb8] sm:$0x7] }
 0xb28   : > { %v3503_v60 = vsel %vm939_vm1, %v4217_v35, %v4218_v32  ;;  %v3505_v54 = vsel %vm939_vm1, %v4222_v57, %v4223_v21 }
 0xb29   : > { %v4226_v56 = vpop.permute.xlu1 %4225  ;;  %v4231_v44 = vpop.permute.xlu0 %4230  ;;  %v4004_v62 = vpack.c.bf16 %v3505_v54, %v3503_v60 }
 0xb2a   : > { %v4228_v61 = vunpack.i.h.bf16 %v4226_v56  ;;  %v4227_v34 = vunpack.i.l.bf16 %v4226_v56  ;;  %v4233_v10 = vunpack.i.h.bf16 %v4231_v44  ;;  %v4232_v58 = vunpack.i.l.bf16 %v4231_v44 }
 0xb2b   : > { %3939 = vmatmul.mubr.msk.f32.vlgmr.msra.gmra.mrb[22].mxu1 %vm586_vm5, %v3162_v47  ;;  %v4269_v47 = vld [vmem:[%s4432_s10] sm:$0x77] }
 0xb2c   : > { %3999 = vmatpush1.bf16.msra.mxu1 %v3998_v15  ;;  %3359 = vmatprep.mubr.f32.mxu1 %v5889_v46  ;;  %v3502_v36 = vsel %vm939_vm1, %v4227_v34, %v4217_v35  ;;  %v3504_v5 = vsel %vm939_vm1, %v4228_v61, %v4222_v57  ;;  %v3600_v2 = vsel %vm1041_vm2, %v4232_v58, %v4233_v10  ;;  %v5913_v15 = vld [vmem:[#allocation6_spill] sm:$0xff] }
 0xb2d   : > { %4001 = vmatprep.subr.bf16.mxu1 %v4000_v22  ;;  %v4236_v23 = vpop.permute.xlu1 %4235  ;;  %v4241_v27 = vpop.permute.xlu0 %4240  ;;  %v4006_v37 = vpack.c.bf16 %v3504_v5, %v3502_v36 }
 0xb2e   : > { %v4238_v0 = vunpack.i.h.bf16 %v4236_v23  ;;  %v4237_v11 = vunpack.i.l.bf16 %v4236_v23  ;;  %v4243_v55 = vunpack.i.h.bf16 %v4241_v27  ;;  %v4242_v20 = vunpack.i.l.bf16 %v4241_v27 }
 0xb30   : > { %v3602_v9 = vsel %vm1041_vm2, %v4237_v11, %v4238_v0  ;;  %v3601_v7 = vsel %vm1041_vm2, %v4243_v55, %v4237_v11  ;;  %v3599_v39 = vsel %vm1041_vm2, %v4242_v20, %v4232_v58 }
 0xb31   : > { %v4246_v48 = vpop.permute.xlu1 %4245  ;;  %v4251_v53 = vpop.permute.xlu0 %4250  ;;  %v4008_v18 = vpack.c.bf16 %v3602_v9, %v3600_v2  ;;  %v4010_v49 = vpack.c.bf16 %v3601_v7, %v3599_v39 }
 0xb32   : > { %v4248_v24 = vunpack.i.h.bf16 %v4246_v48  ;;  %v4247_v14 = vunpack.i.l.bf16 %v4246_v48  ;;  %v4253_v50 = vunpack.i.h.bf16 %v4251_v53  ;;  %v4252_v26 = vunpack.i.l.bf16 %v4251_v53 }
 0xb33   : > { %3940 = vmatmul.mubr.msk.f32.vlgmr.msra.gmra.mrb[22].mxu1 %vm586_vm5, %v3271_v41 }
 0xb34   : > { %4003 = vmatpush1.bf16.msra.mxu1 %v4002_v52  ;;  %3468 = vmatprep.mubr.f32.mxu1 %v5889_v46  ;;  %v3709_v29 = vsel %vm1158_vm3, %v4247_v14, %v4248_v24  ;;  %v3711_v31 = vsel %vm1158_vm3, %v4252_v26, %v4253_v50 }
 0xb35   : > { %4005 = vmatprep.subr.bf16.mxu1 %v4004_v62  ;;  %v4256_v4 = vpop.permute.xlu1 %4255  ;;  %v4012_v43 = vpack.c.bf16 %v3711_v31, %v3709_v29 }
 0xb36   : > { %v4258_v3 = vunpack.i.h.bf16 %v4256_v4  ;;  %v4257_v1 = vunpack.i.l.bf16 %v4256_v4 }
 0xb38   : > { %v3708_v19 = vsel %vm1158_vm3, %v4257_v1, %v4247_v14  ;;  %v3710_v13 = vsel %vm1158_vm3, %v4258_v3, %v4252_v26 }
 0xb39   : > { %v4014_v40 = vpack.c.bf16 %v3710_v13, %v3708_v19 }
 0xb3b   : > { %3941 = vmatmul.mubr.msk.f32.vlgmr.msra.gmra.mrb[22].mxu1 %vm586_vm5, %v3368_v30 }
 0xb3c   : > { %4007 = vmatpush1.bf16.msra.mxu1 %v4006_v37  ;;  %3577 = vmatprep.mubr.f32.mxu1 %v5889_v46 }
 0xb3d   : > { %4009 = vmatprep.subr.bf16.mxu1 %v4008_v18 }
 0xb42   : > { %v3795_v59 = vpop.permute.xlu0 %3794 }
 0xb43   : > { %3942 = vmatmul.mubr.msk.f32.vlgmr.msra.gmra.mrb[22].mxu1 %vm586_vm5, %v3477_v28 }
 0xb44   : > { %4011 = vmatpush1.bf16.msra.mxu1 %v4010_v49  ;;  %3674 = vmatprep.mubr.f32.mxu1 %v5889_v46 }
 0xb45   : > { %4013 = vmatprep.subr.bf16.mxu1 %v4012_v43 }
 0xb4b   : > { %3943 = vmatmul.mubr.msk.f32.vlgmr.msra.gmra.mrb[22].mxu1 %vm586_vm5, %v3586_v63 }
 0xb4c   : > { %4015 = vmatpush1.bf16.msra.mxu1 %v4014_v40  ;;  %3783 = vmatprep.mubr.f32.mxu1 %v5889_v46 }
 0xb53   : > { %3944 = vmatmul.mubr.msk.f32.vlgmr.msra.gmra.mrb[22].mxu1 %vm586_vm5, %v3683_v38 }
 0xc26   : > { %v3785_v16 = vpop.f32.mrb[22].mxu1 }
 0xc27   : > { %v3797_v6 = vadd.f32 %v3795_v59, %v3785_v16  ;;  %v3787_v8 = vpop.f32.mrb[23].mxu1 }
 0xc28   : > { %v3798_v33 = vadd.f32 %v3795_v59, %v3787_v8 }
 0xc29   : > { %v3800_v17 = vadd.f32 %v4269_v47, %v3797_v6 }
 0xc2a   : > { %v3801_v45 = vadd.f32 %v3798_v33, %v5913_v15 }
 0xc2c   : > { %v3804_v42 = vcombine.low %v3800_v17, %v3801_v45 }
 0xc2e   : > { %3806 = vst [vmem:[%s212_s26] sm:$0x77] %v3804_v42 }
 0xc2f PF: > { %s15_s15 = sadd.s32 1, %s4308_s15  }
 0xc30   : > { %p12_p3 = scmp.ge.s32.totalorder %s15_s15, 4  }
 0xc32   :  { %14 = sbr.rel (!%p12_p3) target bundleno = 1 (0x1), region = 72 }
 0xc39   :  { %3828 = vsyncpa [#allocation4], 1 }
 0xc3a   :  { %3830 = vsyncpa [#allocation4 + $0x1], 1 }

</bundles_post_ra>
